<compile_context>
chip_gen: v7x
topology: tpu7x:2x2x1
jax: 0.10.0
libtpu: 0.0.40
codegen_flags: <defaults>
</compile_context>

<pallas_src>
import jax
import jax.numpy as jnp
from jax.experimental import pallas as pl
from jax.experimental.pallas import tpu as pltpu


_PAD = 8  # sublane-aligned left/right gutter inside the padded VMEM scratches


def _double_conv_kernel(x_ref, w1_ref, b1_ref, w2t_ref, b2_ref, o_ref,
                        xpad_ref, mpad_ref):
    # x_ref   : (1, H, W, Cin)             NHWC input tile (one image)
    # w1_ref  : (9*Cin, Cmid)              conv1 weights, tap-major im2col rows
    # b1_ref  : (1, Cmid)
    # w2t_ref : (Cout, 9*Cmid)             conv2 weights, pre-transposed
    # b2_ref  : (Cout, 1)
    # o_ref   : (1, Cout, H*W)             lane-dense, NCHW-flattened output
    # xpad_ref: VMEM (H+2, W+2*_PAD, Cin)  padded input scratch
    # mpad_ref: VMEM (H+2, W+2*_PAD, Cmid) padded intermediate scratch
    H = x_ref.shape[1]
    W = x_ref.shape[2]
    Cin = x_ref.shape[3]
    Cmid = w1_ref.shape[1]

    def zero_ring(pad_ref, c):
        # Zero only the padding ring: top/bottom rows plus the two 8-wide,
        # sublane-aligned gutters.  The H x W interior is overwritten below.
        Hp = pad_ref.shape[0]        # H + 2
        Wp = pad_ref.shape[1]        # W + 2*_PAD
        z_row = jnp.zeros((1, Wp, c), jnp.float32)
        pad_ref[0:1, :, :] = z_row                     # top padding row
        pad_ref[Hp - 1:Hp, :, :] = z_row               # bottom padding row
        z_col = jnp.zeros((Hp - 2, _PAD, c), jnp.float32)
        pad_ref[1:Hp - 1, 0:_PAD, :] = z_col           # left gutter (incl. pad col)
        pad_ref[1:Hp - 1, Wp - _PAD:Wp, :] = z_col     # right gutter (incl. pad col)

    def leaky_relu(v):
        return jnp.maximum(v, 0.01 * v)

    def im2col(pad_ref, c):
        # (H+2, Wp, c) padded plane -> (H*W, 9*c) patch matrix (tap-major).
        # Valid pixel (y, x) lives at pad_ref[y+1, _PAD + x, :]; rows 0 / H+1
        # and columns _PAD-1 / _PAD+W are the zero padding ring.
        xp = pad_ref[...]
        slabs = []
        for dy in range(3):
            for dx in range(3):
                s = xp[dy:dy + H, _PAD - 1 + dx:_PAD - 1 + dx + W, :]
                slabs.append(s.reshape(H * W, c))
        return jnp.concatenate(slabs, axis=1)

    # ---- establish zero padding rings, then write the valid interiors -----
    zero_ring(xpad_ref, Cin)
    zero_ring(mpad_ref, Cmid)
    xpad_ref[1:1 + H, _PAD:_PAD + W, :] = x_ref[0]

    # ---- conv1 (single K=9*Cin matmul) + bias + LeakyReLU ------------------
    p1 = im2col(xpad_ref, Cin)                                   # (H*W, 9*Cin)
    h = jnp.dot(p1, w1_ref[...], preferred_element_type=jnp.float32)
    h = leaky_relu(h + b1_ref[...])                              # (H*W, Cmid)
    # Keep the intermediate in VMEM; its zero ring is conv2's padding=1.
    mpad_ref[1:1 + H, _PAD:_PAD + W, :] = h.reshape(H, W, Cmid)

    # ---- conv2 (single K=9*Cmid matmul), computed transposed so the --------
    # ---- accumulator/store is the lane-dense (Cout, H*W) NCHW tile ---------
    p2 = im2col(mpad_ref, Cmid)                                  # (H*W, 9*Cmid)
    y = jax.lax.dot_general(
        w2t_ref[...], p2,
        dimension_numbers=(((1,), (1,)), ((), ())),              # A @ B^T
        preferred_element_type=jnp.float32)                      # (Cout, H*W)
    y = leaky_relu(y + b2_ref[...])
    o_ref[0] = y.astype(o_ref.dtype)


def double_conv_forward(x_nchw, params):
    """DoubleConv forward pass. Input/output are NCHW like the PyTorch module."""
    N, Cin, H, W = x_nchw.shape
    Cmid = params["w1"].shape[1]
    Cout = params["w2t"].shape[0]

    # Single boundary relayout: the NCHW interface needs channels-last inside
    # the kernel so C sits on the MXU contraction axis.  It only touches the
    # smallest tensor (the input); in an NHWC end-to-end model it disappears.
    x_nhwc = jnp.transpose(x_nchw, (0, 2, 3, 1))

    out_flat = pl.pallas_call(
        _double_conv_kernel,
        out_shape=jax.ShapeDtypeStruct((N, Cout, H * W), x_nchw.dtype),
        grid=(N,),
        in_specs=[
            pl.BlockSpec((1, H, W, Cin), lambda n: (n, 0, 0, 0)),
            pl.BlockSpec((9 * Cin, Cmid), lambda n: (0, 0)),
            pl.BlockSpec((1, Cmid), lambda n: (0, 0)),
            pl.BlockSpec((Cout, 9 * Cmid), lambda n: (0, 0)),
            pl.BlockSpec((Cout, 1), lambda n: (0, 0)),
        ],
        out_specs=pl.BlockSpec((1, Cout, H * W), lambda n: (n, 0, 0)),
        scratch_shapes=[
            pltpu.VMEM((H + 2, W + 2 * _PAD, Cin), jnp.float32),
            pltpu.VMEM((H + 2, W + 2 * _PAD, Cmid), jnp.float32),
        ],
        compiler_params=pltpu.CompilerParams(
            dimension_semantics=("parallel",)),
    )(x_nhwc, params["w1"], params["b1"], params["w2t"], params["b2"])

    # Free (contiguous) reshape: (N, Cout, H*W) -> (N, Cout, H, W), already NCHW.
    return out_flat.reshape(N, Cout, H, W)


def init_double_conv_params(key, in_ch, out_ch):
    """Deterministic synthetic init matching nn.Conv2d parameter shapes."""
    def conv_init(k, cin, cout):
        kw, kb = jax.random.split(k)
        fan_in = cin * 9
        bound = 1.0 / jnp.sqrt(fan_in)
        w_pt = jax.random.uniform(kw, (cout, cin, 3, 3), jnp.float32,
                                  -bound, bound)
        b_pt = jax.random.uniform(kb, (cout,), jnp.float32, -bound, bound)
        return w_pt, b_pt

    k1, k2 = jax.random.split(key)
    w1_pt, b1_pt = conv_init(k1, in_ch, out_ch)
    w2_pt, b2_pt = conv_init(k2, out_ch, out_ch)

    # conv1: (Cout,Cin,3,3) -> (3,3,Cin,Cout) -> (9*Cin, Cout); row index is
    # (dy*3+dx)*Cin + c, matching the kernel's tap-major im2col columns.
    w1 = jnp.transpose(w1_pt, (2, 3, 1, 0)).reshape(9 * in_ch, out_ch)
    # conv2: pre-transposed (Cout, 9*Cmid): (Cout,Cmid,3,3) -> (Cout,3,3,Cmid).
    w2t = jnp.transpose(w2_pt, (0, 2, 3, 1)).reshape(out_ch, 9 * out_ch)

    return dict(w1=w1, b1=b1_pt.reshape(1, out_ch),
                w2t=w2t, b2=b2_pt.reshape(out_ch, 1),
                w1_pt=w1_pt, b1_pt=b1_pt, w2_pt=w2_pt, b2_pt=b2_pt)


def _reference_forward(x_nchw, params):
    """Pure-JAX reference (lax conv) for the correctness check."""
    def conv(x, w_pt, b_pt):
        y = jax.lax.conv_general_dilated(
            x, w_pt, window_strides=(1, 1), padding=((1, 1), (1, 1)),
            dimension_numbers=("NCHW", "OIHW", "NCHW"))
        y = y + b_pt.reshape(1, -1, 1, 1)
        return jnp.where(y > 0, y, 0.01 * y)

    y = conv(x_nchw, params["w1_pt"], params["b1_pt"])
    return conv(y, params["w2_pt"], params["b2_pt"])


if __name__ == "__main__":
    key = jax.random.PRNGKey(0)
    k_x, k_p = jax.random.split(key)

    N, in_ch, out_ch, H, W = 2, 4, 8, 16, 16
    x = jax.random.normal(k_x, (N, in_ch, H, W), jnp.float32)
    params = init_double_conv_params(k_p, in_ch, out_ch)

    out = jax.jit(double_conv_forward)(x, params)
    out = jax.block_until_ready(out)

    ref = _reference_forward(x, params)
    assert out.shape == (N, out_ch, H, W)
    assert jnp.allclose(out, ref, atol=1e-4, rtol=1e-4)

    print("KERNEL_OK")
</pallas_src>

<mosaic_0001>
module attributes {stable_mosaic.version = 11 : i64} {
  func.func @_double_conv_kernel(%arg0: i32, %arg1: memref<1x16x16x4xf32, #tpu.memory_space<vmem>>, %arg2: memref<36x8xf32, #tpu.memory_space<vmem>>, %arg3: memref<1x8xf32, #tpu.memory_space<vmem>>, %arg4: memref<8x72xf32, #tpu.memory_space<vmem>>, %arg5: memref<8x1xf32, #tpu.memory_space<vmem>>, %arg6: memref<1x8x256xf32, #tpu.memory_space<vmem>>, %arg7: memref<18x32x4xf32, #tpu.memory_space<vmem>>, %arg8: memref<18x32x8xf32, #tpu.memory_space<vmem>>) attributes {dimension_semantics = [#tpu.dimension_semantics<parallel>], iteration_bounds = array<i64: 2>, scalar_prefetch = 0 : i64, scratch_operands = 2 : i64, tpu.core_type = #tpu.core_type<tc>, window_params = [{transform_indices = @transform_0, window_bounds = array<i64: 1, 16, 16, 4>}, {pipeline_mode = #tpu.pipeline_mode<synchronous>, transform_indices = @transform_1, window_bounds = array<i64: 36, 8>}, {pipeline_mode = #tpu.pipeline_mode<synchronous>, transform_indices = @transform_2, window_bounds = array<i64: 1, 8>}, {pipeline_mode = #tpu.pipeline_mode<synchronous>, transform_indices = @transform_3, window_bounds = array<i64: 8, 72>}, {pipeline_mode = #tpu.pipeline_mode<synchronous>, transform_indices = @transform_4, window_bounds = array<i64: 8, 1>}, {transform_indices = @transform_5, window_bounds = array<i64: 1, 8, 256>}]} {
    %cst = arith.constant 0.000000e+00 : f32
    %0 = vector.broadcast %cst : f32 to vector<1x32x4xf32>
    %c0 = arith.constant 0 : index
    %c0_0 = arith.constant 0 : index
    %c0_1 = arith.constant 0 : index
    %1 = vector.load %arg7[%c0, %c0_0, %c0_1] : memref<18x32x4xf32, #tpu.memory_space<vmem>>, vector<1x32x4xf32>
    tpu.vector_store %arg7[%c0, %c0_0, %c0_1], %0 {strides = array<i32>} : memref<18x32x4xf32, #tpu.memory_space<vmem>>, vector<1x32x4xf32>,
    %c17 = arith.constant 17 : index
    %c0_2 = arith.constant 0 : index
    %c0_3 = arith.constant 0 : index
    %2 = vector.load %arg7[%c17, %c0_2, %c0_3] : memref<18x32x4xf32, #tpu.memory_space<vmem>>, vector<1x32x4xf32>
    tpu.vector_store %arg7[%c17, %c0_2, %c0_3], %0 {strides = array<i32>} : memref<18x32x4xf32, #tpu.memory_space<vmem>>, vector<1x32x4xf32>,
    %cst_4 = arith.constant 0.000000e+00 : f32
    %3 = vector.broadcast %cst_4 : f32 to vector<16x8x4xf32>
    %c1 = arith.constant 1 : index
    %c0_5 = arith.constant 0 : index
    %c0_6 = arith.constant 0 : index
    %4 = vector.load %arg7[%c1, %c0_5, %c0_6] : memref<18x32x4xf32, #tpu.memory_space<vmem>>, vector<16x8x4xf32>
    tpu.vector_store %arg7[%c1, %c0_5, %c0_6], %3 {strides = array<i32>} : memref<18x32x4xf32, #tpu.memory_space<vmem>>, vector<16x8x4xf32>,
    %c1_7 = arith.constant 1 : index
    %c24 = arith.constant 24 : index
    %c0_8 = arith.constant 0 : index
    %5 = vector.load %arg7[%c1_7, %c24, %c0_8] : memref<18x32x4xf32, #tpu.memory_space<vmem>>, vector<16x8x4xf32>
    tpu.vector_store %arg7[%c1_7, %c24, %c0_8], %3 {strides = array<i32>} : memref<18x32x4xf32, #tpu.memory_space<vmem>>, vector<16x8x4xf32>,
    %cst_9 = arith.constant 0.000000e+00 : f32
    %6 = vector.broadcast %cst_9 : f32 to vector<1x32x8xf32>
    %c0_10 = arith.constant 0 : index
    %c0_11 = arith.constant 0 : index
    %c0_12 = arith.constant 0 : index
    %7 = vector.load %arg8[%c0_10, %c0_11, %c0_12] : memref<18x32x8xf32, #tpu.memory_space<vmem>>, vector<1x32x8xf32>
    tpu.vector_store %arg8[%c0_10, %c0_11, %c0_12], %6 {strides = array<i32>} : memref<18x32x8xf32, #tpu.memory_space<vmem>>, vector<1x32x8xf32>,
    %c17_13 = arith.constant 17 : index
    %c0_14 = arith.constant 0 : index
    %c0_15 = arith.constant 0 : index
    %8 = vector.load %arg8[%c17_13, %c0_14, %c0_15] : memref<18x32x8xf32, #tpu.memory_space<vmem>>, vector<1x32x8xf32>
    tpu.vector_store %arg8[%c17_13, %c0_14, %c0_15], %6 {strides = array<i32>} : memref<18x32x8xf32, #tpu.memory_space<vmem>>, vector<1x32x8xf32>,
    %cst_16 = arith.constant 0.000000e+00 : f32
    %9 = vector.broadcast %cst_16 : f32 to vector<16x8x8xf32>
    %c1_17 = arith.constant 1 : index
    %c0_18 = arith.constant 0 : index
    %c0_19 = arith.constant 0 : index
    %10 = vector.load %arg8[%c1_17, %c0_18, %c0_19] : memref<18x32x8xf32, #tpu.memory_space<vmem>>, vector<16x8x8xf32>
    tpu.vector_store %arg8[%c1_17, %c0_18, %c0_19], %9 {strides = array<i32>} : memref<18x32x8xf32, #tpu.memory_space<vmem>>, vector<16x8x8xf32>,
    %c1_20 = arith.constant 1 : index
    %c24_21 = arith.constant 24 : index
    %c0_22 = arith.constant 0 : index
    %11 = vector.load %arg8[%c1_20, %c24_21, %c0_22] : memref<18x32x8xf32, #tpu.memory_space<vmem>>, vector<16x8x8xf32>
    tpu.vector_store %arg8[%c1_20, %c24_21, %c0_22], %9 {strides = array<i32>} : memref<18x32x8xf32, #tpu.memory_space<vmem>>, vector<16x8x8xf32>,
    %c0_23 = arith.constant 0 : index
    %c0_24 = arith.constant 0 : index
    %c0_25 = arith.constant 0 : index
    %c0_26 = arith.constant 0 : index
    %12 = vector.load %arg1[%c0_23, %c0_24, %c0_25, %c0_26] : memref<1x16x16x4xf32, #tpu.memory_space<vmem>>, vector<1x16x16x4xf32>
    %13 = vector.shape_cast %12 : vector<1x16x16x4xf32> to vector<16x16x4xf32>
    %c1_27 = arith.constant 1 : index
    %c8 = arith.constant 8 : index
    %c0_28 = arith.constant 0 : index
    %14 = vector.load %arg7[%c1_27, %c8, %c0_28] : memref<18x32x4xf32, #tpu.memory_space<vmem>>, vector<16x16x4xf32>
    tpu.vector_store %arg7[%c1_27, %c8, %c0_28], %13 {strides = array<i32>} : memref<18x32x4xf32, #tpu.memory_space<vmem>>, vector<16x16x4xf32>,
    %c0_29 = arith.constant 0 : index
    %c0_30 = arith.constant 0 : index
    %c0_31 = arith.constant 0 : index
    %15 = vector.load %arg7[%c0_29, %c0_30, %c0_31] : memref<18x32x4xf32, #tpu.memory_space<vmem>>, vector<18x32x4xf32>
    %16 = vector.extract_strided_slice %15 {offsets = [0, 7, 0], sizes = [16, 16, 4], strides = [1, 1, 1]} : vector<18x32x4xf32> to vector<16x16x4xf32>
    %17 = vector.shape_cast %16 : vector<16x16x4xf32> to vector<256x4xf32>
    %18 = vector.extract_strided_slice %15 {offsets = [0, 8, 0], sizes = [16, 16, 4], strides = [1, 1, 1]} : vector<18x32x4xf32> to vector<16x16x4xf32>
    %19 = vector.shape_cast %18 : vector<16x16x4xf32> to vector<256x4xf32>
    %20 = vector.extract_strided_slice %15 {offsets = [0, 9, 0], sizes = [16, 16, 4], strides = [1, 1, 1]} : vector<18x32x4xf32> to vector<16x16x4xf32>
    %21 = vector.shape_cast %20 : vector<16x16x4xf32> to vector<256x4xf32>
    %22 = vector.extract_strided_slice %15 {offsets = [1, 7, 0], sizes = [16, 16, 4], strides = [1, 1, 1]} : vector<18x32x4xf32> to vector<16x16x4xf32>
    %23 = vector.shape_cast %22 : vector<16x16x4xf32> to vector<256x4xf32>
    %24 = vector.extract_strided_slice %15 {offsets = [1, 8, 0], sizes = [16, 16, 4], strides = [1, 1, 1]} : vector<18x32x4xf32> to vector<16x16x4xf32>
    %25 = vector.shape_cast %24 : vector<16x16x4xf32> to vector<256x4xf32>
    %26 = vector.extract_strided_slice %15 {offsets = [1, 9, 0], sizes = [16, 16, 4], strides = [1, 1, 1]} : vector<18x32x4xf32> to vector<16x16x4xf32>
    %27 = vector.shape_cast %26 : vector<16x16x4xf32> to vector<256x4xf32>
    %28 = vector.extract_strided_slice %15 {offsets = [2, 7, 0], sizes = [16, 16, 4], strides = [1, 1, 1]} : vector<18x32x4xf32> to vector<16x16x4xf32>
    %29 = vector.shape_cast %28 : vector<16x16x4xf32> to vector<256x4xf32>
    %30 = vector.extract_strided_slice %15 {offsets = [2, 8, 0], sizes = [16, 16, 4], strides = [1, 1, 1]} : vector<18x32x4xf32> to vector<16x16x4xf32>
    %31 = vector.shape_cast %30 : vector<16x16x4xf32> to vector<256x4xf32>
    %32 = vector.extract_strided_slice %15 {offsets = [2, 9, 0], sizes = [16, 16, 4], strides = [1, 1, 1]} : vector<18x32x4xf32> to vector<16x16x4xf32>
    %33 = vector.shape_cast %32 : vector<16x16x4xf32> to vector<256x4xf32>
    %34 = tpu.concatenate %17, %19, %21, %23, %25, %27, %29, %31, %33 in 1 : vector<256x4xf32>, vector<256x4xf32>, vector<256x4xf32>, vector<256x4xf32>, vector<256x4xf32>, vector<256x4xf32>, vector<256x4xf32>, vector<256x4xf32>, vector<256x4xf32> -> vector<256x36xf32>
    %c0_32 = arith.constant 0 : index
    %c0_33 = arith.constant 0 : index
    %35 = vector.load %arg2[%c0_32, %c0_33] : memref<36x8xf32, #tpu.memory_space<vmem>>, vector<36x8xf32>
    %cst_34 = arith.constant dense<0.000000e+00> : vector<256x8xf32>
    %36 = tpu.matmul %34, %35, %cst_34 {dimension_numbers = #tpu.dot_dimension_numbers<[1], [0], [0], [1], [0, 0, 1, 1], [], []>} : vector<256x36xf32>, vector<36x8xf32>, vector<256x8xf32> -> vector<256x8xf32>
    %c0_35 = arith.constant 0 : index
    %c0_36 = arith.constant 0 : index
    %37 = vector.load %arg3[%c0_35, %c0_36] : memref<1x8xf32, #tpu.memory_space<vmem>>, vector<1x8xf32>
    %38 = vector.broadcast %37 : vector<1x8xf32> to vector<256x8xf32>
    %39 = arith.addf %36, %38 : vector<256x8xf32>
    %cst_37 = arith.constant 0.00999999977 : f32
    %40 = vector.broadcast %cst_37 : f32 to vector<256x8xf32>
    %41 = arith.mulf %40, %39 : vector<256x8xf32>
    %42 = arith.maximumf %39, %41 : vector<256x8xf32>
    %43 = vector.shape_cast %42 : vector<256x8xf32> to vector<16x16x8xf32>
    %c1_38 = arith.constant 1 : index
    %c8_39 = arith.constant 8 : index
    %c0_40 = arith.constant 0 : index
    %44 = vector.load %arg8[%c1_38, %c8_39, %c0_40] : memref<18x32x8xf32, #tpu.memory_space<vmem>>, vector<16x16x8xf32>
    tpu.vector_store %arg8[%c1_38, %c8_39, %c0_40], %43 {strides = array<i32>} : memref<18x32x8xf32, #tpu.memory_space<vmem>>, vector<16x16x8xf32>,
    %c0_41 = arith.constant 0 : index
    %c0_42 = arith.constant 0 : index
    %c0_43 = arith.constant 0 : index
    %45 = vector.load %arg8[%c0_41, %c0_42, %c0_43] : memref<18x32x8xf32, #tpu.memory_space<vmem>>, vector<18x32x8xf32>
    %46 = vector.extract_strided_slice %45 {offsets = [0, 7, 0], sizes = [16, 16, 8], strides = [1, 1, 1]} : vector<18x32x8xf32> to vector<16x16x8xf32>
    %47 = vector.shape_cast %46 : vector<16x16x8xf32> to vector<256x8xf32>
    %48 = vector.extract_strided_slice %45 {offsets = [0, 8, 0], sizes = [16, 16, 8], strides = [1, 1, 1]} : vector<18x32x8xf32> to vector<16x16x8xf32>
    %49 = vector.shape_cast %48 : vector<16x16x8xf32> to vector<256x8xf32>
    %50 = vector.extract_strided_slice %45 {offsets = [0, 9, 0], sizes = [16, 16, 8], strides = [1, 1, 1]} : vector<18x32x8xf32> to vector<16x16x8xf32>
    %51 = vector.shape_cast %50 : vector<16x16x8xf32> to vector<256x8xf32>
    %52 = vector.extract_strided_slice %45 {offsets = [1, 7, 0], sizes = [16, 16, 8], strides = [1, 1, 1]} : vector<18x32x8xf32> to vector<16x16x8xf32>
    %53 = vector.shape_cast %52 : vector<16x16x8xf32> to vector<256x8xf32>
    %54 = vector.extract_strided_slice %45 {offsets = [1, 8, 0], sizes = [16, 16, 8], strides = [1, 1, 1]} : vector<18x32x8xf32> to vector<16x16x8xf32>
    %55 = vector.shape_cast %54 : vector<16x16x8xf32> to vector<256x8xf32>
    %56 = vector.extract_strided_slice %45 {offsets = [1, 9, 0], sizes = [16, 16, 8], strides = [1, 1, 1]} : vector<18x32x8xf32> to vector<16x16x8xf32>
    %57 = vector.shape_cast %56 : vector<16x16x8xf32> to vector<256x8xf32>
    %58 = vector.extract_strided_slice %45 {offsets = [2, 7, 0], sizes = [16, 16, 8], strides = [1, 1, 1]} : vector<18x32x8xf32> to vector<16x16x8xf32>
    %59 = vector.shape_cast %58 : vector<16x16x8xf32> to vector<256x8xf32>
    %60 = vector.extract_strided_slice %45 {offsets = [2, 8, 0], sizes = [16, 16, 8], strides = [1, 1, 1]} : vector<18x32x8xf32> to vector<16x16x8xf32>
    %61 = vector.shape_cast %60 : vector<16x16x8xf32> to vector<256x8xf32>
    %62 = vector.extract_strided_slice %45 {offsets = [2, 9, 0], sizes = [16, 16, 8], strides = [1, 1, 1]} : vector<18x32x8xf32> to vector<16x16x8xf32>
    %63 = vector.shape_cast %62 : vector<16x16x8xf32> to vector<256x8xf32>
    %64 = tpu.concatenate %47, %49, %51, %53, %55, %57, %59, %61, %63 in 1 : vector<256x8xf32>, vector<256x8xf32>, vector<256x8xf32>, vector<256x8xf32>, vector<256x8xf32>, vector<256x8xf32>, vector<256x8xf32>, vector<256x8xf32>, vector<256x8xf32> -> vector<256x72xf32>
    %c0_44 = arith.constant 0 : index
    %c0_45 = arith.constant 0 : index
    %65 = vector.load %arg4[%c0_44, %c0_45] : memref<8x72xf32, #tpu.memory_space<vmem>>, vector<8x72xf32>
    %cst_46 = arith.constant dense<0.000000e+00> : vector<8x256xf32>
    %66 = tpu.matmul %65, %64, %cst_46 {dimension_numbers = #tpu.dot_dimension_numbers<[1], [1], [0], [0], [0, 0, 1, 0], [], []>} : vector<8x72xf32>, vector<256x72xf32>, vector<8x256xf32> -> vector<8x256xf32>
    %c0_47 = arith.constant 0 : index
    %c0_48 = arith.constant 0 : index
    %67 = vector.load %arg5[%c0_47, %c0_48] : memref<8x1xf32, #tpu.memory_space<vmem>>, vector<8x1xf32>
    %68 = vector.broadcast %67 : vector<8x1xf32> to vector<8x256xf32>
    %69 = arith.addf %66, %68 : vector<8x256xf32>
    %cst_49 = arith.constant 0.00999999977 : f32
    %70 = vector.broadcast %cst_49 : f32 to vector<8x256xf32>
    %71 = arith.mulf %70, %69 : vector<8x256xf32>
    %72 = arith.maximumf %69, %71 : vector<8x256xf32>
    %c0_50 = arith.constant 0 : index
    %c0_51 = arith.constant 0 : index
    %c0_52 = arith.constant 0 : index
    %73 = vector.load %arg6[%c0_50, %c0_51, %c0_52] : memref<1x8x256xf32, #tpu.memory_space<vmem>>, vector<1x8x256xf32>
    %74 = vector.shape_cast %73 : vector<1x8x256xf32> to vector<8x256xf32>
    %75 = vector.shape_cast %72 : vector<8x256xf32> to vector<1x8x256xf32>
    tpu.vector_store %arg6[%c0_50, %c0_51, %c0_52], %75 {strides = array<i32>} : memref<1x8x256xf32, #tpu.memory_space<vmem>>, vector<1x8x256xf32>,
    return
  }
  func.func @transform_0(%arg0: i32) -> (i32, i32, i32, i32) {
    %c0_i32 = arith.constant 0 : i32
    %c0_i32_0 = arith.constant 0 : i32
    %c0_i32_1 = arith.constant 0 : i32
    %c0_i32_2 = arith.constant 0 : i32
    return %arg0, %c0_i32, %c0_i32_0, %c0_i32_1 : i32, i32, i32, i32
  }
  func.func @transform_1(%arg0: i32) -> (i32, i32) {
    %c0_i32 = arith.constant 0 : i32
    %c0_i32_0 = arith.constant 0 : i32
    %c0_i32_1 = arith.constant 0 : i32
    return %c0_i32, %c0_i32_0 : i32, i32
  }
  func.func @transform_2(%arg0: i32) -> (i32, i32) {
    %c0_i32 = arith.constant 0 : i32
    %c0_i32_0 = arith.constant 0 : i32
    %c0_i32_1 = arith.constant 0 : i32
    return %c0_i32, %c0_i32_0 : i32, i32
  }
  func.func @transform_3(%arg0: i32) -> (i32, i32) {
    %c0_i32 = arith.constant 0 : i32
    %c0_i32_0 = arith.constant 0 : i32
    %c0_i32_1 = arith.constant 0 : i32
    return %c0_i32, %c0_i32_0 : i32, i32
  }
  func.func @transform_4(%arg0: i32) -> (i32, i32) {
    %c0_i32 = arith.constant 0 : i32
    %c0_i32_0 = arith.constant 0 : i32
    %c0_i32_1 = arith.constant 0 : i32
    return %c0_i32, %c0_i32_0 : i32, i32
  }
  func.func @transform_5(%arg0: i32) -> (i32, i32, i32) {
    %c0_i32 = arith.constant 0 : i32
    %c0_i32_0 = arith.constant 0 : i32
    %c0_i32_1 = arith.constant 0 : i32
    return %arg0, %c0_i32, %c0_i32_0 : i32, i32, i32
  }
}

</mosaic_0001>

<bundles_post_ra>
// kernel: double_conv_forward.1
= control target key start
LH: loop header
LB: loop body
LE: loop exit
PB: predicated region body
PF: predicated region fallthrough
CT: control target
= control target key end

     0   :  { %s4828_s18 = smov 0   ;;  %s8077_s0 = inlined_call_operand.vmem [shape: f32[2,16,16,4], index: 0, kind: input, shape index: {}]   ;;  %s8078_s1 = inlined_call_operand.vmem [shape: f32[36,8], index: 1, kind: input, shape index: {}]   ;;  %s8079_s2 = inlined_call_operand.vmem [shape: f32[1,8], index: 2, kind: input, shape index: {}]   ;;  %s8080_s3 = inlined_call_operand.vmem [shape: f32[8,72], index: 3, kind: input, shape index: {}]   ;;  %s8081_s4 = inlined_call_operand.vmem [shape: f32[8,1], index: 4, kind: input, shape index: {}]   ;;  %s8082_s5 = inlined_call_operand.vmem [shape: f32[2,8,256], index: 5, kind: output, shape index: {}]  }
   0x1 LB: > { %s3820_s19 = sadd.s32 4294967295, %s4782_s18   ;;  %p3824_p0 = scmp.ge.s32.totalorder %s4782_s18, 1  ;;  %s4782_s18 = sphi %s4828_s18, %s15_s18  }
   0x2   : > { %p187_p1 = scmp.lt.s32.totalorder %s4782_s18, 3 }
   0x4   : > { %p188_p2 = pnand %p3824_p0, %p187_p1 }
   0x6   : > { %191 = sbr.rel (%p188_p2) target bundleno = 1455 (0x5af), region = 40 }
   0xd   : > { %vm225_vm0 = vcmask 31744   ;;  %p4838_p3 = scmp.lt.s32.totalorder %s3820_s19, 1  ;;  %v4784_v0 = vmov 0.0   ;;  %s4785_s25 = smov 4   ;;  %vm495_vm1 = vcmask 1040384   ;;  %vm268_vm2 = vcmask 64512  }
   0xe   : > { %227 = vst.msk [vmem:[#allocation2 + $0x8] sm:$0xff] %vm225_vm0, %v4784_v0  ;;  %226 = vst.msk [vmem:[#allocation2] sm:$0xff] %vm225_vm0, %v4784_v0  ;;  %vm624_vm3 = vcmask 1046528   ;;  %s4786_s26 = smov 8   ;;  %s4787_s27 = smov 12   ;;  %vm1872_vm4 = vcmask 1043456  }
   0xf   : > { %228 = vst.msk [vmem:[#allocation2 + $0x10] sm:$0xff] %vm225_vm0, %v4784_v0  ;;  %229 = vst.msk [vmem:[#allocation2 + $0x18] sm:$0xff] %vm225_vm0, %v4784_v0  ;;  %s8749_s19 = smov (!%p4838_p3, %s3820_s19), 1  ;;  %s4788_s28 = smov 16   ;;  %vm1565_vm5 = vcmask 97280   ;;  %vm1598_vm6 = vcmask 130048  }
  0x10   : > { %231 = vst.msk [vmem:[#allocation2 + $0x220] sm:$0xff] %vm225_vm0, %v4784_v0  ;;  %232 = vst.msk [vmem:[#allocation2 + $0x228] sm:$0xff] %vm225_vm0, %v4784_v0  ;;  %s3898_s21 = sshll.u32 %s8749_s19, 8  ;;  %s4789_s29 = smov 20   ;;  %vm1631_vm7 = vcmask 162816   ;;  %vm1664_vm8 = vcmask 195584  }
  0x11   : > { %233 = vst.msk [vmem:[#allocation2 + $0x230] sm:$0xff] %vm225_vm0, %v4784_v0  ;;  %234 = vst.msk [vmem:[#allocation2 + $0x238] sm:$0xff] %vm225_vm0, %v4784_v0  ;;  %s4932_s24 = scalar_lea.vmem %s8077_s0, %s3898_s21  ;;  %s4790_s30 = smov 24   ;;  %vm1697_vm9 = vcmask 228352   ;;  %vm1730_vm10 = vcmask 261120   ;;  %vm1775_vm11 = vcmask 293888  }
  0x12   : > { %236 = vst.msk [vmem:[#allocation2 + $0x20] sm:$0xff] %vm225_vm0, %v4784_v0  ;;  %237 = vst.msk [vmem:[#allocation2 + $0x40] sm:$0xff] %vm225_vm0, %v4784_v0  ;;  %v311_v1 = vld [vmem:[%s4932_s24] sm:$0xff]  ;;  %v313_v2 = vld [vmem:[%s4932_s24 + $0x10] sm:$0xff]  ;;  %s4791_s16 = smov 28   ;;  %s4792_s17 = smov 32  }
  0x13   : > { %238 = vst.msk [vmem:[#allocation2 + $0x60] sm:$0xff] %vm225_vm0, %v4784_v0  ;;  %239 = vst.msk [vmem:[#allocation2 + $0x80] sm:$0xff] %vm225_vm0, %v4784_v0  ;;  %v312_v3 = vld [vmem:[%s4932_s24 + $0x8] sm:$0xff]  ;;  %v315_v4 = vld [vmem:[%s4932_s24 + $0x20] sm:$0xff]  ;;  %s4793_s22 = smov 40   ;;  %s4794_s23 = smov 48  }
  0x14   : > { %240 = vst.msk [vmem:[#allocation2 + $0xa0] sm:$0xff] %vm225_vm0, %v4784_v0  ;;  %241 = vst.msk [vmem:[#allocation2 + $0xc0] sm:$0xff] %vm225_vm0, %v4784_v0  ;;  %v314_v5 = vld [vmem:[%s4932_s24 + $0x18] sm:$0xff]  ;;  %v317_v6 = vld [vmem:[%s4932_s24 + $0x30] sm:$0xff]  ;;  %vm3449_vm12 = vcmask 326656   ;;  %vm3482_vm13 = vcmask 392192  }
  0x15   : > { %242 = vst.msk [vmem:[#allocation2 + $0xe0] sm:$0xff] %vm225_vm0, %v4784_v0  ;;  %243 = vst.msk [vmem:[#allocation2 + $0x100] sm:$0xff] %vm225_vm0, %v4784_v0  ;;  %v4943_v7 = vld [vmem:[#allocation2 + $0x8] sm:$0xff]  ;;  %v319_v12 = vld [vmem:[%s4932_s24 + $0x40] sm:$0xff]  ;;  %vm3515_vm14 = vcmask 457728   ;;  %vm3548_vm15 = vcmask 523264  }
  0x16   : > { %244 = vst.msk [vmem:[#allocation2 + $0x120] sm:$0xff] %vm225_vm0, %v4784_v0  ;;  %245 = vst.msk [vmem:[#allocation2 + $0x140] sm:$0xff] %vm225_vm0, %v4784_v0  ;;  %v4945_v8 = vld [vmem:[#allocation2 + $0x10] sm:$0xff]  ;;  %v316_v9 = vld [vmem:[%s4932_s24 + $0x28] sm:$0xff]  ;;  %733 = vrot.lane.b32.xlu0 %v4943_v7, %s4785_s25  ;;  %v8083_v10 = vrot.slane %v4943_v7, 7 }
  0x17   : > { %246 = vst.msk [vmem:[#allocation2 + $0x160] sm:$0xff] %vm225_vm0, %v4784_v0  ;;  %247 = vst.msk [vmem:[#allocation2 + $0x180] sm:$0xff] %vm225_vm0, %v4784_v0  ;;  %v499_v11 = vrot.slane %v4945_v8, 7  ;;  %v318_v13 = vld [vmem:[%s4932_s24 + $0x38] sm:$0xff]  ;;  %v321_v14 = vld [vmem:[%s4932_s24 + $0x50] sm:$0xff] }
  0x18   : > { %248 = vst.msk [vmem:[#allocation2 + $0x1a0] sm:$0xff] %vm225_vm0, %v4784_v0  ;;  %249 = vst.msk [vmem:[#allocation2 + $0x1c0] sm:$0xff] %vm225_vm0, %v4784_v0  ;;  %v320_v15 = vld [vmem:[%s4932_s24 + $0x48] sm:$0xff]  ;;  %v323_v16 = vld [vmem:[%s4932_s24 + $0x60] sm:$0xff] }
  0x19   : > { %250 = vst.msk [vmem:[#allocation2 + $0x1e0] sm:$0xff] %vm225_vm0, %v4784_v0  ;;  %251 = vst.msk [vmem:[#allocation2 + $0x200] sm:$0xff] %vm225_vm0, %v4784_v0  ;;  %v322_v17 = vld [vmem:[%s4932_s24 + $0x58] sm:$0xff]  ;;  %v325_v18 = vld [vmem:[%s4932_s24 + $0x70] sm:$0xff]  ;;  %v4972_v20 = vsel %vm495_vm1, %v8083_v10, %v499_v11 }
  0x1a   : > { %252 = vst.msk [vmem:[#allocation2 + $0x38] sm:$0xff] %vm225_vm0, %v4784_v0  ;;  %253 = vst.msk [vmem:[#allocation2 + $0x58] sm:$0xff] %vm225_vm0, %v4784_v0  ;;  %v324_v19 = vld [vmem:[%s4932_s24 + $0x68] sm:$0xff]  ;;  %v327_v21 = vld [vmem:[%s4932_s24 + $0x80] sm:$0xff]  ;;  %735 = vrot.lane.b32.xlu0 %v4945_v8, %s4785_s25 }
  0x1b   : > { %254 = vst.msk [vmem:[#allocation2 + $0x78] sm:$0xff] %vm225_vm0, %v4784_v0  ;;  %255 = vst.msk [vmem:[#allocation2 + $0x98] sm:$0xff] %vm225_vm0, %v4784_v0  ;;  %v326_v22 = vld [vmem:[%s4932_s24 + $0x78] sm:$0xff]  ;;  %v329_v23 = vld [vmem:[%s4932_s24 + $0x90] sm:$0xff] }
  0x1c   : > { %256 = vst.msk [vmem:[#allocation2 + $0xb8] sm:$0xff] %vm225_vm0, %v4784_v0  ;;  %257 = vst.msk [vmem:[#allocation2 + $0xd8] sm:$0xff] %vm225_vm0, %v4784_v0  ;;  %v328_v24 = vld [vmem:[%s4932_s24 + $0x88] sm:$0xff]  ;;  %v331_v25 = vld [vmem:[%s4932_s24 + $0xa0] sm:$0xff] }
  0x1d   : > { %258 = vst.msk [vmem:[#allocation2 + $0xf8] sm:$0xff] %vm225_vm0, %v4784_v0  ;;  %259 = vst.msk [vmem:[#allocation2 + $0x118] sm:$0xff] %vm225_vm0, %v4784_v0  ;;  %v330_v26 = vld [vmem:[%s4932_s24 + $0x98] sm:$0xff]  ;;  %v333_v30 = vld [vmem:[%s4932_s24 + $0xb0] sm:$0xff] }
  0x1e   : > { %260 = vst.msk [vmem:[#allocation2 + $0x138] sm:$0xff] %vm225_vm0, %v4784_v0  ;;  %261 = vst.msk [vmem:[#allocation2 + $0x158] sm:$0xff] %vm225_vm0, %v4784_v0  ;;  %v332_v31 = vld [vmem:[%s4932_s24 + $0xa8] sm:$0xff]  ;;  %v335_v32 = vld [vmem:[%s4932_s24 + $0xc0] sm:$0xff] }
  0x1f   : > { %262 = vst.msk [vmem:[#allocation2 + $0x178] sm:$0xff] %vm225_vm0, %v4784_v0  ;;  %263 = vst.msk [vmem:[#allocation2 + $0x198] sm:$0xff] %vm225_vm0, %v4784_v0  ;;  %v334_v36 = vld [vmem:[%s4932_s24 + $0xb8] sm:$0xff]  ;;  %v337_v37 = vld [vmem:[%s4932_s24 + $0xd0] sm:$0xff] }
  0x20   : > { %264 = vst.msk [vmem:[#allocation2 + $0x1b8] sm:$0xff] %vm225_vm0, %v4784_v0  ;;  %265 = vst.msk [vmem:[#allocation2 + $0x1d8] sm:$0xff] %vm225_vm0, %v4784_v0  ;;  %v336_v38 = vld [vmem:[%s4932_s24 + $0xc8] sm:$0xff]  ;;  %v339_v39 = vld [vmem:[%s4932_s24 + $0xe0] sm:$0xff] }
  0x21   : > { %266 = vst.msk [vmem:[#allocation2 + $0x1f8] sm:$0xff] %vm225_vm0, %v4784_v0  ;;  %267 = vst.msk [vmem:[#allocation2 + $0x218] sm:$0xff] %vm225_vm0, %v4784_v0  ;;  %v338_v40 = vld [vmem:[%s4932_s24 + $0xd8] sm:$0xff]  ;;  %v340_v41 = vld [vmem:[%s4932_s24 + $0xe8] sm:$0xff] }
  0x22   : > { %343 = vst.msk [vmem:[#allocation2 + $0x28] sm:$0xff] %vm225_vm0, %v311_v1  ;;  %345 = vst.msk [vmem:[#allocation2 + $0x48] sm:$0xff] %vm225_vm0, %v313_v2  ;;  %v341_v59 = vld [vmem:[%s4932_s24 + $0xf0] sm:$0xff]  ;;  %v342_v63 = vld [vmem:[%s4932_s24 + $0xf8] sm:$0xff]  ;;  %v626_v2 = vrot.slane %v4945_v8, 1  ;;  %s4795_s24 = smov 56  }
  0x23   : > { %344 = vst.msk [vmem:[#allocation2 + $0x30] sm:$0xff] %vm225_vm0, %v312_v3  ;;  %8238 = vst [vmem:[#allocation4_spill] sm:$0xff] %v4943_v7 }
  0x24   : > { %347 = vst.msk [vmem:[#allocation2 + $0x68] sm:$0xff] %vm225_vm0, %v315_v4  ;;  %346 = vst.msk [vmem:[#allocation2 + $0x50] sm:$0xff] %vm225_vm0, %v314_v5  ;;  %v378_v5 = vld [vmem:[#allocation2 + $0x18] sm:$0xff] }
  0x25   : > { %349 = vst.msk [vmem:[#allocation2 + $0x88] sm:$0xff] %vm225_vm0, %v317_v6  ;;  %348 = vst.msk [vmem:[#allocation2 + $0x70] sm:$0xff] %vm225_vm0, %v316_v9 }
  0x26   : > { %351 = vst.msk [vmem:[#allocation2 + $0xa8] sm:$0xff] %vm225_vm0, %v319_v12  ;;  %350 = vst.msk [vmem:[#allocation2 + $0x90] sm:$0xff] %vm225_vm0, %v318_v13  ;;  %v628_v12 = vrot.slane %v378_v5, 1  ;;  %v382_v13 = vld [vmem:[#allocation2 + $0x38] sm:$0xff] }
  0x27   : > { %353 = vst.msk [vmem:[#allocation2 + $0xc8] sm:$0xff] %vm225_vm0, %v321_v14  ;;  %352 = vst.msk [vmem:[#allocation2 + $0xb0] sm:$0xff] %vm225_vm0, %v320_v15 }
  0x28   : > { %355 = vst.msk [vmem:[#allocation2 + $0xe8] sm:$0xff] %vm225_vm0, %v323_v16  ;;  %8239 = vst [vmem:[#allocation5_spill] sm:$0xff] %v4972_v20 }
  0x29   : > { %354 = vst.msk [vmem:[#allocation2 + $0xd0] sm:$0xff] %vm225_vm0, %v322_v17  ;;  %357 = vst.msk [vmem:[#allocation2 + $0x108] sm:$0xff] %vm225_vm0, %v325_v18  ;;  %v4988_v27 = vld [vmem:[#allocation2 + $0x28] sm:$0xff]  ;;  %v629_v17 = vsel %vm624_vm3, %v626_v2, %v628_v12  ;;  %v633_v18 = vrot.slane %v382_v13, 1  ;;  %v402_v12 = vld [vmem:[#allocation2 + $0xd8] sm:$0xff] }
  0x2a   : > { %356 = vst.msk [vmem:[#allocation2 + $0xf0] sm:$0xff] %vm225_vm0, %v324_v19  ;;  %359 = vst.msk [vmem:[#allocation2 + $0x128] sm:$0xff] %vm225_vm0, %v327_v21  ;;  %v4990_v28 = vld [vmem:[#allocation2 + $0x48] sm:$0xff]  ;;  %737 = vrot.lane.b32.xlu1 %v4988_v27, %s4785_s25  ;;  %v4997_v29 = vld [vmem:[#allocation2 + $0x30] sm:$0xff]  ;;  %v630_v9 = vrot.slane %v4988_v27, 1 }
  0x2b   : > { %358 = vst.msk [vmem:[#allocation2 + $0x110] sm:$0xff] %vm225_vm0, %v326_v22  ;;  %361 = vst.msk [vmem:[#allocation2 + $0x148] sm:$0xff] %vm225_vm0, %v329_v23  ;;  %741 = vrot.lane.b32.xlu0 %v4990_v28, %s4785_s25  ;;  %v5006_v33 = vld [vmem:[#allocation2 + $0x68] sm:$0xff]  ;;  %v5011_v34 = vld [vmem:[#allocation2 + $0x50] sm:$0xff]  ;;  %v631_v11 = vrot.slane %v4997_v29, 1  ;;  %v635_v15 = vrot.slane %v4990_v28, 1 }
  0x2c   : > { %360 = vst.msk [vmem:[#allocation2 + $0x130] sm:$0xff] %vm225_vm0, %v328_v24  ;;  %363 = vst.msk [vmem:[#allocation2 + $0x168] sm:$0xff] %vm225_vm0, %v331_v25  ;;  %v5015_v35 = vld [vmem:[#allocation2 + $0x88] sm:$0xff]  ;;  %v5028_v42 = vld [vmem:[#allocation2 + $0x70] sm:$0xff]  ;;  %v636_v16 = vrot.slane %v5011_v34, 1  ;;  %v640_v22 = vrot.slane %v5006_v33, 1 }
  0x2d   : > { %362 = vst.msk [vmem:[#allocation2 + $0x150] sm:$0xff] %vm225_vm0, %v330_v26  ;;  %365 = vst.msk [vmem:[#allocation2 + $0x188] sm:$0xff] %vm225_vm0, %v333_v30  ;;  %v5035_v43 = vld [vmem:[#allocation2 + $0xa8] sm:$0xff]  ;;  %v5039_v44 = vld [vmem:[#allocation2 + $0x90] sm:$0xff]  ;;  %v5218_v14 = vsel %vm624_vm3, %v630_v9, %v631_v11  ;;  %v641_v23 = vrot.slane %v5028_v42, 1  ;;  %v5234_v24 = vsel %vm624_vm3, %v631_v11, %v633_v18  ;;  %v658_v18 = vrot.slane %v402_v12, 1 }
  0x2e   : > { %364 = vst.msk [vmem:[#allocation2 + $0x170] sm:$0xff] %vm225_vm0, %v332_v31  ;;  %367 = vst.msk [vmem:[#allocation2 + $0x1a8] sm:$0xff] %vm225_vm0, %v335_v32  ;;  %739 = vrot.lane.b32.xlu1 %v4997_v29, %s4785_s25  ;;  %v5043_v45 = vld [vmem:[#allocation2 + $0xc8] sm:$0xff]  ;;  %v5047_v46 = vld [vmem:[#allocation2 + $0xb0] sm:$0xff]  ;;  %v5228_v21 = vsel %vm624_vm3, %v635_v15, %v636_v16  ;;  %v645_v31 = vrot.slane %v5015_v35, 1  ;;  %v646_v32 = vrot.slane %v5039_v44, 1 }
  0x2f   : > { %745 = vrot.lane.b32.xlu0 %v5006_v33, %s4785_s25  ;;  %366 = vst.msk [vmem:[#allocation2 + $0x190] sm:$0xff] %vm225_vm0, %v334_v36  ;;  %369 = vst.msk [vmem:[#allocation2 + $0x1c8] sm:$0xff] %vm225_vm0, %v337_v37  ;;  %v5051_v47 = vld [vmem:[#allocation2 + $0xe8] sm:$0xff]  ;;  %v386_v19 = vld [vmem:[#allocation2 + $0x58] sm:$0xff]  ;;  %v5239_v30 = vsel %vm624_vm3, %v640_v22, %v641_v23  ;;  %v655_v5 = vrot.slane %v5043_v45, 1 }
  0x30   : > { %368 = vst.msk [vmem:[#allocation2 + $0x1b0] sm:$0xff] %vm225_vm0, %v336_v38  ;;  %371 = vst.msk [vmem:[#allocation2 + $0x1e8] sm:$0xff] %vm225_vm0, %v339_v39  ;;  %v5055_v48 = vld [vmem:[#allocation2 + $0xd0] sm:$0xff]  ;;  %v5059_v49 = vld [vmem:[#allocation2 + $0x108] sm:$0xff]  ;;  %v638_v25 = vrot.slane %v386_v19, 1  ;;  %v5251_v39 = vsel %vm624_vm3, %v645_v31, %v646_v32  ;;  %v660_v15 = vrot.slane %v5051_v47, 1 }
  0x31   : > { %370 = vst.msk [vmem:[#allocation2 + $0x1d0] sm:$0xff] %vm225_vm0, %v338_v40  ;;  %372 = vst.msk [vmem:[#allocation2 + $0x1f0] sm:$0xff] %vm225_vm0, %v340_v41  ;;  %v5063_v50 = vld [vmem:[#allocation2 + $0xf0] sm:$0xff]  ;;  %v5067_v51 = vld [vmem:[#allocation2 + $0x128] sm:$0xff]  ;;  %v650_v40 = vrot.slane %v5035_v43, 1  ;;  %v651_v41 = vrot.slane %v5047_v46, 1 }
  0x32   : > { %743 = vrot.lane.b32.xlu1 %v5011_v34, %s4785_s25  ;;  %v5071_v52 = vld [vmem:[#allocation2 + $0x110] sm:$0xff]  ;;  %v5075_v53 = vld [vmem:[#allocation2 + $0x148] sm:$0xff]  ;;  %373 = vst.msk [vmem:[#allocation2 + $0x208] sm:$0xff] %vm225_vm0, %v341_v59  ;;  %374 = vst.msk [vmem:[#allocation2 + $0x210] sm:$0xff] %vm225_vm0, %v342_v63  ;;  %v5246_v36 = vsel %vm624_vm3, %v636_v16, %v638_v25  ;;  %v661_v16 = vrot.slane %v5063_v50, 1 }
  0x33   : > { %749 = vrot.lane.b32.xlu0 %v5015_v35, %s4785_s25  ;;  %v5079_v54 = vld [vmem:[#allocation2 + $0x130] sm:$0xff]  ;;  %v5083_v55 = vld [vmem:[#allocation2 + $0x168] sm:$0xff]  ;;  %269 = vst.msk [vmem:[#allocation3] sm:$0xff] %vm268_vm2, %v4784_v0  ;;  %270 = vst.msk [vmem:[#allocation3 + $0x8] sm:$0xff] %vm268_vm2, %v4784_v0  ;;  %v666_v25 = vrot.slane %v5071_v52, 1 }
  0x34   : > { %v5087_v56 = vld [vmem:[#allocation2 + $0x150] sm:$0xff]  ;;  %v5091_v57 = vld [vmem:[#allocation2 + $0x188] sm:$0xff]  ;;  %271 = vst.msk [vmem:[#allocation3 + $0x10] sm:$0xff] %vm268_vm2, %v4784_v0  ;;  %272 = vst.msk [vmem:[#allocation3 + $0x18] sm:$0xff] %vm268_vm2, %v4784_v0  ;;  %v5287_v22 = vsel %vm624_vm3, %v660_v15, %v661_v16 }
  0x35   : > { %v5095_v58 = vld [vmem:[#allocation2 + $0x170] sm:$0xff]  ;;  %v5100_v60 = vld [vmem:[#allocation2 + $0x1a8] sm:$0xff]  ;;  %274 = vst.msk [vmem:[#allocation3 + $0x220] sm:$0xff] %vm268_vm2, %v4784_v0  ;;  %275 = vst.msk [vmem:[#allocation3 + $0x228] sm:$0xff] %vm268_vm2, %v4784_v0 }
  0x36   : > { %747 = vrot.lane.b32.xlu1 %v5028_v42, %s4785_s25  ;;  %276 = vst.msk [vmem:[#allocation3 + $0x230] sm:$0xff] %vm268_vm2, %v4784_v0  ;;  %277 = vst.msk [vmem:[#allocation3 + $0x238] sm:$0xff] %vm268_vm2, %v4784_v0  ;;  %v5185_v61 = vld [vmem:[#allocation2 + $0x190] sm:$0xff]  ;;  %v5189_v62 = vld [vmem:[#allocation2 + $0x1c8] sm:$0xff] }
  0x37   : > { %753 = vrot.lane.b32.xlu0 %v5035_v43, %s4785_s25  ;;  %279 = vst.msk [vmem:[#allocation3 + $0x20] sm:$0xff] %vm268_vm2, %v4784_v0  ;;  %280 = vst.msk [vmem:[#allocation3 + $0x40] sm:$0xff] %vm268_vm2, %v4784_v0  ;;  %v5194_v1 = vld [vmem:[#allocation2 + $0x1b0] sm:$0xff]  ;;  %v5201_v3 = vld [vmem:[#allocation2 + $0x1e8] sm:$0xff] }
  0x38   : > { %281 = vst.msk [vmem:[#allocation3 + $0x60] sm:$0xff] %vm268_vm2, %v4784_v0  ;;  %282 = vst.msk [vmem:[#allocation3 + $0x80] sm:$0xff] %vm268_vm2, %v4784_v0  ;;  %v5205_v4 = vld [vmem:[#allocation2 + $0x1d0] sm:$0xff]  ;;  %v390_v26 = vld [vmem:[#allocation2 + $0x78] sm:$0xff]  ;;  %v691_v10 = vrot.slane %v5194_v1, 1 }
  0x39   : > { %283 = vst.msk [vmem:[#allocation3 + $0xa0] sm:$0xff] %vm268_vm2, %v4784_v0  ;;  %284 = vst.msk [vmem:[#allocation3 + $0xc0] sm:$0xff] %vm268_vm2, %v4784_v0  ;;  %v5214_v8 = vld [vmem:[#allocation2 + $0x1f0] sm:$0xff]  ;;  %v643_v37 = vrot.slane %v390_v26, 1  ;;  %v394_v38 = vld [vmem:[#allocation2 + $0x98] sm:$0xff] }
  0x3a   : > { %751 = vrot.lane.b32.xlu1 %v5039_v44, %s4785_s25  ;;  %285 = vst.msk [vmem:[#allocation3 + $0xe0] sm:$0xff] %vm268_vm2, %v4784_v0  ;;  %286 = vst.msk [vmem:[#allocation3 + $0x100] sm:$0xff] %vm268_vm2, %v4784_v0  ;;  %v648_v63 = vrot.slane %v394_v38, 1  ;;  %v406_v19 = vld [vmem:[#allocation2 + $0xf8] sm:$0xff]  ;;  %v670_v38 = vrot.slane %v5067_v51, 1 }
  0x3b   : > { %757 = vrot.lane.b32.xlu0 %v5043_v45, %s4785_s25  ;;  %287 = vst.msk [vmem:[#allocation3 + $0x120] sm:$0xff] %vm268_vm2, %v4784_v0  ;;  %288 = vst.msk [vmem:[#allocation3 + $0x140] sm:$0xff] %vm268_vm2, %v4784_v0  ;;  %v5258_v59 = vsel %vm624_vm3, %v641_v23, %v643_v37  ;;  %v665_v23 = vrot.slane %v5059_v49, 1  ;;  %v663_v31 = vrot.slane %v406_v19, 1  ;;  %v680_v19 = vrot.slane %v5083_v55, 1 }
  0x3c   : > { %289 = vst.msk [vmem:[#allocation3 + $0x160] sm:$0xff] %vm268_vm2, %v4784_v0  ;;  %290 = vst.msk [vmem:[#allocation3 + $0x180] sm:$0xff] %vm268_vm2, %v4784_v0  ;;  %v5270_v9 = vsel %vm624_vm3, %v646_v32, %v648_v63  ;;  %v410_v32 = vld [vmem:[#allocation2 + $0x118] sm:$0xff] }
  0x3d   : > { %291 = vst.msk [vmem:[#allocation3 + $0x1a0] sm:$0xff] %vm268_vm2, %v4784_v0  ;;  %292 = vst.msk [vmem:[#allocation3 + $0x1c0] sm:$0xff] %vm268_vm2, %v4784_v0  ;;  %v5299_v37 = vsel %vm624_vm3, %v665_v23, %v666_v25  ;;  %v668_v63 = vrot.slane %v410_v32, 1  ;;  %v681_v23 = vrot.slane %v5095_v58, 1  ;;  %v422_v32 = vld [vmem:[#allocation2 + $0x178] sm:$0xff] }
  0x3e   : > { %755 = vrot.lane.b32.xlu1 %v5047_v46, %s4785_s25  ;;  %293 = vst.msk [vmem:[#allocation3 + $0x1e0] sm:$0xff] %vm268_vm2, %v4784_v0  ;;  %294 = vst.msk [vmem:[#allocation3 + $0x200] sm:$0xff] %vm268_vm2, %v4784_v0 }
  0x3f   : > { %761 = vrot.lane.b32.xlu0 %v5051_v47, %s4785_s25  ;;  %295 = vst.msk [vmem:[#allocation3 + $0x38] sm:$0xff] %vm268_vm2, %v4784_v0  ;;  %296 = vst.msk [vmem:[#allocation3 + $0x58] sm:$0xff] %vm268_vm2, %v4784_v0  ;;  %v5318_v12 = vsel %vm624_vm3, %v666_v25, %v668_v63  ;;  %v685_v63 = vrot.slane %v5091_v57, 1 }
  0x40   : > { %297 = vst.msk [vmem:[#allocation3 + $0x78] sm:$0xff] %vm268_vm2, %v4784_v0  ;;  %298 = vst.msk [vmem:[#allocation3 + $0x98] sm:$0xff] %vm268_vm2, %v4784_v0 }
  0x41   : > { %299 = vst.msk [vmem:[#allocation3 + $0xb8] sm:$0xff] %vm268_vm2, %v4784_v0  ;;  %300 = vst.msk [vmem:[#allocation3 + $0xd8] sm:$0xff] %vm268_vm2, %v4784_v0 }
  0x42   : > { %759 = vrot.lane.b32.xlu1 %v5055_v48, %s4785_s25  ;;  %301 = vst.msk [vmem:[#allocation3 + $0xf8] sm:$0xff] %vm268_vm2, %v4784_v0  ;;  %302 = vst.msk [vmem:[#allocation3 + $0x118] sm:$0xff] %vm268_vm2, %v4784_v0 }
  0x43   : > { %765 = vrot.lane.b32.xlu0 %v5059_v49, %s4785_s25  ;;  %303 = vst.msk [vmem:[#allocation3 + $0x138] sm:$0xff] %vm268_vm2, %v4784_v0  ;;  %304 = vst.msk [vmem:[#allocation3 + $0x158] sm:$0xff] %vm268_vm2, %v4784_v0 }
  0x44   : > { %305 = vst.msk [vmem:[#allocation3 + $0x178] sm:$0xff] %vm268_vm2, %v4784_v0  ;;  %306 = vst.msk [vmem:[#allocation3 + $0x198] sm:$0xff] %vm268_vm2, %v4784_v0 }
  0x45   : > { %307 = vst.msk [vmem:[#allocation3 + $0x1b8] sm:$0xff] %vm268_vm2, %v4784_v0  ;;  %308 = vst.msk [vmem:[#allocation3 + $0x1d8] sm:$0xff] %vm268_vm2, %v4784_v0 }
  0x46   : > { %763 = vrot.lane.b32.xlu1 %v5063_v50, %s4785_s25  ;;  %309 = vst.msk [vmem:[#allocation3 + $0x1f8] sm:$0xff] %vm268_vm2, %v4784_v0  ;;  %310 = vst.msk [vmem:[#allocation3 + $0x218] sm:$0xff] %vm268_vm2, %v4784_v0  ;;  %v625_v0 = vrot.slane %v4943_v7, 1  ;;  %v696_v7 = vrot.slane %v5205_v4, 1 }
  0x47   : > { %769 = vrot.lane.b32.xlu0 %v5067_v51, %s4785_s25 }
  0x48   : > { %v627_v6 = vsel %vm624_vm3, %v625_v0, %v626_v2  ;;  %v398_v0 = vld [vmem:[#allocation2 + $0xb8] sm:$0xff]  ;;  %v5263_v2 = vsel %vm624_vm3, %v650_v40, %v651_v41  ;;  %v671_v40 = vrot.slane %v5079_v54, 1 }
  0x49   : > { %v653_v11 = vrot.slane %v398_v0, 1  ;;  %v414_v0 = vld [vmem:[#allocation2 + $0x138] sm:$0xff] }
  0x4a   : > { %767 = vrot.lane.b32.xlu1 %v5071_v52, %s4785_s25  ;;  %v673_v15 = vrot.slane %v414_v0, 1  ;;  %v686_v0 = vrot.slane %v5185_v61, 1 }
  0x4b   : > { %773 = vrot.lane.b32.xlu0 %v5075_v53, %s4785_s25 }
  0x4e   : > { %771 = vrot.lane.b32.xlu1 %v5079_v54, %s4785_s25 }
  0x4f   : > { %777 = vrot.lane.b32.xlu0 %v5083_v55, %s4785_s25 }
  0x52   : > { %775 = vrot.lane.b32.xlu1 %v5087_v56, %s4785_s25 }
  0x53   : > { %781 = vrot.lane.b32.xlu0 %v5091_v57, %s4785_s25 }
  0x56   : > { %779 = vrot.lane.b32.xlu1 %v5095_v58, %s4785_s25 }
  0x57   : > { %785 = vrot.lane.b32.xlu0 %v5100_v60, %s4785_s25 }
  0x5a   : > { %783 = vrot.lane.b32.xlu1 %v5185_v61, %s4785_s25 }
  0x5b   : > { %789 = vrot.lane.b32.xlu0 %v5189_v62, %s4785_s25 }
  0x5e   : > { %787 = vrot.lane.b32.xlu1 %v5194_v1, %s4785_s25 }
  0x5f   : > { %793 = vrot.lane.b32.xlu0 %v5201_v3, %s4785_s25 }
  0x62   : > { %791 = vrot.lane.b32.xlu1 %v5205_v4, %s4785_s25 }
  0x63   : > { %829 = vrot.lane.b32.xlu0 %v627_v6, %s4786_s26  ;;  %v656_v6 = vrot.slane %v5055_v48, 1 }
  0x65   : > { %v5275_v13 = vsel %vm624_vm3, %v655_v5, %v656_v6  ;;  %v5294_v26 = vsel %vm624_vm3, %v656_v6, %v658_v18  ;;  %v5311_v5 = vsel %vm624_vm3, %v670_v38, %v671_v40  ;;  %v675_v6 = vrot.slane %v5075_v53, 1 }
  0x66   : > { %795 = vrot.lane.b32.xlu1 %v5214_v8, %s4785_s25  ;;  %v5335_v38 = vsel %vm624_vm3, %v680_v19, %v681_v23  ;;  %v690_v19 = vrot.slane %v5100_v60, 1  ;;  %s4796_s25 = smov 64  }
  0x67   : > { %833 = vrot.lane.b32.xlu0 %v5218_v14, %s4786_s26  ;;  %8241 = vst [vmem:[#allocation7_spill] sm:$0xff] %v5335_v38 }
  0x6a   : > { %831 = vrot.lane.b32.xlu1 %v629_v17, %s4786_s26  ;;  %v5282_v17 = vsel %vm624_vm3, %v651_v41, %v653_v11  ;;  %v5306_v41 = vsel %vm624_vm3, %v661_v16, %v663_v31  ;;  %v676_v11 = vrot.slane %v5087_v56, 1  ;;  %v418_v16 = vld [vmem:[#allocation2 + $0x158] sm:$0xff]  ;;  %v5330_v31 = vsel %vm624_vm3, %v671_v40, %v673_v15 }
  0x6b   : > { %837 = vrot.lane.b32.xlu0 %v5228_v21, %s4786_s26  ;;  %8240 = vst [vmem:[#allocation6_spill] sm:$0xff] %v5330_v31  ;;  %v678_v25 = vrot.slane %v418_v16, 1  ;;  %v683_v40 = vrot.slane %v422_v32, 1  ;;  %v426_v15 = vld [vmem:[#allocation2 + $0x198] sm:$0xff]  ;;  %v5347_v16 = vsel %vm624_vm3, %v685_v63, %v686_v0  ;;  %v5359_v32 = vsel %vm624_vm3, %v690_v19, %v691_v10 }
  0x6c   : > { %v5323_v18 = vsel %vm624_vm3, %v675_v6, %v676_v11  ;;  %8243 = vst [vmem:[#allocation9_spill] sm:$0xff] %v5347_v16  ;;  %8245 = vst [vmem:[#allocation11_spill] sm:$0xff] %v5359_v32  ;;  %v695_v63 = vrot.slane %v5189_v62, 1 }
  0x6d   : > { %v5342_v6 = vsel %vm624_vm3, %v676_v11, %v678_v25  ;;  %v5354_v20 = vsel %vm624_vm3, %v681_v23, %v683_v40  ;;  %v688_v11 = vrot.slane %v426_v15, 1  ;;  %v430_v25 = vld [vmem:[#allocation2 + $0x1b8] sm:$0xff] }
  0x6e   : > { %835 = vrot.lane.b32.xlu1 %v5234_v24, %s4786_s26  ;;  %8242 = vst [vmem:[#allocation8_spill] sm:$0xff] %v5342_v6  ;;  %8244 = vst [vmem:[#allocation10_spill] sm:$0xff] %v5354_v20  ;;  %v693_v40 = vrot.slane %v430_v25, 1  ;;  %v434_v15 = vld [vmem:[#allocation2 + $0x1d8] sm:$0xff]  ;;  %v5373_v19 = vsel %vm624_vm3, %v695_v63, %v696_v7  ;;  %v379_v25 = vld [vmem:[#allocation2 + $0x20] sm:$0xff] }
  0x6f   : > { %841 = vrot.lane.b32.xlu0 %v5239_v30, %s4786_s26  ;;  %v5368_v23 = vsel %vm624_vm3, %v686_v0, %v688_v11  ;;  %8248 = vst [vmem:[#allocation14_spill] sm:$0xff] %v5373_v19  ;;  %v698_v11 = vrot.slane %v434_v15, 1  ;;  %v438_v63 = vld [vmem:[#allocation2 + $0x1f8] sm:$0xff] }
  0x70   : > { %8247 = vst [vmem:[#allocation13_spill] sm:$0xff] %v5368_v23  ;;  %v5382_v0 = vsel %vm624_vm3, %v691_v10, %v693_v40  ;;  %v501_v10 = vrot.slane %v379_v25, 7  ;;  %v703_v15 = vrot.slane %v438_v63, 1  ;;  %v507_v25 = vrot.slane %v4990_v28, 7 }
  0x71   : > { %8250 = vst [vmem:[#allocation16_spill] sm:$0xff] %v5382_v0  ;;  %v5397_v40 = vsel %vm624_vm3, %v696_v7, %v698_v11  ;;  %v387_v11 = vld [vmem:[#allocation2 + $0x60] sm:$0xff] }
  0x72   : > { %839 = vrot.lane.b32.xlu1 %v5246_v36, %s4786_s26  ;;  %8254 = vst [vmem:[#allocation20_spill] sm:$0xff] %v5397_v40 }
  0x73   : > { %845 = vrot.lane.b32.xlu0 %v5251_v39, %s4786_s26 }
  0x76   : > { %843 = vrot.lane.b32.xlu1 %v5258_v59, %s4786_s26 }
  0x77   : > { %849 = vrot.lane.b32.xlu0 %v5263_v2, %s4786_s26 }
  0x7a   : > { %847 = vrot.lane.b32.xlu1 %v5270_v9, %s4786_s26 }
  0x7b   : > { %853 = vrot.lane.b32.xlu0 %v5275_v13, %s4786_s26 }
  0x7e   : > { %851 = vrot.lane.b32.xlu1 %v5282_v17, %s4786_s26 }
  0x7f   : > { %857 = vrot.lane.b32.xlu0 %v5287_v22, %s4786_s26 }
  0x82   : > { %855 = vrot.lane.b32.xlu1 %v5294_v26, %s4786_s26 }
  0x83   : > { %861 = vrot.lane.b32.xlu0 %v5299_v37, %s4786_s26 }
  0x86   : > { %859 = vrot.lane.b32.xlu1 %v5306_v41, %s4786_s26 }
  0x87   : > { %865 = vrot.lane.b32.xlu0 %v5311_v5, %s4786_s26 }
  0x8a   : > { %863 = vrot.lane.b32.xlu1 %v5318_v12, %s4786_s26 }
  0x8b   : > { %869 = vrot.lane.b32.xlu0 %v5323_v18, %s4786_s26 }
  0x8e   : > { %867 = vrot.lane.b32.xlu1 %v5330_v31, %s4786_s26 }
  0x8f   : > { %873 = vrot.lane.b32.xlu0 %v5335_v38, %s4786_s26  ;;  %v5363_v38 = vpop.permute.xlu0 %733 }
  0x90   : > { %8246 = vst [vmem:[#allocation12_spill] sm:$0xff] %v5363_v38 }
  0x92   : > { %871 = vrot.lane.b32.xlu1 %v5342_v6, %s4786_s26  ;;  %v701_v6 = vrot.slane %v5214_v8, 1 }
  0x93   : > { %877 = vrot.lane.b32.xlu0 %v5347_v16, %s4786_s26  ;;  %v700_v16 = vrot.slane %v5201_v3, 1  ;;  %v5377_v31 = vpop.permute.xlu0 %735 }
  0x94   : > { %8249 = vst [vmem:[#allocation15_spill] sm:$0xff] %v5377_v31  ;;  %v502_v31 = vrot.slane %v4988_v27, 7  ;;  %v5412_v7 = vsel %vm624_vm3, %v701_v6, %v703_v15  ;;  %v391_v15 = vld [vmem:[#allocation2 + $0x80] sm:$0xff] }
  0x95   : > { %8258 = vst [vmem:[#allocation24_spill] sm:$0xff] %v5412_v7 }
  0x96   : > { %875 = vrot.lane.b32.xlu1 %v5354_v20, %s4786_s26 }
  0x97   : > { %881 = vrot.lane.b32.xlu0 %v5359_v32, %s4786_s26  ;;  %v5389_v32 = vsel %vm624_vm3, %v700_v16, %v701_v6  ;;  %v512_v6 = vrot.slane %v5006_v33, 7 }
  0x98   : > { %8252 = vst [vmem:[#allocation18_spill] sm:$0xff] %v5389_v32 }
  0x9a   : > { %879 = vrot.lane.b32.xlu1 %v5368_v23, %s4786_s26 }
  0x9b   : > { %885 = vrot.lane.b32.xlu0 %v5373_v19, %s4786_s26 }
  0x9c   : > { %v5384_v38 = vpop.permute.xlu1 %737 }
  0x9d   : > { %8251 = vst [vmem:[#allocation17_spill] sm:$0xff] %v5384_v38  ;;  %v5391_v20 = vpop.permute.xlu0 %741  ;;  %v383_v38 = vld [vmem:[#allocation2 + $0x40] sm:$0xff] }
  0x9e   : > { %8253 = vst [vmem:[#allocation19_spill] sm:$0xff] %v5391_v20  ;;  %883 = vrot.lane.b32.xlu1 %v5382_v0, %s4786_s26  ;;  %v5408_v20 = vsel %vm495_vm1, %v501_v10, %v502_v31  ;;  %v506_v0 = vrot.slane %v383_v38, 7  ;;  %v511_v10 = vrot.slane %v387_v11, 7  ;;  %v516_v11 = vrot.slane %v391_v15, 7 }
  0x9f   : > { %889 = vrot.lane.b32.xlu0 %v5389_v32, %s4786_s26  ;;  %8257 = vst [vmem:[#allocation23_spill] sm:$0xff] %v5408_v20 }
  0xa0   : > { %v5399_v23 = vpop.permute.xlu1 %739  ;;  %v5424_v38 = vsel %vm495_vm1, %v506_v0, %v507_v25  ;;  %v5440_v0 = vsel %vm495_vm1, %v511_v10, %v512_v6 }
  0xa1   : > { %8255 = vst [vmem:[#allocation21_spill] sm:$0xff] %v5399_v23  ;;  %v5403_v16 = vpop.permute.xlu0 %745  ;;  %8261 = vst [vmem:[#allocation27_spill] sm:$0xff] %v5424_v38 }
  0xa2   : > { %8256 = vst [vmem:[#allocation22_spill] sm:$0xff] %v5403_v16  ;;  %887 = vrot.lane.b32.xlu1 %v5397_v40, %s4786_s26  ;;  %v504_v16 = vrot.slane %v4997_v29, 7  ;;  %8265 = vst [vmem:[#allocation31_spill] sm:$0xff] %v5440_v0 }
  0xa3   : > { %925 = vrot.lane.b32.xlu0 %v5408_v20, %s4787_s27 }
  0xa4   : > { %v5414_v63 = vpop.permute.xlu1 %743 }
  0xa5   : > { %8259 = vst [vmem:[#allocation25_spill] sm:$0xff] %v5414_v63  ;;  %v5419_v23 = vpop.permute.xlu0 %749  ;;  %v5432_v63 = vsel %vm495_vm1, %v502_v31, %v504_v16  ;;  %v514_v16 = vrot.slane %v5028_v42, 7 }
  0xa6   : > { %8260 = vst [vmem:[#allocation26_spill] sm:$0xff] %v5419_v23  ;;  %891 = vrot.lane.b32.xlu1 %v5412_v7, %s4786_s26  ;;  %8263 = vst [vmem:[#allocation29_spill] sm:$0xff] %v5432_v63  ;;  %v509_v23 = vrot.slane %v5011_v34, 7  ;;  %v517_v7 = vrot.slane %v5015_v35, 7 }
  0xa7   : > { %929 = vrot.lane.b32.xlu0 %v5424_v38, %s4787_s27 }
  0xa8   : > { %v5427_v40 = vpop.permute.xlu1 %747  ;;  %v5448_v31 = vsel %vm495_vm1, %v507_v25, %v509_v23  ;;  %v5456_v10 = vsel %vm495_vm1, %v516_v11, %v517_v7  ;;  %v5464_v23 = vsel %vm495_vm1, %v512_v6, %v514_v16  ;;  %v519_v25 = vrot.slane %v5039_v44, 7 }
  0xa9   : > { %8262 = vst [vmem:[#allocation28_spill] sm:$0xff] %v5427_v40  ;;  %v5435_v20 = vpop.permute.xlu0 %753  ;;  %v395_v40 = vld [vmem:[#allocation2 + $0xa0] sm:$0xff]  ;;  %8267 = vst [vmem:[#allocation33_spill] sm:$0xff] %v5448_v31  ;;  %v524_v16 = vrot.slane %v5047_v46, 7 }
  0xaa   : > { %8264 = vst [vmem:[#allocation30_spill] sm:$0xff] %v5435_v20  ;;  %927 = vrot.lane.b32.xlu1 %v5432_v63, %s4787_s27  ;;  %8269 = vst [vmem:[#allocation35_spill] sm:$0xff] %v5456_v10  ;;  %v521_v15 = vrot.slane %v395_v40, 7  ;;  %v522_v63 = vrot.slane %v5035_v43, 7  ;;  %v5480_v6 = vsel %vm495_vm1, %v517_v7, %v519_v25  ;;  %v529_v25 = vrot.slane %v5055_v48, 7 }
  0xab   : > { %933 = vrot.lane.b32.xlu0 %v5440_v0, %s4787_s27  ;;  %8271 = vst [vmem:[#allocation37_spill] sm:$0xff] %v5464_v23  ;;  %8275 = vst [vmem:[#allocation41_spill] sm:$0xff] %v5480_v6 }
  0xac   : > { %v5443_v32 = vpop.permute.xlu1 %751  ;;  %v5472_v40 = vsel %vm495_vm1, %v521_v15, %v522_v63  ;;  %v5496_v7 = vsel %vm495_vm1, %v522_v63, %v524_v16  ;;  %v534_v16 = vrot.slane %v5063_v50, 7 }
  0xad   : > { %8266 = vst [vmem:[#allocation32_spill] sm:$0xff] %v5443_v32  ;;  %v5451_v20 = vpop.permute.xlu0 %757  ;;  %v399_v32 = vld [vmem:[#allocation2 + $0xc0] sm:$0xff]  ;;  %8273 = vst [vmem:[#allocation39_spill] sm:$0xff] %v5472_v40 }
  0xae   : > { %8268 = vst [vmem:[#allocation34_spill] sm:$0xff] %v5451_v20  ;;  %931 = vrot.lane.b32.xlu1 %v5448_v31, %s4787_s27  ;;  %v526_v11 = vrot.slane %v399_v32, 7  ;;  %v527_v31 = vrot.slane %v5043_v45, 7  ;;  %8279 = vst [vmem:[#allocation45_spill] sm:$0xff] %v5496_v7 }
  0xaf   : > { %937 = vrot.lane.b32.xlu0 %v5456_v10, %s4787_s27 }
  0xb0   : > { %v5459_v38 = vpop.permute.xlu1 %755  ;;  %v5488_v32 = vsel %vm495_vm1, %v526_v11, %v527_v31  ;;  %v5512_v63 = vsel %vm495_vm1, %v527_v31, %v529_v25  ;;  %v539_v25 = vrot.slane %v5071_v52, 7 }
  0xb1   : > { %8270 = vst [vmem:[#allocation36_spill] sm:$0xff] %v5459_v38  ;;  %v5467_v20 = vpop.permute.xlu0 %761  ;;  %v403_v38 = vld [vmem:[#allocation2 + $0xe0] sm:$0xff]  ;;  %8277 = vst [vmem:[#allocation43_spill] sm:$0xff] %v5488_v32 }
  0xb2   : > { %8272 = vst [vmem:[#allocation38_spill] sm:$0xff] %v5467_v20  ;;  %935 = vrot.lane.b32.xlu1 %v5464_v23, %s4787_s27  ;;  %v531_v15 = vrot.slane %v403_v38, 7  ;;  %v532_v23 = vrot.slane %v5051_v47, 7  ;;  %8283 = vst [vmem:[#allocation49_spill] sm:$0xff] %v5512_v63 }
  0xb3   : > { %941 = vrot.lane.b32.xlu0 %v5472_v40, %s4787_s27 }
  0xb4   : > { %v5475_v0 = vpop.permute.xlu1 %759  ;;  %v5504_v38 = vsel %vm495_vm1, %v531_v15, %v532_v23  ;;  %v5528_v31 = vsel %vm495_vm1, %v532_v23, %v534_v16  ;;  %v544_v16 = vrot.slane %v5079_v54, 7 }
  0xb5   : > { %8274 = vst [vmem:[#allocation40_spill] sm:$0xff] %v5475_v0  ;;  %v5483_v20 = vpop.permute.xlu0 %765  ;;  %v407_v0 = vld [vmem:[#allocation2 + $0x100] sm:$0xff]  ;;  %8281 = vst [vmem:[#allocation47_spill] sm:$0xff] %v5504_v38 }
  0xb6   : > { %8276 = vst [vmem:[#allocation42_spill] sm:$0xff] %v5483_v20  ;;  %939 = vrot.lane.b32.xlu1 %v5480_v6, %s4787_s27  ;;  %v536_v11 = vrot.slane %v407_v0, 7  ;;  %v537_v6 = vrot.slane %v5059_v49, 7  ;;  %8287 = vst [vmem:[#allocation53_spill] sm:$0xff] %v5528_v31 }
  0xb7   : > { %945 = vrot.lane.b32.xlu0 %v5488_v32, %s4787_s27 }
  0xb8   : > { %v5491_v10 = vpop.permute.xlu1 %763  ;;  %v5520_v0 = vsel %vm495_vm1, %v536_v11, %v537_v6  ;;  %v5544_v23 = vsel %vm495_vm1, %v537_v6, %v539_v25  ;;  %v549_v25 = vrot.slane %v5087_v56, 7 }
  0xb9   : > { %8278 = vst [vmem:[#allocation44_spill] sm:$0xff] %v5491_v10  ;;  %v5499_v20 = vpop.permute.xlu0 %769  ;;  %v411_v10 = vld [vmem:[#allocation2 + $0x120] sm:$0xff]  ;;  %8285 = vst [vmem:[#allocation51_spill] sm:$0xff] %v5520_v0 }
  0xba   : > { %8280 = vst [vmem:[#allocation46_spill] sm:$0xff] %v5499_v20  ;;  %943 = vrot.lane.b32.xlu1 %v5496_v7, %s4787_s27  ;;  %v541_v15 = vrot.slane %v411_v10, 7  ;;  %v542_v7 = vrot.slane %v5067_v51, 7  ;;  %8291 = vst [vmem:[#allocation57_spill] sm:$0xff] %v5544_v23 }
  0xbb   : > { %949 = vrot.lane.b32.xlu0 %v5504_v38, %s4787_s27 }
  0xbc   : > { %v5507_v40 = vpop.permute.xlu1 %767  ;;  %v5536_v10 = vsel %vm495_vm1, %v541_v15, %v542_v7  ;;  %v5560_v6 = vsel %vm495_vm1, %v542_v7, %v544_v16  ;;  %v554_v16 = vrot.slane %v5095_v58, 7 }
  0xbd   : > { %8282 = vst [vmem:[#allocation48_spill] sm:$0xff] %v5507_v40  ;;  %v5515_v20 = vpop.permute.xlu0 %773  ;;  %v415_v40 = vld [vmem:[#allocation2 + $0x140] sm:$0xff]  ;;  %8289 = vst [vmem:[#allocation55_spill] sm:$0xff] %v5536_v10 }
  0xbe   : > { %8284 = vst [vmem:[#allocation50_spill] sm:$0xff] %v5515_v20  ;;  %947 = vrot.lane.b32.xlu1 %v5512_v63, %s4787_s27  ;;  %v546_v11 = vrot.slane %v415_v40, 7  ;;  %v547_v63 = vrot.slane %v5075_v53, 7  ;;  %8295 = vst [vmem:[#allocation61_spill] sm:$0xff] %v5560_v6 }
  0xbf   : > { %953 = vrot.lane.b32.xlu0 %v5520_v0, %s4787_s27 }
  0xc0   : > { %v5523_v32 = vpop.permute.xlu1 %771  ;;  %v5552_v40 = vsel %vm495_vm1, %v546_v11, %v547_v63  ;;  %v5576_v7 = vsel %vm495_vm1, %v547_v63, %v549_v25  ;;  %v559_v25 = vrot.slane %v5185_v61, 7 }
  0xc1   : > { %8286 = vst [vmem:[#allocation52_spill] sm:$0xff] %v5523_v32  ;;  %v5531_v20 = vpop.permute.xlu0 %777  ;;  %v419_v32 = vld [vmem:[#allocation2 + $0x160] sm:$0xff]  ;;  %8293 = vst [vmem:[#allocation59_spill] sm:$0xff] %v5552_v40 }
  0xc2   : > { %8288 = vst [vmem:[#allocation54_spill] sm:$0xff] %v5531_v20  ;;  %951 = vrot.lane.b32.xlu1 %v5528_v31, %s4787_s27  ;;  %v551_v15 = vrot.slane %v419_v32, 7  ;;  %v552_v31 = vrot.slane %v5083_v55, 7  ;;  %8299 = vst [vmem:[#allocation65_spill] sm:$0xff] %v5576_v7 }
  0xc3   : > { %957 = vrot.lane.b32.xlu0 %v5536_v10, %s4787_s27 }
  0xc4   : > { %v5539_v38 = vpop.permute.xlu1 %775  ;;  %v5568_v32 = vsel %vm495_vm1, %v551_v15, %v552_v31  ;;  %v5592_v63 = vsel %vm495_vm1, %v552_v31, %v554_v16  ;;  %v564_v16 = vrot.slane %v5194_v1, 7 }
  0xc5   : > { %8290 = vst [vmem:[#allocation56_spill] sm:$0xff] %v5539_v38  ;;  %v5547_v20 = vpop.permute.xlu0 %781  ;;  %v423_v38 = vld [vmem:[#allocation2 + $0x180] sm:$0xff]  ;;  %8297 = vst [vmem:[#allocation63_spill] sm:$0xff] %v5568_v32 }
  0xc6   : > { %8292 = vst [vmem:[#allocation58_spill] sm:$0xff] %v5547_v20  ;;  %955 = vrot.lane.b32.xlu1 %v5544_v23, %s4787_s27  ;;  %v556_v11 = vrot.slane %v423_v38, 7  ;;  %v557_v23 = vrot.slane %v5091_v57, 7  ;;  %8303 = vst [vmem:[#allocation69_spill] sm:$0xff] %v5592_v63 }
  0xc7   : > { %961 = vrot.lane.b32.xlu0 %v5552_v40, %s4787_s27 }
  0xc8   : > { %v5555_v0 = vpop.permute.xlu1 %779  ;;  %v5584_v38 = vsel %vm495_vm1, %v556_v11, %v557_v23  ;;  %v5608_v31 = vsel %vm495_vm1, %v557_v23, %v559_v25  ;;  %v569_v25 = vrot.slane %v5205_v4, 7 }
  0xc9   : > { %8294 = vst [vmem:[#allocation60_spill] sm:$0xff] %v5555_v0  ;;  %v5563_v20 = vpop.permute.xlu0 %785  ;;  %v427_v0 = vld [vmem:[#allocation2 + $0x1a0] sm:$0xff]  ;;  %8301 = vst [vmem:[#allocation67_spill] sm:$0xff] %v5584_v38 }
  0xca   : > { %8296 = vst [vmem:[#allocation62_spill] sm:$0xff] %v5563_v20  ;;  %959 = vrot.lane.b32.xlu1 %v5560_v6, %s4787_s27  ;;  %v561_v15 = vrot.slane %v427_v0, 7  ;;  %v562_v6 = vrot.slane %v5100_v60, 7  ;;  %8307 = vst [vmem:[#allocation73_spill] sm:$0xff] %v5608_v31 }
  0xcb   : > { %965 = vrot.lane.b32.xlu0 %v5568_v32, %s4787_s27  ;;  %v567_v32 = vrot.slane %v5189_v62, 7 }
  0xcc   : > { %v5571_v10 = vpop.permute.xlu1 %783  ;;  %v5600_v0 = vsel %vm495_vm1, %v561_v15, %v562_v6  ;;  %v439_v15 = vld [vmem:[#allocation2 + $0x200] sm:$0xff]  ;;  %v5626_v23 = vsel %vm495_vm1, %v562_v6, %v564_v16  ;;  %v5641_v6 = vld [vmem:[#allocation2 + $0x210] sm:$0xff] }
  0xcd   : > { %8298 = vst [vmem:[#allocation64_spill] sm:$0xff] %v5571_v10  ;;  %v5579_v20 = vpop.permute.xlu0 %789  ;;  %v431_v10 = vld [vmem:[#allocation2 + $0x1c0] sm:$0xff]  ;;  %8305 = vst [vmem:[#allocation71_spill] sm:$0xff] %v5600_v0  ;;  %v5644_v16 = vsel %vm495_vm1, %v567_v32, %v569_v25 }
  0xce   : > { %8300 = vst [vmem:[#allocation66_spill] sm:$0xff] %v5579_v20  ;;  %963 = vrot.lane.b32.xlu1 %v5576_v7, %s4787_s27  ;;  %v566_v11 = vrot.slane %v431_v10, 7  ;;  %v5615_v10 = vld [vmem:[#allocation2 + $0x208] sm:$0xff]  ;;  %8311 = vst [vmem:[#allocation77_spill] sm:$0xff] %v5626_v23 }
  0xcf   : > { %969 = vrot.lane.b32.xlu0 %v5584_v38, %s4787_s27  ;;  %8314 = vst [vmem:[#allocation80_spill] sm:$0xff] %v5641_v6  ;;  %8315 = vst [vmem:[#allocation81_spill] sm:$0xff] %v5644_v16 }
  0xd0   : > { %v5587_v40 = vpop.permute.xlu1 %787  ;;  %v5618_v38 = vsel %vm495_vm1, %v566_v11, %v567_v32 }
  0xd1   : > { %8302 = vst [vmem:[#allocation68_spill] sm:$0xff] %v5587_v40  ;;  %v5595_v20 = vpop.permute.xlu0 %793  ;;  %v435_v40 = vld [vmem:[#allocation2 + $0x1e0] sm:$0xff]  ;;  %8309 = vst [vmem:[#allocation75_spill] sm:$0xff] %v5618_v38 }
  0xd2   : > { %8304 = vst [vmem:[#allocation70_spill] sm:$0xff] %v5595_v20  ;;  %967 = vrot.lane.b32.xlu1 %v5592_v63, %s4787_s27  ;;  %v572_v63 = vrot.slane %v5201_v3, 7 }
  0xd3   : > { %973 = vrot.lane.b32.xlu0 %v5600_v0, %s4787_s27 }
  0xd4   : > { %v5603_v7 = vpop.permute.xlu1 %791 }
  0xd5   : > { %8306 = vst [vmem:[#allocation72_spill] sm:$0xff] %v5603_v7  ;;  %v5611_v20 = vpop.permute.xlu0 %829  ;;  %v571_v7 = vrot.slane %v435_v40, 7 }
  0xd6   : > { %8308 = vst [vmem:[#allocation74_spill] sm:$0xff] %v5611_v20  ;;  %971 = vrot.lane.b32.xlu1 %v5608_v31, %s4787_s27  ;;  %v708_v20 = vrot.slane %v439_v15, 7  ;;  %v709_v31 = vrot.slane %v5615_v10, 7  ;;  %v574_v15 = vrot.slane %v5214_v8, 7 }
  0xd7   : > { %977 = vrot.lane.b32.xlu0 %v5618_v38, %s4787_s27  ;;  %v5635_v40 = vsel %vm495_vm1, %v571_v7, %v572_v63  ;;  %v711_v7 = vrot.slane %v5641_v6, 7 }
  0xd8   : > { %v5621_v0 = vpop.permute.xlu1 %795  ;;  %v5660_v32 = vsel %vm495_vm1, %v572_v63, %v574_v15 }
  0xd9   : > { %8310 = vst [vmem:[#allocation76_spill] sm:$0xff] %v5621_v0  ;;  %v5630_v19 = vpop.permute.xlu0 %833  ;;  %v5648_v0 = vsel %vm495_vm1, %v708_v20, %v709_v31  ;;  %v5667_v20 = vsel %vm495_vm1, %v709_v31, %v711_v7 }
  0xda   : > { %8312 = vst [vmem:[#allocation78_spill] sm:$0xff] %v5630_v19  ;;  %975 = vrot.lane.b32.xlu1 %v5626_v23, %s4787_s27 }
  0xdb   : > { %981 = vrot.lane.b32.xlu0 %v5635_v40, %s4787_s27 }
  0xdc   : > { %v5637_v11 = vpop.permute.xlu1 %831 }
  0xdd   : > { %8313 = vst [vmem:[#allocation79_spill] sm:$0xff] %v5637_v11  ;;  %v5650_v19 = vpop.permute.xlu0 %837 }
  0xde   : > { %8316 = vst [vmem:[#allocation82_spill] sm:$0xff] %v5650_v19  ;;  %979 = vrot.lane.b32.xlu1 %v5644_v16, %s4787_s27 }
  0xdf   : > { %985 = vrot.lane.b32.xlu0 %v5648_v0, %s4787_s27 }
  0xe0   : > { %v5655_v11 = vpop.permute.xlu1 %835 }
  0xe1   : > { %8317 = vst [vmem:[#allocation83_spill] sm:$0xff] %v5655_v11  ;;  %v5662_v25 = vpop.permute.xlu0 %841 }
  0xe2   : > { %983 = vrot.lane.b32.xlu1 %v5660_v32, %s4787_s27 }
  0xe3   : > { %1021 = vrot.lane.b32.xlu0 %v4988_v27, %s4788_s28 }
  0xe4   : > { %v5669_v19 = vpop.permute.xlu1 %839 }
  0xe5   : > { %v5673_v11 = vpop.permute.xlu0 %845 }
  0xe6   : > { %8318 = vst [vmem:[#allocation84_spill] sm:$0xff] %v5673_v11  ;;  %987 = vrot.lane.b32.xlu1 %v5667_v20, %s4787_s27  ;;  %v8387_v11 = vld [vmem:[#allocation33_spill] sm:$0xff] }
  0xe7   : > { %1025 = vrot.lane.b32.xlu0 %v4990_v28, %s4788_s28 }
  0xe8   : > { %v5677_v63 = vpop.permute.xlu1 %843 }
  0xe9   : > { %8319 = vst [vmem:[#allocation85_spill] sm:$0xff] %v5677_v63  ;;  %v5681_v15 = vpop.permute.xlu0 %849  ;;  %v8391_v63 = vld [vmem:[#allocation37_spill] sm:$0xff] }
  0xea   : > { %8320 = vst [vmem:[#allocation86_spill] sm:$0xff] %v5681_v15  ;;  %1023 = vrot.lane.b32.xlu1 %v4997_v29, %s4788_s28 }
  0xeb   : > { %1029 = vrot.lane.b32.xlu0 %v5006_v33, %s4788_s28 }
  0xec   : > { %v5685_v31 = vpop.permute.xlu1 %847 }
  0xed   : > { %8321 = vst [vmem:[#allocation87_spill] sm:$0xff] %v5685_v31  ;;  %v5689_v27 = vpop.permute.xlu0 %853 }
  0xee   : > { %8322 = vst [vmem:[#allocation88_spill] sm:$0xff] %v5689_v27  ;;  %1027 = vrot.lane.b32.xlu1 %v5011_v34, %s4788_s28 }
  0xef   : > { %1033 = vrot.lane.b32.xlu0 %v5015_v35, %s4788_s28 }
  0xf0   : > { %v5693_v7 = vpop.permute.xlu1 %851 }
  0xf1   : > { %8323 = vst [vmem:[#allocation89_spill] sm:$0xff] %v5693_v7  ;;  %v5697_v28 = vpop.permute.xlu0 %857  ;;  %v8380_v7 = vld [vmem:[#allocation24_spill] sm:$0xff] }
  0xf2   : > { %8324 = vst [vmem:[#allocation90_spill] sm:$0xff] %v5697_v28  ;;  %1031 = vrot.lane.b32.xlu1 %v5028_v42, %s4788_s28  ;;  %v8377_v28 = vld [vmem:[#allocation18_spill] sm:$0xff] }
  0xf3   : > { %1037 = vrot.lane.b32.xlu0 %v5035_v43, %s4788_s28 }
  0xf4   : > { %v5701_v29 = vpop.permute.xlu1 %855 }
  0xf5   : > { %8325 = vst [vmem:[#allocation91_spill] sm:$0xff] %v5701_v29  ;;  %v5705_v33 = vpop.permute.xlu0 %861  ;;  %v8379_v29 = vld [vmem:[#allocation20_spill] sm:$0xff] }
  0xf6   : > { %8326 = vst [vmem:[#allocation92_spill] sm:$0xff] %v5705_v33  ;;  %1035 = vrot.lane.b32.xlu1 %v5039_v44, %s4788_s28 }
  0xf7   : > { %1041 = vrot.lane.b32.xlu0 %v5043_v45, %s4788_s28 }
  0xf8   : > { %v5709_v34 = vpop.permute.xlu1 %859 }
  0xf9   : > { %8327 = vst [vmem:[#allocation93_spill] sm:$0xff] %v5709_v34  ;;  %v5713_v35 = vpop.permute.xlu0 %865  ;;  %v715_v34 = vrot.slane %v5641_v6, 1 }
  0xfa   : > { %8328 = vst [vmem:[#allocation94_spill] sm:$0xff] %v5713_v35  ;;  %1039 = vrot.lane.b32.xlu1 %v5047_v46, %s4788_s28 }
  0xfb   : > { %1045 = vrot.lane.b32.xlu0 %v5051_v47, %s4788_s28 }
  0xfc   : > { %v5717_v42 = vpop.permute.xlu1 %863 }
  0xfd   : > { %8329 = vst [vmem:[#allocation95_spill] sm:$0xff] %v5717_v42  ;;  %v5721_v43 = vpop.permute.xlu0 %869 }
  0xfe   : > { %8330 = vst [vmem:[#allocation96_spill] sm:$0xff] %v5721_v43  ;;  %1043 = vrot.lane.b32.xlu1 %v5055_v48, %s4788_s28 }
  0xff   : > { %1049 = vrot.lane.b32.xlu0 %v5059_v49, %s4788_s28 }
 0x100   : > { %v5725_v44 = vpop.permute.xlu1 %867 }
 0x101   : > { %8331 = vst [vmem:[#allocation97_spill] sm:$0xff] %v5725_v44  ;;  %v5729_v45 = vpop.permute.xlu0 %873 }
 0x102   : > { %8332 = vst [vmem:[#allocation98_spill] sm:$0xff] %v5729_v45  ;;  %1047 = vrot.lane.b32.xlu1 %v5063_v50, %s4788_s28 }
 0x103   : > { %1053 = vrot.lane.b32.xlu0 %v5067_v51, %s4788_s28 }
 0x104   : > { %v5733_v46 = vpop.permute.xlu1 %871 }
 0x105   : > { %8333 = vst [vmem:[#allocation99_spill] sm:$0xff] %v5733_v46  ;;  %v5737_v47 = vpop.permute.xlu0 %877 }
 0x106   : > { %8334 = vst [vmem:[#allocation100_spill] sm:$0xff] %v5737_v47  ;;  %1051 = vrot.lane.b32.xlu1 %v5071_v52, %s4788_s28 }
 0x107   : > { %1057 = vrot.lane.b32.xlu0 %v5075_v53, %s4788_s28 }
 0x108   : > { %v5741_v48 = vpop.permute.xlu1 %875 }
 0x109   : > { %8335 = vst [vmem:[#allocation101_spill] sm:$0xff] %v5741_v48  ;;  %v5745_v49 = vpop.permute.xlu0 %881 }
 0x10a   : > { %8336 = vst [vmem:[#allocation102_spill] sm:$0xff] %v5745_v49  ;;  %1055 = vrot.lane.b32.xlu1 %v5079_v54, %s4788_s28 }
 0x10b   : > { %1061 = vrot.lane.b32.xlu0 %v5083_v55, %s4788_s28 }
 0x10c   : > { %v5749_v50 = vpop.permute.xlu1 %879 }
 0x10d   : > { %8337 = vst [vmem:[#allocation103_spill] sm:$0xff] %v5749_v50  ;;  %v5753_v51 = vpop.permute.xlu0 %885 }
 0x10e   : > { %8338 = vst [vmem:[#allocation104_spill] sm:$0xff] %v5753_v51  ;;  %1059 = vrot.lane.b32.xlu1 %v5087_v56, %s4788_s28 }
 0x10f   : > { %1065 = vrot.lane.b32.xlu0 %v5091_v57, %s4788_s28 }
 0x110   : > { %v5757_v52 = vpop.permute.xlu1 %883 }
 0x111   : > { %8339 = vst [vmem:[#allocation105_spill] sm:$0xff] %v5757_v52  ;;  %v5761_v53 = vpop.permute.xlu0 %889 }
 0x112   : > { %8340 = vst [vmem:[#allocation106_spill] sm:$0xff] %v5761_v53  ;;  %1063 = vrot.lane.b32.xlu1 %v5095_v58, %s4788_s28 }
 0x113   : > { %1069 = vrot.lane.b32.xlu0 %v5100_v60, %s4788_s28 }
 0x114   : > { %v5765_v54 = vpop.permute.xlu1 %887 }
 0x115   : > { %8341 = vst [vmem:[#allocation107_spill] sm:$0xff] %v5765_v54  ;;  %v5771_v55 = vpop.permute.xlu0 %925 }
 0x116   : > { %1067 = vrot.lane.b32.xlu1 %v5185_v61, %s4788_s28 }
 0x117   : > { %1073 = vrot.lane.b32.xlu0 %v5189_v62, %s4788_s28 }
 0x118   : > { %v5773_v56 = vpop.permute.xlu1 %891 }
 0x119   : > { %8342 = vst [vmem:[#allocation108_spill] sm:$0xff] %v5773_v56  ;;  %v5779_v57 = vpop.permute.xlu0 %929 }
 0x11a   : > { %1071 = vrot.lane.b32.xlu1 %v5194_v1, %s4788_s28 }
 0x11b   : > { %1077 = vrot.lane.b32.xlu0 %v5201_v3, %s4788_s28 }
 0x11c   : > { %v5781_v58 = vpop.permute.xlu1 %927 }
 0x11d   : > { %v5787_v60 = vpop.permute.xlu0 %933 }
 0x11e   : > { %1075 = vrot.lane.b32.xlu1 %v5205_v4, %s4788_s28 }
 0x11f   : > { %1081 = vrot.lane.b32.xlu0 %v5615_v10, %s4788_s28 }
 0x120   : > { %v5789_v61 = vpop.permute.xlu1 %931 }
 0x121   : > { %v5795_v62 = vpop.permute.xlu0 %937 }
 0x122   : > { %1079 = vrot.lane.b32.xlu1 %v5214_v8, %s4788_s28 }
 0x123   : > { %1117 = vrot.lane.b32.xlu0 %v5218_v14, %s4789_s29 }
 0x124   : > { %v5797_v1 = vpop.permute.xlu1 %935 }
 0x125   : > { %v5803_v3 = vpop.permute.xlu0 %941 }
 0x126   : > { %1083 = vrot.lane.b32.xlu1 %v5641_v6, %s4788_s28  ;;  %8343 = vst [vmem:[#allocation109_spill] sm:$0xff] %v5803_v3  ;;  %v8386_v3 = vld [vmem:[#allocation31_spill] sm:$0xff]  ;;  %v8395_v6 = vld [vmem:[#allocation41_spill] sm:$0xff] }
 0x127   : > { %1121 = vrot.lane.b32.xlu0 %v5228_v21, %s4789_s29 }
 0x128   : > { %v5805_v4 = vpop.permute.xlu1 %939 }
 0x129   : > { %8344 = vst [vmem:[#allocation110_spill] sm:$0xff] %v5805_v4  ;;  %v5811_v8 = vpop.permute.xlu0 %945  ;;  %v8390_v4 = vld [vmem:[#allocation35_spill] sm:$0xff] }
 0x12a   : > { %1119 = vrot.lane.b32.xlu1 %v5234_v24, %s4789_s29  ;;  %8345 = vst [vmem:[#allocation111_spill] sm:$0xff] %v5811_v8 }
 0x12b   : > { %1125 = vrot.lane.b32.xlu0 %v5239_v30, %s4789_s29 }
 0x12c   : > { %v5813_v56 = vpop.permute.xlu1 %943 }
 0x12d   : > { %8346 = vst [vmem:[#allocation112_spill] sm:$0xff] %v5813_v56  ;;  %v5819_v14 = vpop.permute.xlu0 %949  ;;  %v8383_v56 = vld [vmem:[#allocation27_spill] sm:$0xff] }
 0x12e   : > { %1123 = vrot.lane.b32.xlu1 %v5246_v36, %s4789_s29  ;;  %8347 = vst [vmem:[#allocation113_spill] sm:$0xff] %v5819_v14 }
 0x12f   : > { %1129 = vrot.lane.b32.xlu0 %v5251_v39, %s4789_s29 }
 0x130   : > { %v5821_v53 = vpop.permute.xlu1 %947 }
 0x131   : > { %8348 = vst [vmem:[#allocation114_spill] sm:$0xff] %v5821_v53  ;;  %v5827_v24 = vpop.permute.xlu0 %953 }
 0x132   : > { %1127 = vrot.lane.b32.xlu1 %v5258_v59, %s4789_s29  ;;  %8349 = vst [vmem:[#allocation115_spill] sm:$0xff] %v5827_v24 }
 0x133   : > { %1133 = vrot.lane.b32.xlu0 %v5263_v2, %s4789_s29 }
 0x134   : > { %v5829_v54 = vpop.permute.xlu1 %951 }
 0x135   : > { %8350 = vst [vmem:[#allocation116_spill] sm:$0xff] %v5829_v54  ;;  %v5835_v51 = vpop.permute.xlu0 %957  ;;  %v442_v54 = vld [vmem:[#allocation2 + $0x218] sm:$0xff] }
 0x136   : > { %1131 = vrot.lane.b32.xlu1 %v5270_v9, %s4789_s29  ;;  %8351 = vst [vmem:[#allocation117_spill] sm:$0xff] %v5835_v51  ;;  %v8373_v51 = vld [vmem:[#allocation13_spill] sm:$0xff]  ;;  %v717_v27 = vrot.slane %v442_v54, 1 }
 0x137   : > { %1137 = vrot.lane.b32.xlu0 %v5275_v13, %s4789_s29 }
 0x138   : > { %v5837_v52 = vpop.permute.xlu1 %955  ;;  %v5931_v15 = vsel %vm624_vm3, %v715_v34, %v717_v27 }
 0x139   : > { %8352 = vst [vmem:[#allocation118_spill] sm:$0xff] %v5837_v52  ;;  %v5843_v49 = vpop.permute.xlu0 %961  ;;  %v714_v52 = vrot.slane %v5615_v10, 1 }
 0x13a   : > { %1135 = vrot.lane.b32.xlu1 %v5282_v17, %s4789_s29  ;;  %8353 = vst [vmem:[#allocation119_spill] sm:$0xff] %v5843_v49  ;;  %v8365_v49 = vld [vmem:[#allocation8_spill] sm:$0xff] }
 0x13b   : > { %1141 = vrot.lane.b32.xlu0 %v5287_v22, %s4789_s29 }
 0x13c   : > { %v5845_v50 = vpop.permute.xlu1 %959 }
 0x13d   : > { %8354 = vst [vmem:[#allocation120_spill] sm:$0xff] %v5845_v50  ;;  %v5851_v47 = vpop.permute.xlu0 %965  ;;  %v8369_v50 = vld [vmem:[#allocation10_spill] sm:$0xff] }
 0x13e   : > { %1139 = vrot.lane.b32.xlu1 %v5294_v26, %s4789_s29  ;;  %8355 = vst [vmem:[#allocation121_spill] sm:$0xff] %v5851_v47 }
 0x13f   : > { %1145 = vrot.lane.b32.xlu0 %v5299_v37, %s4789_s29 }
 0x140   : > { %v5853_v48 = vpop.permute.xlu1 %963 }
 0x141   : > { %8356 = vst [vmem:[#allocation122_spill] sm:$0xff] %v5853_v48  ;;  %v5859_v45 = vpop.permute.xlu0 %969  ;;  %v8361_v48 = vld [vmem:[#allocation6_spill] sm:$0xff] }
 0x142   : > { %1143 = vrot.lane.b32.xlu1 %v5306_v41, %s4789_s29  ;;  %8357 = vst [vmem:[#allocation123_spill] sm:$0xff] %v5859_v45 }
 0x143   : > { %1149 = vrot.lane.b32.xlu0 %v5311_v5, %s4789_s29 }
 0x144   : > { %v5861_v46 = vpop.permute.xlu1 %967 }
 0x145   : > { %8358 = vst [vmem:[#allocation124_spill] sm:$0xff] %v5861_v46  ;;  %v5867_v43 = vpop.permute.xlu0 %973  ;;  %v8364_v46 = vld [vmem:[#allocation7_spill] sm:$0xff] }
 0x146   : > { %1147 = vrot.lane.b32.xlu1 %v5318_v12, %s4789_s29  ;;  %8359 = vst [vmem:[#allocation125_spill] sm:$0xff] %v5867_v43 }
 0x147   : > { %1153 = vrot.lane.b32.xlu0 %v5323_v18, %s4789_s29 }
 0x148   : > { %v5869_v47 = vpop.permute.xlu1 %971 }
 0x149   : > { %8360 = vst [vmem:[#allocation126_spill] sm:$0xff] %v5869_v47  ;;  %v5875_v44 = vpop.permute.xlu0 %977  ;;  %v8368_v47 = vld [vmem:[#allocation9_spill] sm:$0xff] }
 0x14a   : > { %1151 = vrot.lane.b32.xlu1 %v8361_v48, %s4789_s29  ;;  %8362 = vst [vmem:[#allocation6_spill] sm:$0xff] %v5875_v44 }
 0x14b   : > { %1157 = vrot.lane.b32.xlu0 %v8364_v46, %s4789_s29 }
 0x14c   : > { %v5877_v45 = vpop.permute.xlu1 %975 }
 0x14d   : > { %8363 = vst [vmem:[#allocation127_spill] sm:$0xff] %v5877_v45  ;;  %v5883_v35 = vpop.permute.xlu0 %981  ;;  %v8372_v45 = vld [vmem:[#allocation11_spill] sm:$0xff] }
 0x14e   : > { %1155 = vrot.lane.b32.xlu1 %v8365_v49, %s4789_s29  ;;  %8366 = vst [vmem:[#allocation7_spill] sm:$0xff] %v5883_v35 }
 0x14f   : > { %1161 = vrot.lane.b32.xlu0 %v8368_v47, %s4789_s29 }
 0x150   : > { %v5885_v43 = vpop.permute.xlu1 %979 }
 0x151   : > { %8367 = vst [vmem:[#allocation8_spill] sm:$0xff] %v5885_v43  ;;  %v5891_v42 = vpop.permute.xlu0 %985  ;;  %v8375_v43 = vld [vmem:[#allocation14_spill] sm:$0xff] }
 0x152   : > { %1159 = vrot.lane.b32.xlu1 %v8369_v50, %s4789_s29  ;;  %8370 = vst [vmem:[#allocation9_spill] sm:$0xff] %v5891_v42  ;;  %v8376_v42 = vld [vmem:[#allocation16_spill] sm:$0xff] }
 0x153   : > { %1165 = vrot.lane.b32.xlu0 %v8372_v45, %s4789_s29  ;;  %8382 = vst [vmem:[#allocation16_spill] sm:$0xff] %v5931_v15 }
 0x154   : > { %v5893_v44 = vpop.permute.xlu1 %983 }
 0x155   : > { %8371 = vst [vmem:[#allocation10_spill] sm:$0xff] %v5893_v44  ;;  %v5899_v33 = vpop.permute.xlu0 %1021 }
 0x156   : > { %1163 = vrot.lane.b32.xlu1 %v8373_v51, %s4789_s29 }
 0x157   : > { %1169 = vrot.lane.b32.xlu0 %v8375_v43, %s4789_s29 }
 0x158   : > { %v5901_v35 = vpop.permute.xlu1 %987 }
 0x159   : > { %8374 = vst [vmem:[#allocation11_spill] sm:$0xff] %v5901_v35  ;;  %v5909_v44 = vpop.permute.xlu0 %1025  ;;  %v5916_v35 = vsel %vm624_vm3, %v714_v52, %v715_v34 }
 0x15a   : > { %1167 = vrot.lane.b32.xlu1 %v8376_v42, %s4789_s29  ;;  %8378 = vst [vmem:[#allocation13_spill] sm:$0xff] %v5916_v35 }
 0x15b   : > { %1173 = vrot.lane.b32.xlu0 %v8377_v28, %s4789_s29 }
 0x15c   : > { %v5911_v24 = vpop.permute.xlu1 %1023 }
 0x15d   : > { %v5920_v14 = vpop.permute.xlu0 %1029 }
 0x15e   : > { %1171 = vrot.lane.b32.xlu1 %v8379_v29, %s4789_s29 }
 0x15f   : > { %1177 = vrot.lane.b32.xlu0 %v5916_v35, %s4789_s29 }
 0x160   : > { %v5922_v53 = vpop.permute.xlu1 %1027 }
 0x161   : > { %v5928_v8 = vpop.permute.xlu0 %1033 }
 0x162   : > { %1175 = vrot.lane.b32.xlu1 %v8380_v7, %s4789_s29  ;;  %8381 = vst [vmem:[#allocation14_spill] sm:$0xff] %v5928_v8  ;;  %v1767_v8 = vld [vmem:[%s8078_s1 + $0x20] sm:$0xf] }
 0x163   : > { %1213 = vrot.lane.b32.xlu0 %v8383_v56, %s4790_s30 }
 0x164   : > { %v5933_v52 = vpop.permute.xlu1 %1031 }
 0x165   : > { %v5939_v54 = vpop.permute.xlu0 %1037 }
 0x166   : > { %1179 = vrot.lane.b32.xlu1 %v5931_v15, %s4789_s29  ;;  %8384 = vst [vmem:[#allocation18_spill] sm:$0xff] %v5939_v54 }
 0x167   : > { %1217 = vrot.lane.b32.xlu0 %v8386_v3, %s4790_s30 }
 0x168   : > { %v5941_v31 = vpop.permute.xlu1 %1035 }
 0x169   : > { %8385 = vst [vmem:[#allocation20_spill] sm:$0xff] %v5941_v31  ;;  %v5947_v27 = vpop.permute.xlu0 %1041  ;;  %v8394_v31 = vld [vmem:[#allocation39_spill] sm:$0xff] }
 0x16a   : > { %1215 = vrot.lane.b32.xlu1 %v8387_v11, %s4790_s30  ;;  %8388 = vst [vmem:[#allocation24_spill] sm:$0xff] %v5947_v27 }
 0x16b   : > { %1221 = vrot.lane.b32.xlu0 %v8390_v4, %s4790_s30  ;;  %v8399_v4 = vld [vmem:[#allocation45_spill] sm:$0xff] }
 0x16c   : > { %v5949_v34 = vpop.permute.xlu1 %1039 }
 0x16d   : > { %8389 = vst [vmem:[#allocation27_spill] sm:$0xff] %v5949_v34  ;;  %v5955_v15 = vpop.permute.xlu0 %1045  ;;  %v8398_v34 = vld [vmem:[#allocation43_spill] sm:$0xff] }
 0x16e   : > { %1219 = vrot.lane.b32.xlu1 %v8391_v63, %s4790_s30  ;;  %8392 = vst [vmem:[#allocation31_spill] sm:$0xff] %v5955_v15 }
 0x16f   : > { %1225 = vrot.lane.b32.xlu0 %v8394_v31, %s4790_s30  ;;  %v1763_v31 = vld [vmem:[%s8078_s1] sm:$0xff] }
 0x170   : > { %v5957_v54 = vpop.permute.xlu1 %1043 }
 0x171   : > { %8393 = vst [vmem:[#allocation33_spill] sm:$0xff] %v5957_v54  ;;  %v5963_v35 = vpop.permute.xlu0 %1049  ;;  %v8402_v54 = vld [vmem:[#allocation47_spill] sm:$0xff] }
 0x172   : > { %1223 = vrot.lane.b32.xlu1 %v8395_v6, %s4790_s30  ;;  %8396 = vst [vmem:[#allocation128_spill] sm:$0xff] %v5963_v35  ;;  %v1764_v35 = vld [vmem:[%s8078_s1 + $0x8] sm:$0xff]  ;;  %v1766_v6 = vld [vmem:[%s8078_s1 + $0x18] sm:$0xff] }
 0x173   : > { %1229 = vrot.lane.b32.xlu0 %v8398_v34, %s4790_s30 }
 0x174   : > { %v5965_v27 = vpop.permute.xlu1 %1047 }
 0x175   : > { %8397 = vst [vmem:[#allocation129_spill] sm:$0xff] %v5965_v27  ;;  %v5971_v63 = vpop.permute.xlu0 %1053  ;;  %v8403_v27 = vld [vmem:[#allocation49_spill] sm:$0xff] }
 0x176   : > { %1227 = vrot.lane.b32.xlu1 %v8399_v4, %s4790_s30  ;;  %8400 = vst [vmem:[#allocation130_spill] sm:$0xff] %v5971_v63  ;;  %v4029_v4 = vpack.c.bf16 %v1764_v35, %v1763_v31 }
 0x177   : > { %1233 = vrot.lane.b32.xlu0 %v8402_v54, %s4790_s30  ;;  %v1765_v54 = vld [vmem:[%s8078_s1 + $0x10] sm:$0xff] }
 0x178   : > { %v5973_v15 = vpop.permute.xlu1 %1051  ;;  %4030 = vmatprep.subr.bf16.mxu0 %v4029_v4  ;;  %v4033_v31 = vpack.c.bf16 %v1766_v6, %v1765_v54  ;;  %v8414_v6 = vld [vmem:[#allocation59_spill] sm:$0xff]  ;;  %v8415_v54 = vld [vmem:[#allocation61_spill] sm:$0xff] }
 0x179   : > { %8401 = vst [vmem:[#allocation131_spill] sm:$0xff] %v5973_v15  ;;  %v5985_v34 = vpop.permute.xlu0 %1057  ;;  %v8406_v15 = vld [vmem:[#allocation51_spill] sm:$0xff]  ;;  %4032 = vmatpush3.bf16.msra.mxu0 %v4029_v4  ;;  %v8411_v4 = vld [vmem:[#allocation57_spill] sm:$0xff] }
 0x17a   : > { %1231 = vrot.lane.b32.xlu1 %v8403_v27, %s4790_s30  ;;  %8404 = vst [vmem:[#allocation132_spill] sm:$0xff] %v5985_v34  ;;  %v8407_v27 = vld [vmem:[#allocation53_spill] sm:$0xff]  ;;  %4034 = vmatprep.subr.bf16.mxu0 %v4033_v31 }
 0x17b   : > { %1237 = vrot.lane.b32.xlu0 %v8406_v15, %s4790_s30 }
 0x17c   : > { %v5987_v63 = vpop.permute.xlu1 %1055 }
 0x17d   : > { %8405 = vst [vmem:[#allocation133_spill] sm:$0xff] %v5987_v63  ;;  %v5999_v34 = vpop.permute.xlu0 %1061  ;;  %v8410_v63 = vld [vmem:[#allocation55_spill] sm:$0xff]  ;;  %4036 = vmatpush3.bf16.msra.mxu0 %v4033_v31 }
 0x17e   : > { %1235 = vrot.lane.b32.xlu1 %v8407_v27, %s4790_s30  ;;  %8408 = vst [vmem:[#allocation134_spill] sm:$0xff] %v5999_v34  ;;  %3979 = vmatprep.subr.msk.mxu0 %vm1872_vm4, %v1767_v8 }
 0x17f   : > { %1241 = vrot.lane.b32.xlu0 %v8410_v63, %s4790_s30 }
 0x180   : > { %v6001_v35 = vpop.permute.xlu1 %1059 }
 0x181   : > { %8409 = vst [vmem:[#allocation135_spill] sm:$0xff] %v6001_v35  ;;  %v6007_v15 = vpop.permute.xlu0 %1065  ;;  %3980 = vmatpush3.msk.msra.mxu0 %vm1872_vm4, %v1767_v8  ;;  %v8418_v35 = vld [vmem:[#allocation65_spill] sm:$0xff]  ;;  %v4749_v8 = vld [vmem:[#allocation2 + $0x50] sm:$0xff] }
 0x182   : > { %1239 = vrot.lane.b32.xlu1 %v8411_v4, %s4790_s30  ;;  %8412 = vst [vmem:[#allocation136_spill] sm:$0xff] %v6007_v15  ;;  %v4748_v15 = vld [vmem:[#allocation2 + $0x48] sm:$0xff] }
 0x183   : > { %1245 = vrot.lane.b32.xlu0 %v8414_v6, %s4790_s30  ;;  %v4750_v6 = vld [vmem:[#allocation2 + $0x68] sm:$0xff] }
 0x184   : > { %v6012_v27 = vpop.permute.xlu1 %1063 }
 0x185   : > { %8413 = vst [vmem:[#allocation137_spill] sm:$0xff] %v6012_v27  ;;  %v6018_v31 = vpop.permute.xlu0 %1069 }
 0x186   : > { %1243 = vrot.lane.b32.xlu1 %v8415_v54, %s4790_s30  ;;  %8416 = vst [vmem:[#allocation138_spill] sm:$0xff] %v6018_v31  ;;  %v4758_v54 = vld [vmem:[#allocation2 + $0xe8] sm:$0xff] }
 0x187   : > { %1309 = vrot.lane.b32.xlu0 %v4748_v15, %s4791_s16 }
 0x188   : > { %v6020_v34 = vpop.permute.xlu1 %1067 }
 0x189   : > { %8417 = vst [vmem:[#allocation139_spill] sm:$0xff] %v6020_v34  ;;  %v6025_v27 = vpop.permute.xlu0 %1073 }
 0x18a   : > { %1247 = vrot.lane.b32.xlu1 %v8418_v35, %s4790_s30  ;;  %8419 = vst [vmem:[#allocation140_spill] sm:$0xff] %v6025_v27 }
 0x18b   : > { %1405 = vrot.lane.b32.xlu0 %v5228_v21, %s4792_s17  ;;  %v4751_v21 = vld [vmem:[#allocation2 + $0x70] sm:$0xff] }
 0x18c   : > { %v6027_v63 = vpop.permute.xlu1 %1071 }
 0x18d   : > { %8420 = vst [vmem:[#allocation141_spill] sm:$0xff] %v6027_v63  ;;  %v6032_v31 = vpop.permute.xlu0 %1077  ;;  %v4756_v63 = vld [vmem:[#allocation2 + $0xc8] sm:$0xff] }
 0x18e   : > { %1311 = vrot.lane.b32.xlu1 %v4749_v8, %s4791_s16  ;;  %8421 = vst [vmem:[#allocation142_spill] sm:$0xff] %v6032_v31 }
 0x18f   : > { %1313 = vrot.lane.b32.xlu0 %v4750_v6, %s4791_s16 }
 0x190   : > { %v6034_v34 = vpop.permute.xlu1 %1075 }
 0x191   : > { %8422 = vst [vmem:[#allocation143_spill] sm:$0xff] %v6034_v34  ;;  %v6039_v15 = vpop.permute.xlu0 %1081  ;;  %v4752_v34 = vld [vmem:[#allocation2 + $0x88] sm:$0xff] }
 0x192   : > { %1407 = vrot.lane.b32.xlu1 %v5246_v36, %s4792_s17  ;;  %8423 = vst [vmem:[#allocation144_spill] sm:$0xff] %v6039_v15 }
 0x193   : > { %1409 = vrot.lane.b32.xlu0 %v5239_v30, %s4792_s17  ;;  %v4753_v30 = vld [vmem:[#allocation2 + $0x90] sm:$0xff] }
 0x194   : > { %v6041_v27 = vpop.permute.xlu1 %1079 }
 0x195   : > { %8424 = vst [vmem:[#allocation145_spill] sm:$0xff] %v6041_v27  ;;  %v6046_v8 = vpop.permute.xlu0 %1117 }
 0x196   : > { %1315 = vrot.lane.b32.xlu1 %v4751_v21, %s4791_s16 }
 0x197   : > { %1317 = vrot.lane.b32.xlu0 %v4752_v34, %s4791_s16 }
 0x198   : > { %v6048_v31 = vpop.permute.xlu1 %1083 }
 0x199   : > { %8425 = vst [vmem:[#allocation146_spill] sm:$0xff] %v6048_v31  ;;  %v6053_v36 = vpop.permute.xlu0 %1121  ;;  %v4754_v31 = vld [vmem:[#allocation2 + $0xa8] sm:$0xff] }
 0x19a   : > { %1411 = vrot.lane.b32.xlu1 %v5258_v59, %s4792_s17 }
 0x19b   : > { %1413 = vrot.lane.b32.xlu0 %v5251_v39, %s4792_s17  ;;  %v4755_v39 = vld [vmem:[#allocation2 + $0xb0] sm:$0xff] }
 0x19c   : > { %v6055_v6 = vpop.permute.xlu1 %1119 }
 0x19d   : > { %v6060_v21 = vpop.permute.xlu0 %1125 }
 0x19e   : > { %1319 = vrot.lane.b32.xlu1 %v4753_v30, %s4791_s16 }
 0x19f   : > { %1321 = vrot.lane.b32.xlu0 %v4754_v31, %s4791_s16 }
 0x1a0   : > { %v6062_v15 = vpop.permute.xlu1 %1123 }
 0x1a1   : > { %v6067_v59 = vpop.permute.xlu0 %1129 }
 0x1a2   : > { %1415 = vrot.lane.b32.xlu1 %v5270_v9, %s4792_s17 }
 0x1a3   : > { %1417 = vrot.lane.b32.xlu0 %v5263_v2, %s4792_s17  ;;  %v4757_v2 = vld [vmem:[#allocation2 + $0xd0] sm:$0xff] }
 0x1a4   : > { %v6069_v34 = vpop.permute.xlu1 %1127 }
 0x1a5   : > { %v6074_v30 = vpop.permute.xlu0 %1133 }
 0x1a6   : > { %1323 = vrot.lane.b32.xlu1 %v4755_v39, %s4791_s16 }
 0x1a7   : > { %1325 = vrot.lane.b32.xlu0 %v4756_v63, %s4791_s16 }
 0x1a8   : > { %v6076_v27 = vpop.permute.xlu1 %1131 }
 0x1a9   : > { %v6081_v9 = vpop.permute.xlu0 %1137 }
 0x1aa   : > { %1419 = vrot.lane.b32.xlu1 %v5282_v17, %s4792_s17 }
 0x1ab   : > { %1421 = vrot.lane.b32.xlu0 %v5275_v13, %s4792_s17  ;;  %v4759_v13 = vld [vmem:[#allocation2 + $0xf0] sm:$0xff] }
 0x1ac   : > { %v6083_v31 = vpop.permute.xlu1 %1135 }
 0x1ad   : > { %v6088_v39 = vpop.permute.xlu0 %1141 }
 0x1ae   : > { %1327 = vrot.lane.b32.xlu1 %v4757_v2, %s4791_s16  ;;  %8426 = vst [vmem:[#allocation147_spill] sm:$0xff] %v6088_v39  ;;  %v4760_v39 = vld [vmem:[#allocation2 + $0x108] sm:$0xff] }
 0x1af   : > { %1329 = vrot.lane.b32.xlu0 %v4758_v54, %s4791_s16 }
 0x1b0   : > { %v6090_v35 = vpop.permute.xlu1 %1139 }
 0x1b1   : > { %v6095_v17 = vpop.permute.xlu0 %1145 }
 0x1b2   : > { %1423 = vrot.lane.b32.xlu1 %v5294_v26, %s4792_s17  ;;  %8427 = vst [vmem:[#allocation148_spill] sm:$0xff] %v6095_v17 }
 0x1b3   : > { %1425 = vrot.lane.b32.xlu0 %v5287_v22, %s4792_s17  ;;  %v4761_v22 = vld [vmem:[#allocation2 + $0x110] sm:$0xff] }
 0x1b4   : > { %v6097_v63 = vpop.permute.xlu1 %1143 }
 0x1b5   : > { %8428 = vst [vmem:[#allocation149_spill] sm:$0xff] %v6097_v63  ;;  %v6102_v2 = vpop.permute.xlu0 %1149 }
 0x1b6   : > { %1331 = vrot.lane.b32.xlu1 %v4759_v13, %s4791_s16  ;;  %8429 = vst [vmem:[#allocation150_spill] sm:$0xff] %v6102_v2 }
 0x1b7   : > { %1333 = vrot.lane.b32.xlu0 %v4760_v39, %s4791_s16 }
 0x1b8   : > { %v6104_v4 = vpop.permute.xlu1 %1147 }
 0x1b9   : > { %8430 = vst [vmem:[#allocation151_spill] sm:$0xff] %v6104_v4  ;;  %v6109_v26 = vpop.permute.xlu0 %1153  ;;  %v4762_v4 = vld [vmem:[#allocation2 + $0x128] sm:$0xff] }
 0x1ba   : > { %1427 = vrot.lane.b32.xlu1 %v5306_v41, %s4792_s17  ;;  %8431 = vst [vmem:[#allocation152_spill] sm:$0xff] %v6109_v26 }
 0x1bb   : > { %1429 = vrot.lane.b32.xlu0 %v5299_v37, %s4792_s17  ;;  %v4763_v37 = vld [vmem:[#allocation2 + $0x130] sm:$0xff] }
 0x1bc   : > { %v6111_v54 = vpop.permute.xlu1 %1151 }
 0x1bd   : > { %8432 = vst [vmem:[#allocation153_spill] sm:$0xff] %v6111_v54  ;;  %v6116_v13 = vpop.permute.xlu0 %1157 }
 0x1be   : > { %1335 = vrot.lane.b32.xlu1 %v4761_v22, %s4791_s16  ;;  %8433 = vst [vmem:[#allocation154_spill] sm:$0xff] %v6116_v13 }
 0x1bf   : > { %1337 = vrot.lane.b32.xlu0 %v4762_v4, %s4791_s16 }
 0x1c0   : > { %v6118_v2 = vpop.permute.xlu1 %1155 }
 0x1c1   : > { %8434 = vst [vmem:[#allocation155_spill] sm:$0xff] %v6118_v2  ;;  %v6123_v41 = vpop.permute.xlu0 %1161  ;;  %v4764_v2 = vld [vmem:[#allocation2 + $0x148] sm:$0xff] }
 0x1c2   : > { %1431 = vrot.lane.b32.xlu1 %v5318_v12, %s4792_s17  ;;  %8435 = vst [vmem:[#allocation156_spill] sm:$0xff] %v6123_v41 }
 0x1c3   : > { %1433 = vrot.lane.b32.xlu0 %v5311_v5, %s4792_s17  ;;  %v4765_v5 = vld [vmem:[#allocation2 + $0x150] sm:$0xff] }
 0x1c4   : > { %v6125_v39 = vpop.permute.xlu1 %1159 }
 0x1c5   : > { %8436 = vst [vmem:[#allocation157_spill] sm:$0xff] %v6125_v39  ;;  %v6130_v22 = vpop.permute.xlu0 %1165  ;;  %v4770_v39 = vld [vmem:[#allocation2 + $0x1a8] sm:$0xff] }
 0x1c6   : > { %1339 = vrot.lane.b32.xlu1 %v4763_v37, %s4791_s16  ;;  %8437 = vst [vmem:[#allocation158_spill] sm:$0xff] %v6130_v22 }
 0x1c7   : > { %1341 = vrot.lane.b32.xlu0 %v4764_v2, %s4791_s16 }
 0x1c8   : > { %v6132_v13 = vpop.permute.xlu1 %1163 }
 0x1c9   : > { %8438 = vst [vmem:[#allocation159_spill] sm:$0xff] %v6132_v13  ;;  %v6137_v12 = vpop.permute.xlu0 %1169  ;;  %v8443_v13 = vld [vmem:[#allocation63_spill] sm:$0xff] }
 0x1ca   : > { %1435 = vrot.lane.b32.xlu1 %v8361_v48, %s4792_s17  ;;  %8439 = vst [vmem:[#allocation160_spill] sm:$0xff] %v6137_v12  ;;  %v4766_v12 = vld [vmem:[#allocation2 + $0x168] sm:$0xff] }
 0x1cb   : > { %1437 = vrot.lane.b32.xlu0 %v5323_v18, %s4792_s17  ;;  %v8446_v18 = vld [vmem:[#allocation69_spill] sm:$0xff] }
 0x1cc   : > { %v6139_v4 = vpop.permute.xlu1 %1167 }
 0x1cd   : > { %8440 = vst [vmem:[#allocation161_spill] sm:$0xff] %v6139_v4  ;;  %v6144_v37 = vpop.permute.xlu0 %1173 }
 0x1ce   : > { %1343 = vrot.lane.b32.xlu1 %v4765_v5, %s4791_s16  ;;  %8441 = vst [vmem:[#allocation162_spill] sm:$0xff] %v6144_v37 }
 0x1cf   : > { %1249 = vrot.lane.b32.xlu0 %v8443_v13, %s4790_s30  ;;  %v8450_v13 = vld [vmem:[#allocation71_spill] sm:$0xff] }
 0x1d0   : > { %v6146_v22 = vpop.permute.xlu1 %1171 }
 0x1d1   : > { %8442 = vst [vmem:[#allocation163_spill] sm:$0xff] %v6146_v22  ;;  %v6152_v48 = vpop.permute.xlu0 %1177  ;;  %v4767_v22 = vld [vmem:[#allocation2 + $0x170] sm:$0xff] }
 0x1d2   : > { %1439 = vrot.lane.b32.xlu1 %v8365_v49, %s4792_s17  ;;  %8444 = vst [vmem:[#allocation164_spill] sm:$0xff] %v6152_v48 }
 0x1d3   : > { %1345 = vrot.lane.b32.xlu0 %v4766_v12, %s4791_s16 }
 0x1d4   : > { %v6154_v2 = vpop.permute.xlu1 %1175 }
 0x1d5   : > { %8445 = vst [vmem:[#allocation165_spill] sm:$0xff] %v6154_v2  ;;  %v1214_v5 = vpop.permute.xlu0 %1213  ;;  %v8448_v2 = vld [vmem:[#allocation67_spill] sm:$0xff] }
 0x1d6   : > { %1251 = vrot.lane.b32.xlu1 %v8446_v18, %s4790_s30 }
 0x1d7   : > { %1441 = vrot.lane.b32.xlu0 %v8364_v46, %s4792_s17  ;;  %v8449_v46 = vld [vmem:[#allocation73_spill] sm:$0xff] }
 0x1d8   : > { %v6159_v37 = vpop.permute.xlu1 %1179 }
 0x1d9   : > { %8447 = vst [vmem:[#allocation166_spill] sm:$0xff] %v6159_v37  ;;  %v6164_v49 = vpop.permute.xlu0 %1217  ;;  %v4768_v37 = vld [vmem:[#allocation2 + $0x188] sm:$0xff] }
 0x1da   : > { %1347 = vrot.lane.b32.xlu1 %v4767_v22, %s4791_s16 }
 0x1db   : > { %1253 = vrot.lane.b32.xlu0 %v8448_v2, %s4790_s30  ;;  %v4769_v2 = vld [vmem:[#allocation2 + $0x190] sm:$0xff] }
 0x1dc   : > { %v6166_v48 = vpop.permute.xlu1 %1215 }
 0x1dd   : > { %v6172_v12 = vpop.permute.xlu0 %1221 }
 0x1de   : > { %1443 = vrot.lane.b32.xlu1 %v8369_v50, %s4792_s17 }
 0x1df   : > { %1349 = vrot.lane.b32.xlu0 %v4768_v37, %s4791_s16 }
 0x1e0   : > { %v6174_v4 = vpop.permute.xlu1 %1219 }
 0x1e1   : > { %v6179_v22 = vpop.permute.xlu0 %1225 }
 0x1e2   : > { %1255 = vrot.lane.b32.xlu1 %v8449_v46, %s4790_s30 }
 0x1e3   : > { %1445 = vrot.lane.b32.xlu0 %v8368_v47, %s4792_s17  ;;  %v375_v47 = vld [vmem:[#allocation2] sm:$0xff] }
 0x1e4   : > { %v6181_v18 = vpop.permute.xlu1 %1223 }
 0x1e5   : > { %v6186_v50 = vpop.permute.xlu0 %1229 }
 0x1e6   : > { %1351 = vrot.lane.b32.xlu1 %v4769_v2, %s4791_s16 }
 0x1e7   : > { %1257 = vrot.lane.b32.xlu0 %v8450_v13, %s4790_s30  ;;  %v496_v13 = vrot.slane %v375_v47, 7 }
 0x1e8   : > { %v6188_v41 = vpop.permute.xlu1 %1227 }
 0x1e9   : > { %v6194_v37 = vpop.permute.xlu0 %1233 }
 0x1ea   : > { %1447 = vrot.lane.b32.xlu1 %v8373_v51, %s4792_s17  ;;  %v4771_v51 = vld [vmem:[#allocation2 + $0x1b0] sm:$0xff] }
 0x1eb   : > { %1353 = vrot.lane.b32.xlu0 %v4770_v39, %s4791_s16  ;;  %v8453_v39 = vld [vmem:[#allocation4_spill] sm:$0xff] }
 0x1ec   : > { %v6196_v46 = vpop.permute.xlu1 %1231 }
 0x1ed   : > { %v6201_v2 = vpop.permute.xlu0 %1237 }
 0x1ee   : > { %1259 = vrot.lane.b32.xlu1 %v5626_v23, %s4790_s30  ;;  %8451 = vst [vmem:[#allocation167_spill] sm:$0xff] %v6201_v2  ;;  %v8454_v23 = vrot.slane %v8453_v39, 7 }
 0x1ef   : > { %1449 = vrot.lane.b32.xlu0 %v8372_v45, %s4792_s17  ;;  %v8456_v45 = vld [vmem:[#allocation12_spill] sm:$0xff] }
 0x1f0   : > { %v6203_v26 = vpop.permute.xlu1 %1235  ;;  %v498_v63 = vsel %vm495_vm1, %v496_v13, %v8454_v23 }
 0x1f1   : > { %v6208_v54 = vpop.permute.xlu0 %1241  ;;  %v1501_v47 = vsel %vm225_vm0, %v498_v63, %v8456_v45  ;;  %v8460_v45 = vld [vmem:[#allocation5_spill] sm:$0xff] }
 0x1f2   : > { %1355 = vrot.lane.b32.xlu1 %v4771_v51, %s4791_s16  ;;  %8452 = vst [vmem:[#allocation168_spill] sm:$0xff] %v6208_v54  ;;  %v4772_v54 = vld [vmem:[#allocation2 + $0x1c8] sm:$0xff] }
 0x1f3   : > { %1261 = vrot.lane.b32.xlu0 %v5618_v38, %s4790_s30  ;;  %v8457_v38 = vld [vmem:[#allocation74_spill] sm:$0xff] }
 0x1f4   : > { %v6210_v17 = vpop.permute.xlu1 %1239  ;;  %v1533_v39 = vsel %vm268_vm2, %v1501_v47, %v8457_v38 }
 0x1f5   : > { %v6219_v2 = vpop.permute.xlu0 %1245  ;;  %v1566_v23 = vsel %vm1565_vm5, %v1533_v39, %v5771_v55  ;;  %v8459_v55 = vld [vmem:[#allocation15_spill] sm:$0xff] }
 0x1f6   : > { %1451 = vrot.lane.b32.xlu1 %v8376_v42, %s4792_s17  ;;  %8455 = vst [vmem:[#allocation4_spill] sm:$0xff] %v6219_v2  ;;  %v1599_v63 = vsel %vm1598_vm6, %v1566_v23, %v5899_v33  ;;  %v1502_v47 = vsel %vm225_vm0, %v8460_v45, %v8459_v55  ;;  %v4773_v33 = vld [vmem:[#allocation2 + $0x1d0] sm:$0xff] }
 0x1f7   : > { %1357 = vrot.lane.b32.xlu0 %v4772_v54, %s4791_s16  ;;  %v1632_v13 = vsel %vm1631_vm7, %v1599_v63, %v6046_v8  ;;  %v8461_v8 = vld [vmem:[#allocation79_spill] sm:$0xff] }
 0x1f8   : > { %v6223_v51 = vpop.permute.xlu1 %1243  ;;  %v1665_v38 = vsel %vm1664_vm8, %v1632_v13, %v1214_v5  ;;  %v1534_v63 = vsel %vm268_vm2, %v1502_v47, %v8461_v8  ;;  %v8466_v8 = vld [vmem:[#allocation29_spill] sm:$0xff] }
 0x1f9   : > { %v1310_v42 = vpop.permute.xlu0 %1309  ;;  %v1567_v13 = vsel %vm1565_vm5, %v1534_v63, %v5781_v58 }
 0x1fa   : > { %1263 = vrot.lane.b32.xlu1 %v5644_v16, %s4790_s30  ;;  %v1698_v39 = vsel %vm1697_vm9, %v1665_v38, %v1310_v42  ;;  %v8464_v42 = vld [vmem:[#allocation78_spill] sm:$0xff]  ;;  %v1600_v55 = vsel %vm1598_vm6, %v1567_v13, %v5911_v24 }
 0x1fb   : > { %1453 = vrot.lane.b32.xlu0 %v8375_v43, %s4792_s17  ;;  %v8462_v43 = vld [vmem:[#allocation17_spill] sm:$0xff] }
 0x1fc   : > { %v6236_v54 = vpop.permute.xlu1 %1247 }
 0x1fd   : > { %8458 = vst [vmem:[#allocation12_spill] sm:$0xff] %v6236_v54  ;;  %v1406_v23 = vpop.permute.xlu0 %1405  ;;  %v8463_v54 = vld [vmem:[#allocation23_spill] sm:$0xff] }
 0x1fe   : > { %1359 = vrot.lane.b32.xlu1 %v4773_v33, %s4791_s16  ;;  %v1731_v16 = vsel %vm1730_vm10, %v1698_v39, %v1406_v23  ;;  %v1503_v5 = vsel %vm225_vm0, %v8463_v54, %v8462_v43  ;;  %v1633_v54 = vsel %vm1631_vm7, %v1600_v55, %v6055_v6  ;;  %v8465_v23 = vld [vmem:[#allocation21_spill] sm:$0xff] }
 0x1ff   : > { %1265 = vrot.lane.b32.xlu0 %v5635_v40, %s4790_s30  ;;  %3981 = vmatprep.mubr.msk.f32.mxu0 %vm1775_vm11, %v1731_v16  ;;  %v1535_v38 = vsel %vm268_vm2, %v1503_v5, %v8464_v42  ;;  %v1666_v16 = vsel %vm1664_vm8, %v1633_v54, %v6166_v48 }
 0x200   : > { %v1312_v2 = vpop.permute.xlu1 %1311  ;;  %v1568_v45 = vsel %vm1565_vm5, %v1535_v38, %v5779_v57  ;;  %v4774_v57 = vld [vmem:[#allocation2 + $0x1e8] sm:$0xff]  ;;  %v8469_v38 = vld [vmem:[#allocation82_spill] sm:$0xff] }
 0x201   : > { %v1314_v58 = vpop.permute.xlu0 %1313  ;;  %v1601_v47 = vsel %vm1598_vm6, %v1568_v45, %v5909_v44  ;;  %v1699_v24 = vsel %vm1697_vm9, %v1666_v16, %v1312_v2  ;;  %v1504_v44 = vsel %vm225_vm0, %v8466_v8, %v8465_v23  ;;  %v8467_v2 = vld [vmem:[#allocation83_spill] sm:$0xff] }
 0x202   : > { %1455 = vrot.lane.b32.xlu1 %v8379_v29, %s4792_s17  ;;  %v1634_v39 = vsel %vm1631_vm7, %v1601_v47, %v6053_v36  ;;  %v1536_v63 = vsel %vm268_vm2, %v1504_v44, %v8467_v2 }
 0x203   : > { %1361 = vrot.lane.b32.xlu0 %v4774_v57, %s4791_s16  ;;  %v1667_v6 = vsel %vm1664_vm8, %v1634_v39, %v6164_v49  ;;  %v8468_v49 = vld [vmem:[#allocation19_spill] sm:$0xff]  ;;  %v1569_v13 = vsel %vm1565_vm5, %v1536_v63, %v5789_v61  ;;  %v444_v57 = vld [vmem:[#allocation2 + $0x228] sm:$0xff] }
 0x204   : > { %v1408_v33 = vpop.permute.xlu1 %1407  ;;  %v1700_v48 = vsel %vm1697_vm9, %v1667_v6, %v1314_v58  ;;  %v1505_v5 = vsel %vm225_vm0, %v8383_v56, %v8468_v49  ;;  %v1602_v45 = vsel %vm1598_vm6, %v1569_v13, %v5922_v53  ;;  %v4775_v58 = vld [vmem:[#allocation2 + $0x1f0] sm:$0xff]  ;;  %v723_v44 = vrot.slane %v444_v57, 7  ;;  %v8475_v13 = vld [vmem:[#allocation37_spill] sm:$0xff] }
 0x205   : > { %v1732_v29 = vsel %vm1730_vm10, %v1699_v24, %v1408_v33  ;;  %v1410_v36 = vpop.permute.xlu0 %1409  ;;  %v1537_v55 = vsel %vm268_vm2, %v1505_v5, %v8469_v38  ;;  %v1635_v56 = vsel %vm1631_vm7, %v1602_v45, %v6062_v15  ;;  %v8470_v24 = vld [vmem:[#allocation25_spill] sm:$0xff]  ;;  %v443_v33 = vld [vmem:[#allocation2 + $0x220] sm:$0xff]  ;;  %v8471_v6 = vld [vmem:[#allocation22_spill] sm:$0xff] }
 0x206   : > { %1267 = vrot.lane.b32.xlu1 %v5660_v32, %s4790_s30  ;;  %3982 = vmatmul.mubr.msk.f32.vlgmr.msra.gmra.mrb[0].mxu0 %vm1775_vm11, %v1732_v29  ;;  %v1733_v43 = vsel %vm1730_vm10, %v1700_v48, %v1410_v36  ;;  %v1570_v54 = vsel %vm1565_vm5, %v1537_v55, %v5787_v60  ;;  %v1668_v47 = vsel %vm1664_vm8, %v1635_v56, %v6174_v4  ;;  %v722_v8 = vrot.slane %v443_v33, 7  ;;  %v8472_v48 = vld [vmem:[#allocation14_spill] sm:$0xff]  ;;  %v8474_v5 = vld [vmem:[#allocation28_spill] sm:$0xff]  ;;  %v8477_v55 = vld [vmem:[#allocation85_spill] sm:$0xff] }
 0x207   : > { %1457 = vrot.lane.b32.xlu0 %v8377_v28, %s4792_s17  ;;  %3984 = vmatprep.mubr.msk.f32.mxu0 %vm1775_vm11, %v1733_v43  ;;  %v1603_v28 = vsel %vm1598_vm6, %v1570_v54, %v5920_v14  ;;  %v1506_v14 = vsel %vm225_vm0, %v8387_v11, %v8470_v24  ;;  %v1507_v29 = vsel %vm225_vm0, %v8386_v3, %v8471_v6  ;;  %v8478_v56 = vld [vmem:[#allocation26_spill] sm:$0xff]  ;;  %v728_v24 = vrot.slane %v444_v57, 1 }
 0x208   : > { %v1316_v42 = vpop.permute.xlu1 %1315  ;;  %v1636_v16 = vsel %vm1631_vm7, %v1603_v28, %v6060_v21  ;;  %v724_v49 = vsel %vm495_vm1, %v722_v8, %v723_v44  ;;  %v8480_v28 = vld [vmem:[#allocation110_spill] sm:$0xff] }
 0x209   : > { %v1318_v61 = vpop.permute.xlu0 %1317  ;;  %v1701_v53 = vsel %vm1697_vm9, %v1668_v47, %v1316_v42  ;;  %v1669_v60 = vsel %vm1664_vm8, %v1636_v16, %v6172_v12  ;;  %v8476_v42 = vld [vmem:[#allocation80_spill] sm:$0xff]  ;;  %v8485_v6 = vld [vmem:[#allocation18_spill] sm:$0xff] }
 0x20a   : > { %1363 = vrot.lane.b32.xlu1 %v4775_v58, %s4791_s16  ;;  %v1702_v4 = vsel %vm1697_vm9, %v1669_v60, %v1318_v61  ;;  %v8479_v58 = vld [vmem:[#allocation35_spill] sm:$0xff]  ;;  %v8482_v60 = vld [vmem:[#allocation20_spill] sm:$0xff] }
 0x20b   : > { %1269 = vrot.lane.b32.xlu0 %v5648_v0, %s4790_s30  ;;  %v1538_v0 = vsel %vm268_vm2, %v1506_v14, %v5669_v19  ;;  %v1509_v61 = vsel %vm225_vm0, %v8479_v58, %v8478_v56 }
 0x20c   : > { %v1412_v39 = vpop.permute.xlu1 %1411  ;;  %v1571_v11 = vsel %vm1565_vm5, %v1538_v0, %v5797_v1  ;;  %v8484_v0 = vld [vmem:[#allocation16_spill] sm:$0xff] }
 0x20d   : > { %v1734_v15 = vsel %vm1730_vm10, %v1701_v53, %v1412_v39  ;;  %v1414_v21 = vpop.permute.xlu0 %1413  ;;  %v1604_v19 = vsel %vm1598_vm6, %v1571_v11, %v5933_v52  ;;  %v8481_v53 = vld [vmem:[#allocation84_spill] sm:$0xff] }
 0x20e   : > { %1459 = vrot.lane.b32.xlu1 %v8380_v7, %s4792_s17  ;;  %3985 = vmatmul.mubr.msk.f32.gmra.mrb[2].mxu0 %vm1775_vm11, %v1734_v15  ;;  %v1735_v12 = vsel %vm1730_vm10, %v1702_v4, %v1414_v21  ;;  %v1539_v7 = vsel %vm268_vm2, %v1507_v29, %v5662_v25  ;;  %v1637_v1 = vsel %vm1631_vm7, %v1604_v19, %v6069_v34  ;;  %v445_v34 = vld [vmem:[#allocation2 + $0x230] sm:$0xff]  ;;  %v8483_v4 = vld [vmem:[#allocation109_spill] sm:$0xff] }
 0x20f   : > { %1365 = vrot.lane.b32.xlu0 %v5615_v10, %s4791_s16  ;;  %3987 = vmatprep.mubr.msk.f32.mxu0 %vm1775_vm11, %v1735_v12  ;;  %v1572_v3 = vsel %vm1565_vm5, %v1539_v7, %v5795_v62  ;;  %v1670_v25 = vsel %vm1664_vm8, %v1637_v1, %v6181_v18  ;;  %v8473_v62 = vld [vmem:[#allocation13_spill] sm:$0xff]  ;;  %v1508_v18 = vsel %vm225_vm0, %v8475_v13, %v8474_v5  ;;  %v725_v54 = vrot.slane %v445_v34, 7  ;;  %v8492_v5 = vld [vmem:[#allocation86_spill] sm:$0xff] }
 0x210   : > { %v1320_v23 = vpop.permute.xlu1 %1319  ;;  %v1605_v36 = vsel %vm1598_vm6, %v1572_v3, %v8472_v48  ;;  %v1540_v45 = vsel %vm268_vm2, %v1508_v18, %v8477_v55  ;;  %v1541_v39 = vsel %vm268_vm2, %v1509_v61, %v8481_v53  ;;  %v729_v14 = vrot.slane %v445_v34, 1  ;;  %v8486_v48 = vld [vmem:[#allocation32_spill] sm:$0xff]  ;;  %v8493_v18 = vld [vmem:[#allocation27_spill] sm:$0xff]  ;;  %v8497_v53 = vld [vmem:[#allocation45_spill] sm:$0xff] }
 0x211   : > { %v1322_v10 = vpop.permute.xlu0 %1321  ;;  %v1638_v52 = vsel %vm1631_vm7, %v1605_v36, %v6067_v59  ;;  %v1703_v2 = vsel %vm1697_vm9, %v1670_v25, %v1320_v23  ;;  %v1573_v47 = vsel %vm1565_vm5, %v1540_v45, %v8480_v28  ;;  %v1574_v21 = vsel %vm1565_vm5, %v1541_v39, %v8483_v4 }
 0x212   : > { %1271 = vrot.lane.b32.xlu1 %v5667_v20, %s4790_s30  ;;  %v1671_v20 = vsel %vm1664_vm8, %v1638_v52, %v6179_v22  ;;  %v1606_v15 = vsel %vm1598_vm6, %v1573_v47, %v8482_v60  ;;  %v1607_v29 = vsel %vm1598_vm6, %v1574_v21, %v8485_v6  ;;  %v726_v23 = vsel %vm495_vm1, %v723_v44, %v725_v54  ;;  %v8501_v21 = vld [vmem:[#allocation114_spill] sm:$0xff] }
 0x213   : > { %1461 = vrot.lane.b32.xlu0 %v8473_v62, %s4792_s17  ;;  %v1704_v59 = vsel %vm1697_vm9, %v1671_v20, %v1322_v10  ;;  %v1639_v33 = vsel %vm1631_vm7, %v1606_v15, %v6076_v27  ;;  %v1640_v7 = vsel %vm1631_vm7, %v1607_v29, %v6074_v30  ;;  %v446_v27 = vld [vmem:[#allocation2 + $0x238] sm:$0xff]  ;;  %v730_v10 = vsel %vm624_vm3, %v728_v24, %v729_v14  ;;  %v8491_v20 = vld [vmem:[#allocation112_spill] sm:$0xff]  ;;  %v8503_v29 = vld [vmem:[#allocation33_spill] sm:$0xff] }
 0x214   : > { %v1416_v63 = vpop.permute.xlu1 %1415  ;;  %v1672_v11 = vsel %vm1664_vm8, %v1639_v33, %v6188_v41  ;;  %v1673_v3 = vsel %vm1664_vm8, %v1640_v7, %v6186_v50  ;;  %v8487_v41 = vld [vmem:[#allocation41_spill] sm:$0xff]  ;;  %v731_v52 = vrot.slane %v446_v27, 1  ;;  %v8505_v27 = vld [vmem:[#allocation31_spill] sm:$0xff] }
 0x215   : > { %v1736_v43 = vsel %vm1730_vm10, %v1703_v2, %v1416_v63  ;;  %v1418_v38 = vpop.permute.xlu0 %1417  ;;  %v1510_v44 = vsel %vm225_vm0, %v8487_v41, %v8486_v48  ;;  %v8489_v2 = vld [vmem:[#allocation30_spill] sm:$0xff]  ;;  %v8490_v63 = vld [vmem:[#allocation39_spill] sm:$0xff] }
 0x216   : > { %1367 = vrot.lane.b32.xlu1 %v8476_v42, %s4791_s16  ;;  %3988 = vmatmul.mubr.msk.f32.gmra.mrb[4].mxu0 %vm1775_vm11, %v1736_v43  ;;  %v1737_v22 = vsel %vm1730_vm10, %v1704_v59, %v1418_v38  ;;  %v1511_v62 = vsel %vm225_vm0, %v8490_v63, %v8489_v2  ;;  %v8494_v42 = vld [vmem:[#allocation111_spill] sm:$0xff]  ;;  %v732_v58 = vsel %vm624_vm3, %v729_v14, %v731_v52  ;;  %v8499_v14 = vld [vmem:[#allocation34_spill] sm:$0xff] }
 0x217   : > { %1273 = vrot.lane.b32.xlu0 %v724_v49, %s4790_s30  ;;  %3990 = vmatprep.mubr.msk.f32.mxu0 %vm1775_vm11, %v1737_v22  ;;  %v1543_v13 = vsel %vm268_vm2, %v1511_v62, %v8492_v5  ;;  %v8495_v22 = vld [vmem:[#allocation24_spill] sm:$0xff] }
 0x218   : > { %v1324_v16 = vpop.permute.xlu1 %1323  ;;  %v1576_v38 = vsel %vm1565_vm5, %v1543_v13, %v8494_v42  ;;  %v8513_v5 = vld [vmem:[#allocation116_spill] sm:$0xff] }
 0x219   : > { %v1326_v12 = vpop.permute.xlu0 %1325  ;;  %v1705_v19 = vsel %vm1697_vm9, %v1672_v11, %v1324_v16  ;;  %v1609_v54 = vsel %vm1598_vm6, %v1576_v38, %v8495_v22  ;;  %v8496_v16 = vld [vmem:[#allocation36_spill] sm:$0xff]  ;;  %v8515_v38 = vld [vmem:[#allocation129_spill] sm:$0xff] }
 0x21a   : > { %1463 = vrot.lane.b32.xlu1 %v8484_v0, %s4792_s17  ;;  %v1706_v36 = vsel %vm1697_vm9, %v1673_v3, %v1326_v12  ;;  %v1642_v61 = vsel %vm1631_vm7, %v1609_v54, %v6081_v9  ;;  %v1512_v39 = vsel %vm225_vm0, %v8497_v53, %v8496_v16  ;;  %v8498_v9 = vld [vmem:[#allocation89_spill] sm:$0xff]  ;;  %v8502_v12 = vld [vmem:[#allocation88_spill] sm:$0xff] }
 0x21b   : > { %1369 = vrot.lane.b32.xlu0 %v444_v57, %s4791_s16  ;;  %v8488_v57 = vld [vmem:[#allocation87_spill] sm:$0xff]  ;;  %v1544_v15 = vsel %vm268_vm2, %v1512_v39, %v8498_v9  ;;  %v8517_v54 = vld [vmem:[#allocation149_spill] sm:$0xff]  ;;  %v8520_v39 = vld [vmem:[#allocation168_spill] sm:$0xff] }
 0x21c   : > { %v1420_v8 = vpop.permute.xlu1 %1419  ;;  %v1542_v25 = vsel %vm268_vm2, %v1510_v44, %v8488_v57  ;;  %v1577_v33 = vsel %vm1565_vm5, %v1544_v15, %v8501_v21  ;;  %v8521_v9 = vld [vmem:[#allocation44_spill] sm:$0xff]  ;;  %v8522_v15 = vld [vmem:[#allocation53_spill] sm:$0xff] }
 0x21d   : > { %v1738_v1 = vsel %vm1730_vm10, %v1705_v19, %v1420_v8  ;;  %v1422_v30 = vpop.permute.xlu0 %1421  ;;  %v1575_v43 = vsel %vm1565_vm5, %v1542_v25, %v8491_v20  ;;  %v1610_v11 = vsel %vm1598_vm6, %v1577_v33, %v8503_v29  ;;  %v8508_v25 = vld [vmem:[#allocation40_spill] sm:$0xff]  ;;  %v8511_v20 = vld [vmem:[#allocation38_spill] sm:$0xff] }
 0x21e   : > { %1275 = vrot.lane.b32.xlu1 %v726_v23, %s4790_s30  ;;  %3991 = vmatmul.mubr.msk.f32.gmra.mrb[6].mxu0 %vm1775_vm11, %v1738_v1  ;;  %v1739_v50 = vsel %vm1730_vm10, %v1706_v36, %v1422_v30  ;;  %v1608_v59 = vsel %vm1598_vm6, %v1575_v43, %v8493_v18  ;;  %v8504_v23 = vld [vmem:[#allocation113_spill] sm:$0xff]  ;;  %v1643_v19 = vsel %vm1631_vm7, %v1610_v11, %v6090_v35  ;;  %v8507_v36 = vld [vmem:[#allocation167_spill] sm:$0xff]  ;;  %v8524_v33 = vld [vmem:[#allocation42_spill] sm:$0xff] }
 0x21f   : > { %1465 = vrot.lane.b32.xlu0 %v730_v10, %s4792_s17  ;;  %3993 = vmatprep.mubr.msk.f32.mxu0 %vm1775_vm11, %v1739_v50  ;;  %v1641_v55 = vsel %vm1631_vm7, %v1608_v59, %v6083_v31  ;;  %v1675_v31 = vsel %vm1664_vm8, %v1642_v61, %v6194_v37  ;;  %v8500_v37 = vld [vmem:[#allocation43_spill] sm:$0xff]  ;;  %v1676_v1 = vsel %vm1664_vm8, %v1643_v19, %v6203_v26  ;;  %v8509_v35 = vld [vmem:[#allocation49_spill] sm:$0xff]  ;;  %v8514_v59 = vld [vmem:[#allocation90_spill] sm:$0xff] }
 0x220   : > { %v1328_v49 = vpop.permute.xlu1 %1327  ;;  %v1674_v56 = vsel %vm1664_vm8, %v1641_v55, %v6196_v46  ;;  %v1513_v4 = vsel %vm225_vm0, %v8500_v37, %v8499_v14  ;;  %v8506_v10 = vld [vmem:[#allocation147_spill] sm:$0xff]  ;;  %v1514_v50 = vsel %vm225_vm0, %v8509_v35, %v8508_v25  ;;  %v8518_v61 = vld [vmem:[#allocation128_spill] sm:$0xff] }
 0x221   : > { %v1330_v45 = vpop.permute.xlu0 %1329  ;;  %v1707_v28 = vsel %vm1697_vm9, %v1674_v56, %v1328_v49  ;;  %v1545_v6 = vsel %vm268_vm2, %v1513_v4, %v8502_v12  ;;  %v8510_v26 = vld [vmem:[#allocation91_spill] sm:$0xff] }
 0x222   : > { %1371 = vrot.lane.b32.xlu1 %v445_v34, %s4791_s16  ;;  %v1708_v60 = vsel %vm1697_vm9, %v1675_v31, %v1330_v45  ;;  %v1578_v7 = vsel %vm1565_vm5, %v1545_v6, %v8504_v23  ;;  %v1546_v63 = vsel %vm268_vm2, %v1514_v50, %v8510_v26  ;;  %v8512_v43 = vld [vmem:[#allocation47_spill] sm:$0xff]  ;;  %v8519_v31 = vld [vmem:[#allocation148_spill] sm:$0xff]  ;;  %v8526_v6 = vld [vmem:[#allocation118_spill] sm:$0xff] }
 0x223   : > { %v1611_v3 = vsel %vm1598_vm6, %v1578_v7, %v8505_v27  ;;  %v1515_v49 = vsel %vm225_vm0, %v8512_v43, %v8511_v20  ;;  %v1579_v13 = vsel %vm1565_vm5, %v1546_v63, %v8513_v5  ;;  %v8516_v45 = vld [vmem:[#allocation115_spill] sm:$0xff]  ;;  %v8527_v23 = vld [vmem:[#allocation92_spill] sm:$0xff]  ;;  %v8529_v27 = vld [vmem:[#allocation117_spill] sm:$0xff] }
 0x224   : > { %v1424_v47 = vpop.permute.xlu1 %1423  ;;  %v1644_v48 = vsel %vm1631_vm7, %v1611_v3, %v8506_v10  ;;  %v1547_v42 = vsel %vm268_vm2, %v1515_v49, %v8514_v59  ;;  %v1612_v55 = vsel %vm1598_vm6, %v1579_v13, %v8515_v38  ;;  %v8528_v19 = vld [vmem:[#allocation131_spill] sm:$0xff]  ;;  %v8533_v50 = vld [vmem:[#allocation4_spill] sm:$0xff]  ;;  %v8535_v63 = vld [vmem:[#allocation57_spill] sm:$0xff] }
 0x225   : > { %v1740_v34 = vsel %vm1730_vm10, %v1707_v28, %v1424_v47  ;;  %v1426_v46 = vpop.permute.xlu0 %1425  ;;  %v1677_v30 = vsel %vm1664_vm8, %v1644_v48, %v8507_v36  ;;  %v1580_v22 = vsel %vm1565_vm5, %v1547_v42, %v8516_v45  ;;  %v1645_v56 = vsel %vm1631_vm7, %v1612_v55, %v8517_v54  ;;  %v8534_v26 = vld [vmem:[#allocation48_spill] sm:$0xff]  ;;  %v8538_v42 = vld [vmem:[#allocation133_spill] sm:$0xff] }
 0x226   : > { %1467 = vrot.lane.b32.xlu1 %v732_v58, %s4792_s17  ;;  %3994 = vmatmul.mubr.msk.f32.gmra.mrb[8].mxu0 %vm1775_vm11, %v1740_v34  ;;  %v1741_v24 = vsel %vm1730_vm10, %v1708_v60, %v1426_v46  ;;  %v1613_v28 = vsel %vm1598_vm6, %v1580_v22, %v8518_v61  ;;  %v1678_v47 = vsel %vm1664_vm8, %v1645_v56, %v6210_v17  ;;  %v8523_v17 = vld [vmem:[#allocation93_spill] sm:$0xff]  ;;  %v8537_v13 = vld [vmem:[#allocation120_spill] sm:$0xff]  ;;  %v8542_v61 = vld [vmem:[#allocation55_spill] sm:$0xff] }
 0x227   : > { %3996 = vmatprep.mubr.msk.f32.mxu0 %vm1775_vm11, %v1741_v24  ;;  %v1646_v34 = vsel %vm1631_vm7, %v1613_v28, %v8519_v31  ;;  %v1516_v24 = vsel %vm225_vm0, %v8522_v15, %v8521_v9  ;;  %v8539_v55 = vld [vmem:[#allocation153_spill] sm:$0xff]  ;;  %v8540_v54 = vld [vmem:[#allocation12_spill] sm:$0xff] }
 0x228   : > { %v1332_v0 = vpop.permute.xlu1 %1331  ;;  %v1679_v60 = vsel %vm1664_vm8, %v1646_v34, %v8520_v39  ;;  %v1548_v4 = vsel %vm268_vm2, %v1516_v24, %v8523_v17  ;;  %v8543_v34 = vld [vmem:[#allocation94_spill] sm:$0xff]  ;;  %v8544_v39 = vld [vmem:[#allocation119_spill] sm:$0xff]  ;;  %v8545_v9 = vld [vmem:[#allocation132_spill] sm:$0xff] }
 0x229   : > { %v1334_v8 = vpop.permute.xlu0 %1333  ;;  %v1709_v41 = vsel %vm1697_vm9, %v1676_v1, %v1332_v0  ;;  %v8525_v0 = vld [vmem:[#allocation51_spill] sm:$0xff]  ;;  %v1581_v29 = vsel %vm1565_vm5, %v1548_v4, %v8526_v6  ;;  %v8546_v24 = vld [vmem:[#allocation152_spill] sm:$0xff]  ;;  %v8549_v6 = vld [vmem:[#allocation97_spill] sm:$0xff] }
 0x22a   : > { %v1710_v52 = vsel %vm1697_vm9, %v1677_v30, %v1334_v8  ;;  %v1517_v12 = vsel %vm225_vm0, %v8525_v0, %v8524_v33  ;;  %v1614_v8 = vsel %vm1598_vm6, %v1581_v29, %v8528_v19  ;;  %v8530_v1 = vld [vmem:[#allocation151_spill] sm:$0xff]  ;;  %v8532_v30 = vld [vmem:[#allocation150_spill] sm:$0xff]  ;;  %v8547_v4 = vld [vmem:[#allocation52_spill] sm:$0xff] }
 0x22b   : > { %v1549_v7 = vsel %vm268_vm2, %v1517_v12, %v8527_v23  ;;  %v1647_v10 = vsel %vm1631_vm7, %v1614_v8, %v8530_v1  ;;  %v8550_v23 = vld [vmem:[#allocation122_spill] sm:$0xff]  ;;  %v8551_v8 = vld [vmem:[#allocation135_spill] sm:$0xff] }
 0x22c   : > { %v1428_v44 = vpop.permute.xlu1 %1427  ;;  %v1582_v3 = vsel %vm1565_vm5, %v1549_v7, %v8529_v27  ;;  %v1680_v36 = vsel %vm1664_vm8, %v1647_v10, %v6223_v51  ;;  %v8536_v51 = vld [vmem:[#allocation95_spill] sm:$0xff] }
 0x22d   : > { %v1742_v57 = vsel %vm1730_vm10, %v1709_v41, %v1428_v44  ;;  %v1430_v2 = vpop.permute.xlu0 %1429  ;;  %v8531_v41 = vld [vmem:[#allocation130_spill] sm:$0xff] }
 0x22e   : > { %3997 = vmatmul.mubr.msk.f32.gmra.mrb[10].mxu0 %vm1775_vm11, %v1742_v57  ;;  %v1743_v62 = vsel %vm1730_vm10, %v1710_v52, %v1430_v2  ;;  %v1615_v44 = vsel %vm1598_vm6, %v1582_v3, %v8531_v41  ;;  %v8552_v3 = vld [vmem:[#allocation155_spill] sm:$0xff]  ;;  %v8553_v41 = vld [vmem:[#allocation50_spill] sm:$0xff] }
 0x22f   : > { %3999 = vmatprep.mubr.msk.f32.mxu0 %vm1775_vm11, %v1743_v62  ;;  %v1648_v57 = vsel %vm1631_vm7, %v1615_v44, %v8532_v30  ;;  %v1518_v62 = vsel %vm225_vm0, %v8535_v63, %v8534_v26  ;;  %v8554_v44 = vld [vmem:[#allocation59_spill] sm:$0xff]  ;;  %v8557_v63 = vld [vmem:[#allocation134_spill] sm:$0xff] }
 0x230   : > { %v1336_v18 = vpop.permute.xlu1 %1335  ;;  %v1681_v52 = vsel %vm1664_vm8, %v1648_v57, %v8533_v50  ;;  %v1550_v49 = vsel %vm268_vm2, %v1518_v62, %v8536_v51 }
 0x231   : > { %v1338_v58 = vpop.permute.xlu0 %1337  ;;  %v1711_v16 = vsel %vm1697_vm9, %v1678_v47, %v1336_v18  ;;  %v1583_v18 = vsel %vm1565_vm5, %v1550_v49, %v8537_v13  ;;  %v8560_v13 = vld [vmem:[#allocation65_spill] sm:$0xff] }
 0x232   : > { %v1712_v14 = vsel %vm1697_vm9, %v1679_v60, %v1338_v58  ;;  %v1616_v38 = vsel %vm1598_vm6, %v1583_v18, %v8538_v42  ;;  %v8541_v58 = vld [vmem:[#allocation46_spill] sm:$0xff] }
 0x233   : > { %v1649_v45 = vsel %vm1631_vm7, %v1616_v38, %v8539_v55  ;;  %v1519_v28 = vsel %vm225_vm0, %v8542_v61, %v8541_v58  ;;  %v8561_v38 = vld [vmem:[#allocation99_spill] sm:$0xff]  ;;  %v8563_v58 = vld [vmem:[#allocation137_spill] sm:$0xff] }
 0x234   : > { %v1432_v53 = vpop.permute.xlu1 %1431  ;;  %v1682_v56 = vsel %vm1664_vm8, %v1649_v45, %v8540_v54 }
 0x235   : > { %v1744_v46 = vsel %vm1730_vm10, %v1711_v16, %v1432_v53  ;;  %v1434_v37 = vpop.permute.xlu0 %1433  ;;  %v1551_v16 = vsel %vm268_vm2, %v1519_v28, %v8543_v34  ;;  %v8564_v28 = vld [vmem:[#allocation157_spill] sm:$0xff] }
 0x236   : > { %4000 = vmatmul.mubr.msk.f32.gmra.mrb[12].mxu0 %vm1775_vm11, %v1744_v46  ;;  %v1745_v21 = vsel %vm1730_vm10, %v1712_v14, %v1434_v37  ;;  %v1584_v60 = vsel %vm1565_vm5, %v1551_v16, %v8544_v39  ;;  %v8565_v16 = vld [vmem:[#allocation54_spill] sm:$0xff] }
 0x237   : > { %4002 = vmatprep.mubr.msk.f32.mxu0 %vm1775_vm11, %v1745_v21  ;;  %v1617_v15 = vsel %vm1598_vm6, %v1584_v60, %v8545_v9  ;;  %v8548_v21 = vld [vmem:[#allocation61_spill] sm:$0xff]  ;;  %v8567_v9 = vld [vmem:[#allocation98_spill] sm:$0xff] }
 0x238   : > { %v1340_v11 = vpop.permute.xlu1 %1339  ;;  %v1650_v14 = vsel %vm1631_vm7, %v1617_v15, %v8546_v24  ;;  %v1520_v33 = vsel %vm225_vm0, %v8548_v21, %v8547_v4  ;;  %v8569_v4 = vld [vmem:[#allocation136_spill] sm:$0xff] }
 0x239   : > { %v1342_v48 = vpop.permute.xlu0 %1341  ;;  %v1713_v25 = vsel %vm1697_vm9, %v1680_v36, %v1340_v11  ;;  %v1552_v29 = vsel %vm268_vm2, %v1520_v33, %v8549_v6  ;;  %v1521_v36 = vsel %vm225_vm0, %v8554_v44, %v8553_v41  ;;  %v8570_v33 = vld [vmem:[#allocation156_spill] sm:$0xff]  ;;  %v8575_v41 = vld [vmem:[#allocation139_spill] sm:$0xff] }
 0x23a   : > { %v1714_v20 = vsel %vm1697_vm9, %v1681_v52, %v1342_v48  ;;  %v1585_v7 = vsel %vm1565_vm5, %v1552_v29, %v8550_v23  ;;  %v8556_v52 = vld [vmem:[#allocation121_spill] sm:$0xff]  ;;  %v8571_v29 = vld [vmem:[#allocation60_spill] sm:$0xff] }
 0x23b   : > { %v1618_v27 = vsel %vm1598_vm6, %v1585_v7, %v8551_v8  ;;  %v8573_v8 = vld [vmem:[#allocation101_spill] sm:$0xff] }
 0x23c   : > { %v1436_v35 = vpop.permute.xlu1 %1435  ;;  %v1651_v1 = vsel %vm1631_vm7, %v1618_v27, %v8552_v3 }
 0x23d   : > { %v1746_v2 = vsel %vm1730_vm10, %v1713_v25, %v1436_v35  ;;  %v1438_v43 = vpop.permute.xlu0 %1437  ;;  %v8555_v25 = vld [vmem:[#allocation96_spill] sm:$0xff] }
 0x23e   : > { %4003 = vmatmul.mubr.msk.f32.gmra.mrb[14].mxu0 %vm1775_vm11, %v1746_v2  ;;  %v1747_v5 = vsel %vm1730_vm10, %v1714_v20, %v1438_v43  ;;  %v1553_v35 = vsel %vm268_vm2, %v1521_v36, %v8555_v25  ;;  %v8558_v20 = vld [vmem:[#allocation154_spill] sm:$0xff]  ;;  %v8576_v36 = vld [vmem:[#allocation159_spill] sm:$0xff] }
 0x23f   : > { %4005 = vmatprep.mubr.msk.f32.mxu0 %vm1775_vm11, %v1747_v5  ;;  %v1586_v2 = vsel %vm1565_vm5, %v1553_v35, %v8556_v52  ;;  %v8559_v5 = vld [vmem:[#allocation56_spill] sm:$0xff]  ;;  %v8577_v35 = vld [vmem:[#allocation58_spill] sm:$0xff] }
 0x240   : > { %v1344_v59 = vpop.permute.xlu1 %1343  ;;  %v1619_v62 = vsel %vm1598_vm6, %v1586_v2, %v8557_v63  ;;  %v1522_v18 = vsel %vm225_vm0, %v8560_v13, %v8559_v5  ;;  %v8579_v63 = vld [vmem:[#allocation100_spill] sm:$0xff]  ;;  %v8581_v5 = vld [vmem:[#allocation138_spill] sm:$0xff] }
 0x241   : > { %v1250_v22 = vpop.permute.xlu0 %1249  ;;  %v1715_v47 = vsel %vm1697_vm9, %v1682_v56, %v1344_v59  ;;  %v1652_v43 = vsel %vm1631_vm7, %v1619_v62, %v8558_v20  ;;  %v1554_v55 = vsel %vm268_vm2, %v1522_v18, %v8561_v38  ;;  %v8582_v18 = vld [vmem:[#allocation158_spill] sm:$0xff]  ;;  %v6652_v38 = vld [vmem:[#allocation3 + $0x8] sm:$0xff] }
 0x242   : > { %v1683_v17 = vsel %vm1664_vm8, %v1650_v14, %v1250_v22  ;;  %v8562_v22 = vld [vmem:[#allocation124_spill] sm:$0xff]  ;;  %v8568_v14 = vld [vmem:[#allocation123_spill] sm:$0xff]  ;;  %8583 = vst [vmem:[#allocation74_spill] sm:$0xff] %v6652_v38 }
 0x243   : > { %v1587_v54 = vsel %vm1565_vm5, %v1554_v55, %v8562_v22  ;;  %v6654_v55 = vld [vmem:[#allocation3 + $0x10] sm:$0xff] }
 0x244   : > { %v1440_v31 = vpop.permute.xlu1 %1439  ;;  %v1620_v61 = vsel %vm1598_vm6, %v1587_v54, %v8563_v58  ;;  %v4107_v22 = vpack.i.bf16 %v6654_v55, %v6652_v38  ;;  %v8584_v54 = vld [vmem:[#allocation64_spill] sm:$0xff] }
 0x245   : > { %v1748_v53 = vsel %vm1730_vm10, %v1715_v47, %v1440_v31  ;;  %v1346_v46 = vpop.permute.xlu0 %1345  ;;  %v1653_v47 = vsel %vm1631_vm7, %v1620_v61, %v8564_v28 }
 0x246   : > { %4006 = vmatmul.mubr.msk.f32.gmra.mrb[16].mxu0 %vm1775_vm11, %v1748_v53  ;;  %v1716_v0 = vsel %vm1697_vm9, %v1683_v17, %v1346_v46  ;;  %v8566_v53 = vld [vmem:[#allocation63_spill] sm:$0xff]  ;;  %4108 = vrot.lane.b32.xlu0 %v4107_v22, %s4786_s26 }
 0x247   : > { %v1523_v39 = vsel %vm225_vm0, %v8566_v53, %v8565_v16  ;;  %v8587_v16 = vld [vmem:[#allocation127_spill] sm:$0xff] }
 0x248   : > { %v1252_v37 = vpop.permute.xlu1 %1251  ;;  %v1555_v15 = vsel %vm268_vm2, %v1523_v39, %v8567_v9  ;;  %v8589_v9 = vld [vmem:[#allocation161_spill] sm:$0xff]  ;;  %v8605_v22 = vld [vmem:[#allocation7_spill] sm:$0xff] }
 0x249   : > { %v1442_v12 = vpop.permute.xlu0 %1441  ;;  %v1684_v48 = vsel %vm1664_vm8, %v1651_v1, %v1252_v37  ;;  %v1588_v37 = vsel %vm1565_vm5, %v1555_v15, %v8568_v14  ;;  %v8574_v1 = vld [vmem:[#allocation126_spill] sm:$0xff] }
 0x24a   : > { %v1749_v11 = vsel %vm1730_vm10, %v1716_v0, %v1442_v12  ;;  %v1621_v21 = vsel %vm1598_vm6, %v1588_v37, %v8569_v4  ;;  %v8590_v37 = vld [vmem:[#allocation62_spill] sm:$0xff] }
 0x24b   : > { %4008 = vmatprep.mubr.msk.f32.mxu0 %vm1775_vm11, %v1749_v11  ;;  %v1654_v0 = vsel %vm1631_vm7, %v1621_v21, %v8570_v33  ;;  %v8572_v11 = vld [vmem:[#allocation69_spill] sm:$0xff] }
 0x24c   : > { %v1348_v19 = vpop.permute.xlu1 %1347  ;;  %v1524_v23 = vsel %vm225_vm0, %v8572_v11, %v8571_v29  ;;  %v8593_v29 = vld [vmem:[#allocation6_spill] sm:$0xff] }
 0x24d   : > { %v1254_v10 = vpop.permute.xlu0 %1253  ;;  %v1717_v30 = vsel %vm1697_vm9, %v1684_v48, %v1348_v19  ;;  %v1556_v27 = vsel %vm268_vm2, %v1524_v23, %v8573_v8  ;;  %v8595_v8 = vld [vmem:[#allocation160_spill] sm:$0xff] }
 0x24e   : > { %v1685_v49 = vsel %vm1664_vm8, %v1652_v43, %v1254_v10  ;;  %v1589_v10 = vsel %vm1565_vm5, %v1556_v27, %v8574_v1  ;;  %v8580_v43 = vld [vmem:[#allocation125_spill] sm:$0xff] }
 0x24f   : > { %v1622_v44 = vsel %vm1598_vm6, %v1589_v10, %v8575_v41  ;;  %v8596_v10 = vld [vmem:[#allocation68_spill] sm:$0xff] }
 0x250   : > { %v1444_v57 = vpop.permute.xlu1 %1443 }
 0x251   : > { %v1750_v50 = vsel %vm1730_vm10, %v1717_v30, %v1444_v57  ;;  %v1350_v26 = vpop.permute.xlu0 %1349  ;;  %v1655_v30 = vsel %vm1631_vm7, %v1622_v44, %v8576_v36 }
 0x252   : > { %4009 = vmatmul.mubr.msk.f32.gmra.mrb[18].mxu0 %vm1775_vm11, %v1750_v50  ;;  %v1718_v59 = vsel %vm1697_vm9, %v1685_v49, %v1350_v26  ;;  %v8578_v50 = vld [vmem:[#allocation67_spill] sm:$0xff] }
 0x253   : > { %v1525_v52 = vsel %vm225_vm0, %v8578_v50, %v8577_v35  ;;  %v8599_v35 = vld [vmem:[#allocation8_spill] sm:$0xff] }
 0x254   : > { %v1256_v51 = vpop.permute.xlu1 %1255  ;;  %v1557_v62 = vsel %vm268_vm2, %v1525_v52, %v8579_v63  ;;  %v8601_v63 = vld [vmem:[#allocation163_spill] sm:$0xff] }
 0x255   : > { %v1446_v42 = vpop.permute.xlu0 %1445  ;;  %v1686_v34 = vsel %vm1664_vm8, %v1653_v47, %v1256_v51  ;;  %v1590_v51 = vsel %vm1565_vm5, %v1557_v62, %v8580_v43  ;;  %v8586_v47 = vld [vmem:[#allocation103_spill] sm:$0xff] }
 0x256   : > { %v1751_v45 = vsel %vm1730_vm10, %v1718_v59, %v1446_v42  ;;  %v1623_v13 = vsel %vm1598_vm6, %v1590_v51, %v8581_v5  ;;  %v8602_v51 = vld [vmem:[#allocation66_spill] sm:$0xff] }
 0x257   : > { %4011 = vmatprep.mubr.msk.f32.mxu0 %vm1775_vm11, %v1751_v45  ;;  %v1656_v59 = vsel %vm1631_vm7, %v1623_v13, %v8582_v18 }
 0x258   : > { %v1352_v56 = vpop.permute.xlu1 %1351 }
 0x259   : > { %v1258_v31 = vpop.permute.xlu0 %1257  ;;  %v1719_v60 = vsel %vm1697_vm9, %v1686_v34, %v1352_v56  ;;  %v8585_v56 = vld [vmem:[#allocation73_spill] sm:$0xff] }
 0x25a   : > { %v1687_v6 = vsel %vm1664_vm8, %v1654_v0, %v1258_v31  ;;  %v1526_v58 = vsel %vm225_vm0, %v8585_v56, %v8584_v54  ;;  %v8592_v0 = vld [vmem:[#allocation102_spill] sm:$0xff] }
 0x25b   : > { %v1558_v31 = vsel %vm268_vm2, %v1526_v58, %v8586_v47  ;;  %v8606_v58 = vld [vmem:[#allocation142_spill] sm:$0xff] }
 0x25c   : > { %v1448_v46 = vpop.permute.xlu1 %1447  ;;  %v1591_v53 = vsel %vm1565_vm5, %v1558_v31, %v8587_v16  ;;  %v8608_v16 = vld [vmem:[#allocation72_spill] sm:$0xff] }
 0x25d   : > { %v1752_v24 = vsel %vm1730_vm10, %v1719_v60, %v1448_v46  ;;  %v1354_v17 = vpop.permute.xlu0 %1353  ;;  %v8588_v60 = vld [vmem:[#allocation141_spill] sm:$0xff] }
 0x25e   : > { %4012 = vmatmul.mubr.msk.f32.gmra.mrb[20].mxu0 %vm1775_vm11, %v1752_v24  ;;  %v1720_v7 = vsel %vm1697_vm9, %v1687_v6, %v1354_v17  ;;  %v1624_v46 = vsel %vm1598_vm6, %v1591_v53, %v8588_v60  ;;  %v8591_v17 = vld [vmem:[#allocation71_spill] sm:$0xff]  ;;  %v8609_v53 = vld [vmem:[#allocation81_spill] sm:$0xff] }
 0x25f   : > { %v1657_v15 = vsel %vm1631_vm7, %v1624_v46, %v8589_v9  ;;  %v1527_v4 = vsel %vm225_vm0, %v8591_v17, %v8590_v37  ;;  %v8610_v9 = vld [vmem:[#allocation107_spill] sm:$0xff] }
 0x260   : > { %v1260_v12 = vpop.permute.xlu1 %1259 }
 0x261   : > { %v1450_v19 = vpop.permute.xlu0 %1449  ;;  %v1688_v25 = vsel %vm1664_vm8, %v1655_v30, %v1260_v12  ;;  %v1559_v12 = vsel %vm268_vm2, %v1527_v4, %v8592_v0  ;;  %v8598_v30 = vld [vmem:[#allocation105_spill] sm:$0xff] }
 0x262   : > { %v1753_v3 = vsel %vm1730_vm10, %v1720_v7, %v1450_v19  ;;  %v1592_v11 = vsel %vm1565_vm5, %v1559_v12, %v8593_v29  ;;  %v8594_v7 = vld [vmem:[#allocation140_spill] sm:$0xff]  ;;  %v8612_v4 = vld [vmem:[#allocation145_spill] sm:$0xff]  ;;  %v8614_v29 = vld [vmem:[#allocation70_spill] sm:$0xff] }
 0x263   : > { %4014 = vmatprep.mubr.msk.f32.mxu0 %vm1775_vm11, %v1753_v3  ;;  %v1625_v19 = vsel %vm1598_vm6, %v1592_v11, %v8594_v7  ;;  %v1531_v11 = vsel %vm225_vm0, %v5635_v40, %v8614_v29 }
 0x264   : > { %v1356_v48 = vpop.permute.xlu1 %1355  ;;  %v1658_v27 = vsel %vm1631_vm7, %v1625_v19, %v8595_v8  ;;  %v8615_v19 = vld [vmem:[#allocation106_spill] sm:$0xff] }
 0x265   : > { %v1262_v57 = vpop.permute.xlu0 %1261  ;;  %v1721_v2 = vsel %vm1697_vm9, %v1688_v25, %v1356_v48  ;;  %v8597_v48 = vld [vmem:[#allocation77_spill] sm:$0xff]  ;;  %v1563_v8 = vsel %vm268_vm2, %v1531_v11, %v8615_v19 }
 0x266   : > { %v1689_v45 = vsel %vm1664_vm8, %v1656_v59, %v1262_v57  ;;  %v1528_v41 = vsel %vm225_vm0, %v8597_v48, %v8596_v10  ;;  %v8604_v59 = vld [vmem:[#allocation104_spill] sm:$0xff] }
 0x267   : > { %v1560_v57 = vsel %vm268_vm2, %v1528_v41, %v8598_v30  ;;  %v8617_v48 = vld [vmem:[#allocation144_spill] sm:$0xff] }
 0x268   : > { %v1452_v26 = vpop.permute.xlu1 %1451  ;;  %v1593_v50 = vsel %vm1565_vm5, %v1560_v57, %v8599_v35  ;;  %v8619_v57 = vld [vmem:[#allocation76_spill] sm:$0xff] }
 0x269   : > { %v1754_v20 = vsel %vm1730_vm10, %v1721_v2, %v1452_v26  ;;  %v1358_v49 = vpop.permute.xlu0 %1357  ;;  %v8600_v2 = vld [vmem:[#allocation143_spill] sm:$0xff] }
 0x26a   : > { %4015 = vmatmul.mubr.msk.f32.gmra.mrb[22].mxu0 %vm1775_vm11, %v1754_v20  ;;  %v1722_v61 = vsel %vm1697_vm9, %v1689_v45, %v1358_v49  ;;  %v1626_v26 = vsel %vm1598_vm6, %v1593_v50, %v8600_v2  ;;  %v8603_v49 = vld [vmem:[#allocation75_spill] sm:$0xff] }
 0x26b   : > { %v1659_v62 = vsel %vm1631_vm7, %v1626_v26, %v8601_v63  ;;  %v1529_v5 = vsel %vm225_vm0, %v8603_v49, %v8602_v51  ;;  %v8621_v63 = vld [vmem:[#allocation11_spill] sm:$0xff]  ;;  %v8623_v49 = vld [vmem:[#allocation166_spill] sm:$0xff] }
 0x26c   : > { %v1264_v42 = vpop.permute.xlu1 %1263 }
 0x26d   : > { %v1454_v28 = vpop.permute.xlu0 %1453  ;;  %v1690_v14 = vsel %vm1664_vm8, %v1657_v15, %v1264_v42  ;;  %v1561_v42 = vsel %vm268_vm2, %v1529_v5, %v8604_v59 }
 0x26e   : > { %v1755_v34 = vsel %vm1730_vm10, %v1722_v61, %v1454_v28  ;;  %v1594_v54 = vsel %vm1565_vm5, %v1561_v42, %v8605_v22  ;;  %v8607_v28 = vld [vmem:[#allocation162_spill] sm:$0xff]  ;;  %v6771_v42 = vld [vmem:[%s8079_s2] ss:$0 sm:$0xff] }
 0x26f   : > { %4017 = vmatprep.mubr.msk.f32.mxu0 %vm1775_vm11, %v1755_v34  ;;  %v1627_v61 = vsel %vm1598_vm6, %v1594_v54, %v8606_v58 }
 0x270   : > { %v1360_v39 = vpop.permute.xlu1 %1359  ;;  %v1660_v47 = vsel %vm1631_vm7, %v1627_v61, %v8607_v28  ;;  %v2320_v61 = vrot.slane %v6654_v55, 7  ;;  %v8163_v28 = vrot.slane %v6652_v38, 7 }
 0x271   : > { %v1266_v24 = vpop.permute.xlu0 %1265  ;;  %v1723_v21 = vsel %vm1697_vm9, %v1690_v14, %v1360_v39  ;;  %v1530_v39 = vsel %vm225_vm0, %v8609_v53, %v8608_v16  ;;  %v8611_v14 = vld [vmem:[#allocation10_spill] sm:$0xff] }
 0x272   : > { %v1691_v1 = vsel %vm1664_vm8, %v1658_v27, %v1266_v24  ;;  %v1562_v15 = vsel %vm268_vm2, %v1530_v39, %v8610_v9  ;;  %v6781_v16 = vsel %vm495_vm1, %v8163_v28, %v2320_v61  ;;  %v2204_v9 = vld [vmem:[#allocation3 + $0x38] sm:$0xff] }
 0x273   : > { %v1595_v37 = vsel %vm1565_vm5, %v1562_v15, %v8611_v14  ;;  %8624 = vst [vmem:[#allocation15_spill] sm:$0xff] %v6781_v16  ;;  %v2445_v14 = vrot.slane %v6652_v38, 1 }
 0x274   : > { %v1456_v33 = vpop.permute.xlu1 %1455 }
 0x275   : > { %v1756_v6 = vsel %vm1730_vm10, %v1723_v21, %v1456_v33  ;;  %v1362_v23 = vpop.permute.xlu0 %1361  ;;  %v1628_v21 = vsel %vm1598_vm6, %v1595_v37, %v8612_v4  ;;  %v8613_v33 = vld [vmem:[#allocation165_spill] sm:$0xff] }
 0x276   : > { %4018 = vmatmul.mubr.msk.f32.gmra.mrb[24].mxu0 %vm1775_vm11, %v1756_v6  ;;  %v1724_v44 = vsel %vm1697_vm9, %v1691_v1, %v1362_v23  ;;  %v1661_v0 = vsel %vm1631_vm7, %v1628_v21, %v8613_v33  ;;  %v2453_v33 = vrot.slane %v2204_v9, 1 }
 0x278   : > { %v1268_v3 = vpop.permute.xlu1 %1267 }
 0x279   : > { %v1458_v36 = vpop.permute.xlu0 %1457  ;;  %v1692_v43 = vsel %vm1664_vm8, %v1659_v62, %v1268_v3  ;;  %v8616_v3 = vld [vmem:[#allocation9_spill] sm:$0xff] }
 0x27a   : > { %v1757_v25 = vsel %vm1730_vm10, %v1724_v44, %v1458_v36  ;;  %v1596_v1 = vsel %vm1565_vm5, %v1563_v8, %v8616_v3  ;;  %v8618_v44 = vld [vmem:[#allocation164_spill] sm:$0xff] }
 0x27b   : > { %4020 = vmatprep.mubr.msk.f32.mxu0 %vm1775_vm11, %v1757_v25  ;;  %v1629_v41 = vsel %vm1598_vm6, %v1596_v1, %v8617_v48  ;;  %v1532_v25 = vsel %vm225_vm0, %v5660_v32, %v8619_v57  ;;  %vm3588_vm0 = vcmask 588800  }
 0x27c   : > { %v1364_v52 = vpop.permute.xlu1 %1363  ;;  %v1662_v40 = vsel %vm1631_vm7, %v1629_v41, %v8618_v44  ;;  %vm7537_vm4 = vmpackc.low %vm3588_vm0, %vm3588_vm0 }
 0x27d   : > { %v1270_v20 = vpop.permute.xlu0 %1269  ;;  %v1725_v13 = vsel %vm1697_vm9, %v1692_v43, %v1364_v52  ;;  %v8620_v52 = vld [vmem:[#allocation108_spill] sm:$0xff]  ;;  %v8622_v43 = vld [vmem:[#allocation146_spill] sm:$0xff] }
 0x27e   : > { %v1693_v34 = vsel %vm1664_vm8, %v1660_v47, %v1270_v20  ;;  %v1564_v2 = vsel %vm268_vm2, %v1532_v25, %v8620_v52 }
 0x27f   : > { %v1597_v62 = vsel %vm1565_vm5, %v1564_v2, %v8621_v63 }
 0x280   : > { %v1460_v18 = vpop.permute.xlu1 %1459  ;;  %v1630_v51 = vsel %vm1598_vm6, %v1597_v62, %v8622_v43 }
 0x281   : > { %v1758_v45 = vsel %vm1730_vm10, %v1725_v13, %v1460_v18  ;;  %v1366_v56 = vpop.permute.xlu0 %1365  ;;  %v1663_v32 = vsel %vm1631_vm7, %v1630_v51, %v8623_v49 }
 0x282   : > { %4021 = vmatmul.mubr.msk.f32.gmra.mrb[26].mxu0 %vm1775_vm11, %v1758_v45  ;;  %v1726_v60 = vsel %vm1697_vm9, %v1693_v34, %v1366_v56 }
 0x284   : > { %v1272_v31 = vpop.permute.xlu1 %1271 }
 0x285   : > { %v1462_v46 = vpop.permute.xlu0 %1461  ;;  %v1694_v6 = vsel %vm1664_vm8, %v1661_v0, %v1272_v31 }
 0x286   : > { %v1759_v24 = vsel %vm1730_vm10, %v1726_v60, %v1462_v46 }
 0x287   : > { %4023 = vmatprep.mubr.msk.f32.mxu0 %vm1775_vm11, %v1759_v24  ;;  %v2446_v24 = vrot.slane %v6654_v55, 1 }
 0x288   : > { %v1368_v17 = vpop.permute.xlu1 %1367 }
 0x289   : > { %v1274_v12 = vpop.permute.xlu0 %1273  ;;  %v1727_v23 = vsel %vm1697_vm9, %v1694_v6, %v1368_v17  ;;  %v2200_v17 = vld [vmem:[#allocation3 + $0x18] sm:$0xff]  ;;  %v6792_v11 = vsel %vm624_vm3, %v2445_v14, %v2446_v24 }
 0x28a   : > { %v1695_v30 = vsel %vm1664_vm8, %v1662_v40, %v1274_v12  ;;  %v2448_v21 = vrot.slane %v2200_v17, 1  ;;  %v2208_v40 = vld [vmem:[#allocation3 + $0x58] sm:$0xff] }
 0x28c   : > { %v1464_v7 = vpop.permute.xlu1 %1463 }
 0x28d   : > { %v1760_v27 = vsel %vm1730_vm10, %v1727_v23, %v1464_v7  ;;  %v1370_v10 = vpop.permute.xlu0 %1369  ;;  %v6795_v23 = vsel %vm624_vm3, %v2446_v24, %v2448_v21 }
 0x28e   : > { %4024 = vmatmul.mubr.msk.f32.gmra.mrb[28].mxu0 %vm1775_vm11, %v1760_v27  ;;  %v1728_v35 = vsel %vm1697_vm9, %v1695_v30, %v1370_v10 }
 0x290   : > { %v1276_v36 = vpop.permute.xlu1 %1275 }
 0x291   : > { %v1466_v50 = vpop.permute.xlu0 %1465  ;;  %v1696_v5 = vsel %vm1664_vm8, %v1663_v32, %v1276_v36 }
 0x292   : > { %v1761_v26 = vsel %vm1730_vm10, %v1728_v35, %v1466_v50  ;;  %v2458_v50 = vrot.slane %v2208_v40, 1 }
 0x293   : > { %4026 = vmatprep.mubr.msk.f32.mxu0 %vm1775_vm11, %v1761_v26 }
 0x294   : > { %v1372_v20 = vpop.permute.xlu1 %1371 }
 0x295   : > { %v1729_v13 = vsel %vm1697_vm9, %v1696_v5, %v1372_v20 }
 0x298   : > { %v1468_v18 = vpop.permute.xlu1 %1467 }
 0x299   : > { %v1762_v59 = vsel %vm1730_vm10, %v1729_v13, %v1468_v18 }
 0x29a   : > { %4027 = vmatmul.mubr.msk.f32.gmra.mrb[30].mxu0 %vm1775_vm11, %v1762_v59 }
 0x2d9   : > { %v3983_v45 = vpop.f32.mrb[0].mxu0 }
 0x2da   : > { %v1948_v22 = vadd.f32 %v3983_v45, %v6771_v42  ;;  %v1942_v54 = vpop.f32.mrb[1].mxu0 }
 0x2db   : > { %v1943_v56 = vadd.f32 %v6771_v42, %v1942_v54 }
 0x2dc   : > { %v2102_v58 = vmul.f32 0.01, %v1948_v22 }
 0x2dd   : > { %v2101_v47 = vmul.f32 0.01, %v1943_v56 }
 0x2de   : > { %v2134_v31 = vmax.f32 %v1948_v22, %v2102_v58  ;;  %v2212_v22 = vld [vmem:[#allocation3 + $0x78] sm:$0xff] }
 0x2df   : > { %v2133_v34 = vmax.f32 %v1943_v56, %v2101_v47  ;;  %v2463_v47 = vrot.slane %v2212_v22, 1 }
 0x2e0   : > { %2166 = vst.msk [vmem:[#allocation3 + $0x30] sm:$0xff] %vm268_vm2, %v2134_v31 }
 0x2e1   : > { %2165 = vst.msk [vmem:[#allocation3 + $0x28] sm:$0xff] %vm268_vm2, %v2133_v34  ;;  %v3986_v53 = vpop.f32.mrb[2].mxu0 }
 0x2e2   : > { %v1958_v39 = vadd.f32 %v3986_v53, %v6771_v42  ;;  %v1952_v60 = vpop.f32.mrb[3].mxu0 }
 0x2e3   : > { %v1953_v46 = vadd.f32 %v6771_v42, %v1952_v60 }
 0x2e4   : > { %v2104_v15 = vmul.f32 0.01, %v1958_v39 }
 0x2e5   : > { %v2103_v37 = vmul.f32 0.01, %v1953_v46 }
 0x2e6   : > { %v2136_v4 = vmax.f32 %v1958_v39, %v2104_v15 }
 0x2e7   : > { %v2135_v0 = vmax.f32 %v1953_v46, %v2103_v37  ;;  %v2203_v12 = vld [vmem:[#allocation3 + $0x30] sm:$0xff] }
 0x2e8   : > { %2168 = vst.msk [vmem:[#allocation3 + $0x50] sm:$0xff] %vm268_vm2, %v2136_v4  ;;  %v6789_v6 = vld [vmem:[#allocation3 + $0x28] sm:$0xff]  ;;  %v2325_v29 = vrot.slane %v2203_v12, 7  ;;  %v2451_v55 = vrot.slane %v2203_v12, 1 }
 0x2e9   : > { %2167 = vst.msk [vmem:[#allocation3 + $0x48] sm:$0xff] %vm268_vm2, %v2135_v0  ;;  %v3989_v7 = vpop.f32.mrb[4].mxu0  ;;  %v6799_v19 = vpack.i.bf16 %v2203_v12, %v6789_v6  ;;  %v8173_v8 = vrot.slane %v6789_v6, 7  ;;  %v2450_v3 = vrot.slane %v6789_v6, 1 }
 0x2ea   : > { %v1968_v1 = vadd.f32 %v3989_v7, %v6771_v42  ;;  %v1962_v10 = vpop.f32.mrb[5].mxu0  ;;  %v2454_v48 = vsel %vm624_vm3, %v2451_v55, %v2453_v33  ;;  %v2216_v33 = vld [vmem:[#allocation3 + $0x98] sm:$0xff] }
 0x2eb   : > { %v1963_v41 = vadd.f32 %v6771_v42, %v1962_v10  ;;  %4113 = vrot.lane.b32.xlu1 %v6799_v19, %s4786_s26  ;;  %v6813_v44 = vsel %vm495_vm1, %v8173_v8, %v2325_v29  ;;  %v2452_v36 = vsel %vm624_vm3, %v2450_v3, %v2451_v55  ;;  %v2468_v3 = vrot.slane %v2216_v33, 1 }
 0x2ec   : > { %v2106_v30 = vmul.f32 0.01, %v1968_v1  ;;  %v6816_v57 = vpack.i.bf16 %v2454_v48, %v2452_v36 }
 0x2ed   : > { %v2105_v25 = vmul.f32 0.01, %v1963_v41 }
 0x2ee   : > { %v2138_v35 = vmax.f32 %v1968_v1, %v2106_v30 }
 0x2ef   : > { %v2137_v52 = vmax.f32 %v1963_v41, %v2105_v25  ;;  %v2207_v2 = vld [vmem:[#allocation3 + $0x50] sm:$0xff] }
 0x2f0   : > { %2170 = vst.msk [vmem:[#allocation3 + $0x70] sm:$0xff] %vm268_vm2, %v2138_v35  ;;  %v6819_v26 = vld [vmem:[#allocation3 + $0x48] sm:$0xff]  ;;  %v2330_v63 = vrot.slane %v2207_v2, 7  ;;  %v2456_v62 = vrot.slane %v2207_v2, 1 }
 0x2f1   : > { %2169 = vst.msk [vmem:[#allocation3 + $0x68] sm:$0xff] %vm268_vm2, %v2137_v52  ;;  %v3992_v20 = vpop.f32.mrb[6].mxu0  ;;  %v6823_v43 = vpack.i.bf16 %v2207_v2, %v6819_v26  ;;  %v8169_v51 = vrot.slane %v6819_v26, 7  ;;  %v2455_v49 = vrot.slane %v6819_v26, 1 }
 0x2f2   : > { %v1978_v32 = vadd.f32 %v3992_v20, %v6771_v42  ;;  %v1972_v5 = vpop.f32.mrb[7].mxu0  ;;  %v2459_v13 = vsel %vm624_vm3, %v2456_v62, %v2458_v50 }
 0x2f3   : > { %v1973_v18 = vadd.f32 %v6771_v42, %v1972_v5  ;;  %4118 = vrot.lane.b32.xlu0 %v6823_v43, %s4786_s26  ;;  %v6835_v59 = vsel %vm495_vm1, %v8169_v51, %v2330_v63  ;;  %v2457_v45 = vsel %vm624_vm3, %v2455_v49, %v2456_v62  ;;  %v2220_v49 = vld [vmem:[#allocation3 + $0xb8] sm:$0xff] }
 0x2f4   : > { %v2108_v54 = vmul.f32 0.01, %v1978_v32  ;;  %v6838_v56 = vpack.i.bf16 %v2459_v13, %v2457_v45  ;;  %v2473_v45 = vrot.slane %v2220_v49, 1 }
 0x2f5   : > { %v2107_v58 = vmul.f32 0.01, %v1973_v18 }
 0x2f6   : > { %v2140_v61 = vmax.f32 %v1978_v32, %v2108_v54 }
 0x2f7   : > { %v2139_v31 = vmax.f32 %v1973_v18, %v2107_v58  ;;  %v2211_v34 = vld [vmem:[#allocation3 + $0x70] sm:$0xff] }
 0x2f8   : > { %2172 = vst.msk [vmem:[#allocation3 + $0x90] sm:$0xff] %vm268_vm2, %v2140_v61  ;;  %v6841_v53 = vld [vmem:[#allocation3 + $0x68] sm:$0xff]  ;;  %v2335_v39 = vrot.slane %v2211_v34, 7  ;;  %v2461_v60 = vrot.slane %v2211_v34, 1 }
 0x2f9   : > { %2171 = vst.msk [vmem:[#allocation3 + $0x88] sm:$0xff] %vm268_vm2, %v2139_v31  ;;  %v3995_v46 = vpop.f32.mrb[8].mxu0  ;;  %v6845_v9 = vpack.i.bf16 %v2211_v34, %v6841_v53  ;;  %v8172_v15 = vrot.slane %v6841_v53, 7  ;;  %v2460_v24 = vrot.slane %v6841_v53, 1 }
 0x2fa   : > { %v1988_v14 = vadd.f32 %v3995_v46, %v6771_v42  ;;  %v1982_v37 = vpop.f32.mrb[9].mxu0  ;;  %v2464_v17 = vsel %vm624_vm3, %v2461_v60, %v2463_v47 }
 0x2fb   : > { %v1983_v4 = vadd.f32 %v6771_v42, %v1982_v37  ;;  %4123 = vrot.lane.b32.xlu1 %v6845_v9, %s4786_s26  ;;  %v6857_v21 = vsel %vm495_vm1, %v8172_v15, %v2335_v39  ;;  %v2462_v0 = vsel %vm624_vm3, %v2460_v24, %v2461_v60 }
 0x2fc   : > { %8625 = vst [vmem:[#allocation5_spill] sm:$0xff] %v6857_v21  ;;  %v2110_v12 = vmul.f32 0.01, %v1988_v14  ;;  %v6860_v29 = vpack.i.bf16 %v2464_v17, %v2462_v0  ;;  %v2224_v17 = vld [vmem:[#allocation3 + $0xd8] sm:$0xff] }
 0x2fd   : > { %v2109_v55 = vmul.f32 0.01, %v1983_v4 }
 0x2fe   : > { %v2142_v7 = vmax.f32 %v1988_v14, %v2110_v12 }
 0x2ff   : > { %v2141_v1 = vmax.f32 %v1983_v4, %v2109_v55  ;;  %v2215_v10 = vld [vmem:[#allocation3 + $0x90] sm:$0xff] }
 0x300   : > { %2174 = vst.msk [vmem:[#allocation3 + $0xb0] sm:$0xff] %vm268_vm2, %v2142_v7  ;;  %v6863_v48 = vld [vmem:[#allocation3 + $0x88] sm:$0xff]  ;;  %v2466_v41 = vrot.slane %v2215_v10, 1  ;;  %v2340_v40 = vrot.slane %v2215_v10, 7 }
 0x301   : > { %2173 = vst.msk [vmem:[#allocation3 + $0xa8] sm:$0xff] %vm268_vm2, %v2141_v1  ;;  %v3998_v36 = vpop.f32.mrb[10].mxu0  ;;  %v6867_v30 = vpack.i.bf16 %v2215_v10, %v6863_v48  ;;  %v2465_v25 = vrot.slane %v6863_v48, 1  ;;  %v8167_v35 = vrot.slane %v6863_v48, 7 }
 0x302   : > { %v1998_v50 = vadd.f32 %v3998_v36, %v6771_v42  ;;  %v1992_v52 = vpop.f32.mrb[11].mxu0  ;;  %v2469_v2 = vsel %vm624_vm3, %v2466_v41, %v2468_v3  ;;  %v2478_v3 = vrot.slane %v2224_v17, 1 }
 0x303   : > { %v1993_v63 = vadd.f32 %v6771_v42, %v1992_v52  ;;  %4128 = vrot.lane.b32.xlu0 %v6867_v30, %s4786_s26  ;;  %v2467_v62 = vsel %vm624_vm3, %v2465_v25, %v2466_v41  ;;  %v6880_v20 = vsel %vm495_vm1, %v8167_v35, %v2340_v40 }
 0x304   : > { %8626 = vst [vmem:[#allocation79_spill] sm:$0xff] %v6880_v20  ;;  %v2112_v32 = vmul.f32 0.01, %v1998_v50  ;;  %v6882_v5 = vpack.i.bf16 %v2469_v2, %v2467_v62 }
 0x305   : > { %v2111_v13 = vmul.f32 0.01, %v1993_v63 }
 0x306   : > { %v2144_v18 = vmax.f32 %v1998_v50, %v2112_v32 }
 0x307   : > { %v2143_v22 = vmax.f32 %v1993_v63, %v2111_v13  ;;  %v2219_v54 = vld [vmem:[#allocation3 + $0xb0] sm:$0xff] }
 0x308   : > { %2176 = vst.msk [vmem:[#allocation3 + $0xd0] sm:$0xff] %vm268_vm2, %v2144_v18  ;;  %v6885_v58 = vld [vmem:[#allocation3 + $0xa8] sm:$0xff]  ;;  %v2345_v61 = vrot.slane %v2219_v54, 7  ;;  %v2471_v47 = vrot.slane %v2219_v54, 1  ;;  %v2228_v18 = vld [vmem:[#allocation3 + $0xf8] sm:$0xff] }
 0x309   : > { %2175 = vst.msk [vmem:[#allocation3 + $0xc8] sm:$0xff] %vm268_vm2, %v2143_v22  ;;  %v4001_v31 = vpop.f32.mrb[12].mxu0  ;;  %v6889_v34 = vpack.i.bf16 %v2219_v54, %v6885_v58  ;;  %v8171_v39 = vrot.slane %v6885_v58, 7  ;;  %v2470_v60 = vrot.slane %v6885_v58, 1 }
 0x30a   : > { %v2008_v46 = vadd.f32 %v4001_v31, %v6771_v42  ;;  %v2002_v24 = vpop.f32.mrb[13].mxu0  ;;  %v2474_v14 = vsel %vm624_vm3, %v2471_v47, %v2473_v45  ;;  %v2483_v31 = vrot.slane %v2228_v18, 1 }
 0x30b   : > { %8627 = vst [vmem:[#allocation17_spill] sm:$0xff] %v6889_v34  ;;  %v2003_v37 = vadd.f32 %v6771_v42, %v2002_v24  ;;  %4133 = vrot.lane.b32.xlu1 %v6889_v34, %s4786_s26  ;;  %v6901_v4 = vsel %vm495_vm1, %v8171_v39, %v2345_v61  ;;  %v2472_v33 = vsel %vm624_vm3, %v2470_v60, %v2471_v47 }
 0x30c   : > { %8628 = vst [vmem:[#allocation23_spill] sm:$0xff] %v6901_v4  ;;  %v2114_v0 = vmul.f32 0.01, %v2008_v46  ;;  %v6904_v12 = vpack.i.bf16 %v2474_v14, %v2472_v33 }
 0x30d   : > { %v2113_v55 = vmul.f32 0.01, %v2003_v37 }
 0x30e   : > { %v2146_v7 = vmax.f32 %v2008_v46, %v2114_v0 }
 0x30f   : > { %v2145_v1 = vmax.f32 %v2003_v37, %v2113_v55  ;;  %v2223_v10 = vld [vmem:[#allocation3 + $0xd0] sm:$0xff] }
 0x310   : > { %2178 = vst.msk [vmem:[#allocation3 + $0xf0] sm:$0xff] %vm268_vm2, %v2146_v7  ;;  %v6907_v41 = vld [vmem:[#allocation3 + $0xc8] sm:$0xff]  ;;  %v2476_v40 = vrot.slane %v2223_v10, 1  ;;  %v2350_v36 = vrot.slane %v2223_v10, 7 }
 0x311   : > { %2177 = vst.msk [vmem:[#allocation3 + $0xe8] sm:$0xff] %vm268_vm2, %v2145_v1  ;;  %v4004_v25 = vpop.f32.mrb[14].mxu0  ;;  %v6911_v50 = vpack.i.bf16 %v2223_v10, %v6907_v41  ;;  %v2475_v52 = vrot.slane %v6907_v41, 1  ;;  %v8165_v2 = vrot.slane %v6907_v41, 7 }
 0x312   : > { %v2018_v63 = vadd.f32 %v4004_v25, %v6771_v42  ;;  %v2012_v62 = vpop.f32.mrb[15].mxu0  ;;  %v2479_v49 = vsel %vm624_vm3, %v2476_v40, %v2478_v3 }
 0x313   : > { %8629 = vst [vmem:[#allocation78_spill] sm:$0xff] %v6911_v50  ;;  %v2013_v32 = vadd.f32 %v6771_v42, %v2012_v62  ;;  %4138 = vrot.lane.b32.xlu0 %v6911_v50, %s4786_s26  ;;  %v2477_v13 = vsel %vm624_vm3, %v2475_v52, %v2476_v40  ;;  %v6924_v45 = vsel %vm495_vm1, %v8165_v2, %v2350_v36  ;;  %v2232_v40 = vld [vmem:[#allocation3 + $0x118] sm:$0xff] }
 0x314   : > { %8630 = vst [vmem:[#allocation21_spill] sm:$0xff] %v6924_v45  ;;  %v2116_v22 = vmul.f32 0.01, %v2018_v63  ;;  %v6926_v54 = vpack.i.bf16 %v2479_v49, %v2477_v13 }
 0x315   : > { %v2115_v61 = vmul.f32 0.01, %v2013_v32 }
 0x316   : > { %v2148_v47 = vmax.f32 %v2018_v63, %v2116_v22 }
 0x317   : > { %v2147_v60 = vmax.f32 %v2013_v32, %v2115_v61  ;;  %v2227_v46 = vld [vmem:[#allocation3 + $0xf0] sm:$0xff]  ;;  %v2488_v32 = vrot.slane %v2232_v40, 1 }
 0x318   : > { %2180 = vst.msk [vmem:[#allocation3 + $0x110] sm:$0xff] %vm268_vm2, %v2148_v47  ;;  %v6929_v24 = vld [vmem:[#allocation3 + $0xe8] sm:$0xff]  ;;  %v2481_v14 = vrot.slane %v2227_v46, 1  ;;  %v2355_v37 = vrot.slane %v2227_v46, 7 }
 0x319   : > { %2179 = vst.msk [vmem:[#allocation3 + $0x108] sm:$0xff] %vm268_vm2, %v2147_v60  ;;  %v4007_v17 = vpop.f32.mrb[16].mxu0  ;;  %v6933_v33 = vpack.i.bf16 %v2227_v46, %v6929_v24  ;;  %v2480_v0 = vrot.slane %v6929_v24, 1  ;;  %v8168_v55 = vrot.slane %v6929_v24, 7 }
 0x31a   : > { %v2028_v7 = vadd.f32 %v4007_v17, %v6771_v42  ;;  %v2022_v3 = vpop.f32.mrb[17].mxu0  ;;  %v2484_v1 = vsel %vm624_vm3, %v2481_v14, %v2483_v31  ;;  %v2236_v17 = vld [vmem:[#allocation3 + $0x138] sm:$0xff] }
 0x31b   : > { %8631 = vst [vmem:[#allocation29_spill] sm:$0xff] %v6933_v33  ;;  %v2023_v10 = vadd.f32 %v6771_v42, %v2022_v3  ;;  %4143 = vrot.lane.b32.xlu1 %v6933_v33, %s4786_s26  ;;  %v2482_v36 = vsel %vm624_vm3, %v2480_v0, %v2481_v14  ;;  %v6946_v25 = vsel %vm495_vm1, %v8168_v55, %v2355_v37  ;;  %v2493_v40 = vrot.slane %v2236_v17, 1 }
 0x31c   : > { %8632 = vst [vmem:[#allocation83_spill] sm:$0xff] %v6946_v25  ;;  %v2118_v52 = vmul.f32 0.01, %v2028_v7  ;;  %v6948_v63 = vpack.i.bf16 %v2484_v1, %v2482_v36 }
 0x31d   : > { %v2117_v62 = vmul.f32 0.01, %v2023_v10 }
 0x31e   : > { %v2150_v49 = vmax.f32 %v2028_v7, %v2118_v52 }
 0x31f   : > { %v2149_v13 = vmax.f32 %v2023_v10, %v2117_v62  ;;  %v2231_v18 = vld [vmem:[#allocation3 + $0x110] sm:$0xff] }
 0x320   : > { %2182 = vst.msk [vmem:[#allocation3 + $0x130] sm:$0xff] %vm268_vm2, %v2150_v49  ;;  %v6951_v22 = vld [vmem:[#allocation3 + $0x108] sm:$0xff]  ;;  %v2486_v61 = vrot.slane %v2231_v18, 1  ;;  %v2360_v47 = vrot.slane %v2231_v18, 7 }
 0x321   : > { %2181 = vst.msk [vmem:[#allocation3 + $0x128] sm:$0xff] %vm268_vm2, %v2149_v13  ;;  %v6955_v31 = vpack.i.bf16 %v2231_v18, %v6951_v22  ;;  %v2485_v60 = vrot.slane %v6951_v22, 1  ;;  %v8164_v46 = vrot.slane %v6951_v22, 7 }
 0x322   : > { %v2489_v14 = vsel %vm624_vm3, %v2486_v61, %v2488_v32 }
 0x323   : > { %8633 = vst [vmem:[#allocation19_spill] sm:$0xff] %v6955_v31  ;;  %4148 = vrot.lane.b32.xlu0 %v6955_v31, %s4786_s26  ;;  %v2487_v37 = vsel %vm624_vm3, %v2485_v60, %v2486_v61  ;;  %v6966_v0 = vsel %vm495_vm1, %v8164_v46, %v2360_v47 }
 0x324   : > { %v6968_v7 = vpack.i.bf16 %v2489_v14, %v2487_v37 }
 0x325   : > { %v4010_v3 = vpop.f32.mrb[18].mxu0 }
 0x326   : > { %v2038_v1 = vadd.f32 %v4010_v3, %v6771_v42  ;;  %v2032_v10 = vpop.f32.mrb[19].mxu0 }
 0x327   : > { %v2033_v36 = vadd.f32 %v6771_v42, %v2032_v10  ;;  %v2235_v52 = vld [vmem:[#allocation3 + $0x130] sm:$0xff] }
 0x328   : > { %v2120_v62 = vmul.f32 0.01, %v2038_v1  ;;  %v6972_v49 = vld [vmem:[#allocation3 + $0x128] sm:$0xff]  ;;  %v2491_v32 = vrot.slane %v2235_v52, 1  ;;  %v2365_v13 = vrot.slane %v2235_v52, 7 }
 0x329   : > { %v2119_v18 = vmul.f32 0.01, %v2033_v36  ;;  %v6975_v61 = vpack.i.bf16 %v2235_v52, %v6972_v49  ;;  %v2490_v47 = vrot.slane %v6972_v49, 1  ;;  %v8166_v60 = vrot.slane %v6972_v49, 7 }
 0x32a   : > { %v2152_v14 = vmax.f32 %v2038_v1, %v2120_v62  ;;  %v2494_v37 = vsel %vm624_vm3, %v2491_v32, %v2493_v40  ;;  %v2240_v1 = vld [vmem:[#allocation3 + $0x158] sm:$0xff] }
 0x32b   : > { %v2151_v17 = vmax.f32 %v2033_v36, %v2119_v18  ;;  %4153 = vrot.lane.b32.xlu1 %v6975_v61, %s4786_s26  ;;  %v2492_v3 = vsel %vm624_vm3, %v2490_v47, %v2491_v32  ;;  %v6986_v10 = vsel %vm495_vm1, %v8166_v60, %v2365_v13  ;;  %v2498_v18 = vrot.slane %v2240_v1, 1 }
 0x32c   : > { %2184 = vst.msk [vmem:[#allocation3 + $0x150] sm:$0xff] %vm268_vm2, %v2152_v14  ;;  %v6989_v52 = vpack.i.bf16 %v2494_v37, %v2492_v3 }
 0x32d   : > { %2183 = vst.msk [vmem:[#allocation3 + $0x148] sm:$0xff] %vm268_vm2, %v2151_v17 }
 0x331   : > { %v4013_v62 = vpop.f32.mrb[20].mxu0 }
 0x332   : > { %v2048_v40 = vadd.f32 %v4013_v62, %v6771_v42  ;;  %v2042_v36 = vpop.f32.mrb[21].mxu0 }
 0x333   : > { %v2043_v28 = vadd.f32 %v6771_v42, %v2042_v36  ;;  %v2239_v32 = vld [vmem:[#allocation3 + $0x150] sm:$0xff] }
 0x334   : > { %v2122_v47 = vmul.f32 0.01, %v2048_v40  ;;  %v6994_v46 = vld [vmem:[#allocation3 + $0x148] sm:$0xff]  ;;  %v2496_v13 = vrot.slane %v2239_v32, 1  ;;  %v2370_v2 = vrot.slane %v2239_v32, 7 }
 0x335   : > { %v2121_v60 = vmul.f32 0.01, %v2043_v28  ;;  %v6997_v14 = vpack.i.bf16 %v2239_v32, %v6994_v46  ;;  %v2495_v37 = vrot.slane %v6994_v46, 1  ;;  %v8170_v17 = vrot.slane %v6994_v46, 7 }
 0x336   : > { %v2154_v3 = vmax.f32 %v2048_v40, %v2122_v47  ;;  %v2499_v62 = vsel %vm624_vm3, %v2496_v13, %v2498_v18  ;;  %v2244_v40 = vld [vmem:[#allocation3 + $0x178] sm:$0xff] }
 0x337   : > { %v2153_v1 = vmax.f32 %v2043_v28, %v2121_v60  ;;  %4158 = vrot.lane.b32.xlu0 %v6997_v14, %s4786_s26  ;;  %v2497_v36 = vsel %vm624_vm3, %v2495_v37, %v2496_v13  ;;  %v7008_v35 = vsel %vm495_vm1, %v8170_v17, %v2370_v2  ;;  %v2503_v18 = vrot.slane %v2244_v40, 1 }
 0x338   : > { %2186 = vst.msk [vmem:[#allocation3 + $0x170] sm:$0xff] %vm268_vm2, %v2154_v3  ;;  %v7011_v32 = vpack.i.bf16 %v2499_v62, %v2497_v36 }
 0x339   : > { %2185 = vst.msk [vmem:[#allocation3 + $0x168] sm:$0xff] %vm268_vm2, %v2153_v1 }
 0x33d   : > { %v4016_v47 = vpop.f32.mrb[22].mxu0 }
 0x33e   : > { %v2058_v28 = vadd.f32 %v4016_v47, %v6771_v42  ;;  %v2052_v60 = vpop.f32.mrb[23].mxu0 }
 0x33f   : > { %v2053_v55 = vadd.f32 %v6771_v42, %v2052_v60  ;;  %v2243_v13 = vld [vmem:[#allocation3 + $0x170] sm:$0xff] }
 0x340   : > { %v2124_v37 = vmul.f32 0.01, %v2058_v28  ;;  %v7016_v51 = vld [vmem:[#allocation3 + $0x168] sm:$0xff]  ;;  %v2501_v2 = vrot.slane %v2243_v13, 1  ;;  %v2375_v17 = vrot.slane %v2243_v13, 7 }
 0x341   : > { %v2123_v39 = vmul.f32 0.01, %v2053_v55  ;;  %v7019_v3 = vpack.i.bf16 %v2243_v13, %v7016_v51  ;;  %v2500_v62 = vrot.slane %v7016_v51, 1  ;;  %v8174_v1 = vrot.slane %v7016_v51, 7 }
 0x342   : > { %v2156_v36 = vmax.f32 %v2058_v28, %v2124_v37  ;;  %v2504_v47 = vsel %vm624_vm3, %v2501_v2, %v2503_v18  ;;  %v2248_v28 = vld [vmem:[#allocation3 + $0x198] sm:$0xff] }
 0x343   : > { %v2155_v40 = vmax.f32 %v2053_v55, %v2123_v39  ;;  %4163 = vrot.lane.b32.xlu1 %v7019_v3, %s4786_s26  ;;  %v2502_v60 = vsel %vm624_vm3, %v2500_v62, %v2501_v2  ;;  %v7030_v15 = vsel %vm495_vm1, %v8174_v1, %v2375_v17  ;;  %v2508_v18 = vrot.slane %v2248_v28, 1 }
 0x344   : > { %2188 = vst.msk [vmem:[#allocation3 + $0x190] sm:$0xff] %vm268_vm2, %v2156_v36  ;;  %v7033_v13 = vpack.i.bf16 %v2504_v47, %v2502_v60 }
 0x345   : > { %2187 = vst.msk [vmem:[#allocation3 + $0x188] sm:$0xff] %vm268_vm2, %v2155_v40 }
 0x349   : > { %v4019_v37 = vpop.f32.mrb[24].mxu0 }
 0x34a   : > { %v2068_v39 = vadd.f32 %v4019_v37, %v6771_v42  ;;  %v2062_v55 = vpop.f32.mrb[25].mxu0 }
 0x34b   : > { %v2063_v8 = vadd.f32 %v6771_v42, %v2062_v55  ;;  %v2247_v2 = vld [vmem:[#allocation3 + $0x190] sm:$0xff] }
 0x34c   : > { %v2126_v62 = vmul.f32 0.01, %v2068_v39  ;;  %v7038_v27 = vld [vmem:[#allocation3 + $0x188] sm:$0xff]  ;;  %v2506_v17 = vrot.slane %v2247_v2, 1  ;;  %v2380_v1 = vrot.slane %v2247_v2, 7 }
 0x34d   : > { %v2125_v31 = vmul.f32 0.01, %v2063_v8  ;;  %v7041_v36 = vpack.i.bf16 %v2247_v2, %v7038_v27  ;;  %v2505_v47 = vrot.slane %v7038_v27, 1  ;;  %v8180_v40 = vrot.slane %v7038_v27, 7 }
 0x34e   : > { %v2158_v60 = vmax.f32 %v2068_v39, %v2126_v62  ;;  %v2509_v37 = vsel %vm624_vm3, %v2506_v17, %v2508_v18  ;;  %v2252_v39 = vld [vmem:[#allocation3 + $0x1b8] sm:$0xff] }
 0x34f   : > { %8634 = vst [vmem:[#allocation82_spill] sm:$0xff] %v7041_v36  ;;  %v2157_v28 = vmax.f32 %v2063_v8, %v2125_v31  ;;  %4168 = vrot.lane.b32.xlu0 %v7041_v36, %s4786_s26  ;;  %v2507_v55 = vsel %vm624_vm3, %v2505_v47, %v2506_v17  ;;  %v7052_v33 = vsel %vm495_vm1, %v8180_v40, %v2380_v1  ;;  %v2513_v18 = vrot.slane %v2252_v39, 1 }
 0x350   : > { %8635 = vst [vmem:[#allocation25_spill] sm:$0xff] %v7052_v33  ;;  %2190 = vst.msk [vmem:[#allocation3 + $0x1b0] sm:$0xff] %vm268_vm2, %v2158_v60  ;;  %v7055_v2 = vpack.i.bf16 %v2509_v37, %v2507_v55 }
 0x351   : > { %2189 = vst.msk [vmem:[#allocation3 + $0x1a8] sm:$0xff] %vm268_vm2, %v2157_v28 }
 0x355   : > { %v4022_v62 = vpop.f32.mrb[26].mxu0 }
 0x356   : > { %v2078_v8 = vadd.f32 %v4022_v62, %v6771_v42  ;;  %v2072_v31 = vpop.f32.mrb[27].mxu0 }
 0x357   : > { %v2073_v16 = vadd.f32 %v6771_v42, %v2072_v31  ;;  %v2251_v17 = vld [vmem:[#allocation3 + $0x1b0] sm:$0xff] }
 0x358   : > { %v2128_v47 = vmul.f32 0.01, %v2078_v8  ;;  %v7060_v38 = vld [vmem:[#allocation3 + $0x1a8] sm:$0xff]  ;;  %v2511_v1 = vrot.slane %v2251_v17, 1  ;;  %v2385_v40 = vrot.slane %v2251_v17, 7 }
 0x359   : > { %8636 = vst [vmem:[#allocation22_spill] sm:$0xff] %v7060_v38  ;;  %v2127_v50 = vmul.f32 0.01, %v2073_v16  ;;  %v7063_v60 = vpack.i.bf16 %v2251_v17, %v7060_v38  ;;  %v2510_v37 = vrot.slane %v7060_v38, 1  ;;  %v8188_v28 = vrot.slane %v7060_v38, 7 }
 0x35a   : > { %v2160_v55 = vmax.f32 %v2078_v8, %v2128_v47  ;;  %v2514_v62 = vsel %vm624_vm3, %v2511_v1, %v2513_v18  ;;  %v2256_v8 = vld [vmem:[#allocation3 + $0x1d8] sm:$0xff] }
 0x35b   : > { %8637 = vst [vmem:[#allocation14_spill] sm:$0xff] %v7063_v60  ;;  %v2159_v39 = vmax.f32 %v2073_v16, %v2127_v50  ;;  %4173 = vrot.lane.b32.xlu1 %v7063_v60, %s4786_s26  ;;  %v2512_v31 = vsel %vm624_vm3, %v2510_v37, %v2511_v1  ;;  %v7074_v34 = vsel %vm495_vm1, %v8188_v28, %v2385_v40  ;;  %v2518_v18 = vrot.slane %v2256_v8, 1 }
 0x35c   : > { %8638 = vst [vmem:[#allocation13_spill] sm:$0xff] %v7074_v34  ;;  %2192 = vst.msk [vmem:[#allocation3 + $0x1d0] sm:$0xff] %vm268_vm2, %v2160_v55  ;;  %v7077_v17 = vpack.i.bf16 %v2514_v62, %v2512_v31 }
 0x35d   : > { %2191 = vst.msk [vmem:[#allocation3 + $0x1c8] sm:$0xff] %vm268_vm2, %v2159_v39 }
 0x361   : > { %v4025_v47 = vpop.f32.mrb[28].mxu0 }
 0x362   : > { %v2088_v16 = vadd.f32 %v4025_v47, %v6771_v42  ;;  %v2082_v50 = vpop.f32.mrb[29].mxu0 }
 0x363   : > { %v2083_v60 = vadd.f32 %v6771_v42, %v2082_v50  ;;  %v2255_v1 = vld [vmem:[#allocation3 + $0x1d0] sm:$0xff] }
 0x364   : > { %v2130_v37 = vmul.f32 0.01, %v2088_v16  ;;  %v7082_v38 = vld [vmem:[#allocation3 + $0x1c8] sm:$0xff]  ;;  %v2516_v40 = vrot.slane %v2255_v1, 1  ;;  %v2390_v28 = vrot.slane %v2255_v1, 7 }
 0x365   : > { %v2129_v34 = vmul.f32 0.01, %v2083_v60  ;;  %v7085_v55 = vpack.i.bf16 %v2255_v1, %v7082_v38  ;;  %v2515_v62 = vrot.slane %v7082_v38, 1  ;;  %v8192_v39 = vrot.slane %v7082_v38, 7 }
 0x366   : > { %v2162_v31 = vmax.f32 %v2088_v16, %v2130_v37  ;;  %v2519_v47 = vsel %vm624_vm3, %v2516_v40, %v2518_v18 }
 0x367   : > { %8639 = vst [vmem:[#allocation28_spill] sm:$0xff] %v7085_v55  ;;  %v2161_v8 = vmax.f32 %v2083_v60, %v2129_v34  ;;  %4178 = vrot.lane.b32.xlu0 %v7085_v55, %s4786_s26  ;;  %v2517_v50 = vsel %vm624_vm3, %v2515_v62, %v2516_v40  ;;  %v7096_v36 = vsel %vm495_vm1, %v8192_v39, %v2390_v28  ;;  %v2260_v60 = vld [vmem:[#allocation3 + $0x1f8] sm:$0xff] }
 0x368   : > { %8640 = vst [vmem:[#allocation37_spill] sm:$0xff] %v7096_v36  ;;  %2194 = vst.msk [vmem:[#allocation3 + $0x1f0] sm:$0xff] %vm268_vm2, %v2162_v31  ;;  %v7100_v1 = vpack.i.bf16 %v2519_v47, %v2517_v50  ;;  %v8641_v34 = vpack.i.bf16 %v6795_v23, %v6792_v11  ;;  %v2523_v40 = vrot.slane %v2260_v60, 1 }
 0x369   : > { %2193 = vst.msk [vmem:[#allocation3 + $0x1e8] sm:$0xff] %vm268_vm2, %v2161_v8 }
 0x36b   : > { %4188 = vrot.lane.b32.xlu0 %v8641_v34, %s4788_s28 }
 0x36d   : > { %v4028_v16 = vpop.f32.mrb[30].mxu0 }
 0x36e   : > { %v2098_v18 = vadd.f32 %v4028_v16, %v6771_v42  ;;  %v2092_v37 = vpop.f32.mrb[31].mxu0 }
 0x36f   : > { %v2093_v28 = vadd.f32 %v6771_v42, %v2092_v37  ;;  %4198 = vrot.lane.b32.xlu0 %v6838_v56, %s4788_s28  ;;  %v2259_v62 = vld [vmem:[#allocation3 + $0x1f0] sm:$0xff] }
 0x370   : > { %v2132_v31 = vmul.f32 0.01, %v2098_v18  ;;  %v7110_v47 = vld [vmem:[#allocation3 + $0x1e8] sm:$0xff]  ;;  %v2521_v8 = vrot.slane %v2259_v62, 1  ;;  %v2395_v42 = vrot.slane %v2259_v62, 7 }
 0x371   : > { %v2131_v50 = vmul.f32 0.01, %v2093_v28  ;;  %v7113_v11 = vpack.i.bf16 %v2259_v62, %v7110_v47  ;;  %v2520_v23 = vrot.slane %v7110_v47, 1  ;;  %v8195_v34 = vrot.slane %v7110_v47, 7 }
 0x372   : > { %v2164_v16 = vmax.f32 %v2098_v18, %v2132_v31  ;;  %v2524_v60 = vsel %vm624_vm3, %v2521_v8, %v2523_v40  ;;  %v2201_v40 = vld [vmem:[#allocation3 + $0x20] sm:$0xff]  ;;  %v8643_v62 = vrot.slane %v6789_v6, 7 }
 0x373   : > { %v2163_v37 = vmax.f32 %v2093_v28, %v2131_v50  ;;  %4183 = vrot.lane.b32.xlu1 %v7113_v11, %s4786_s26  ;;  %4208 = vrot.lane.b32.xlu0 %v6882_v5, %s4788_s28  ;;  %v2522_v39 = vsel %vm624_vm3, %v2520_v23, %v2521_v8  ;;  %v7127_v55 = vsel %vm495_vm1, %v8195_v34, %v2395_v42  ;;  %v2209_v28 = vld [vmem:[#allocation3 + $0x60] sm:$0xff] }
 0x374   : > { %2196 = vst.msk [vmem:[#allocation3 + $0x210] sm:$0xff] %vm268_vm2, %v2164_v16  ;;  %8642 = vst [vmem:[#allocation80_spill] sm:$0xff] %v7127_v55  ;;  %v7129_v18 = vpack.i.bf16 %v2524_v60, %v2522_v39  ;;  %v2322_v39 = vrot.slane %v2201_v40, 7  ;;  %v2332_v8 = vrot.slane %v2209_v28, 7  ;;  %v2217_v50 = vld [vmem:[#allocation3 + $0xa0] sm:$0xff]  ;;  %v8644_v16 = vrot.slane %v6841_v53, 7 }
 0x375   : > { %2195 = vst.msk [vmem:[#allocation3 + $0x208] sm:$0xff] %vm268_vm2, %v2163_v37  ;;  %v2342_v6 = vrot.slane %v2217_v50, 7  ;;  %v2205_v42 = vld [vmem:[#allocation3 + $0x40] sm:$0xff]  ;;  %v8646_v28 = vrot.slane %v6885_v58, 7 }
 0x376   : > { %v7151_v31 = vsel %vm495_vm1, %v2322_v39, %v8643_v62  ;;  %v7162_v60 = vsel %vm495_vm1, %v2332_v8, %v8644_v16  ;;  %v2225_v37 = vld [vmem:[#allocation3 + $0xe0] sm:$0xff]  ;;  %v2327_v39 = vrot.slane %v2205_v42, 7  ;;  %v8648_v16 = vrot.slane %v6819_v26, 7 }
 0x377   : > { %4193 = vrot.lane.b32.xlu1 %v6816_v57, %s4788_s28  ;;  %4218 = vrot.lane.b32.xlu0 %v6926_v54, %s4788_s28  ;;  %v4267_v23 = vpack.i.bf16 %v6813_v44, %v7151_v31  ;;  %8645 = vst [vmem:[#allocation85_spill] sm:$0xff] %v7162_v60  ;;  %v7169_v40 = vpack.i.bf16 %v6857_v21, %v7162_v60  ;;  %v2352_v62 = vrot.slane %v2225_v37, 7  ;;  %v2213_v8 = vld [vmem:[#allocation3 + $0x80] sm:$0xff]  ;;  %v8649_v42 = vrot.slane %v6929_v24, 7 }
 0x378   : > { %v7174_v53 = vsel %vm495_vm1, %v2342_v6, %v8646_v28  ;;  %v2233_v50 = vld [vmem:[#allocation3 + $0x120] sm:$0xff]  ;;  %v7187_v58 = vsel %vm495_vm1, %v2327_v39, %v8648_v16  ;;  %v2337_v6 = vrot.slane %v2213_v8, 7  ;;  %v8651_v24 = vrot.slane %v6863_v48, 7 }
 0x379   : > { %8647 = vst [vmem:[#allocation26_spill] sm:$0xff] %v7174_v53  ;;  %v7192_v37 = vsel %vm495_vm1, %v2352_v62, %v8649_v42  ;;  %v2362_v28 = vrot.slane %v2233_v50, 7  ;;  %v2221_v34 = vld [vmem:[#allocation3 + $0xc0] sm:$0xff]  ;;  %v4272_v39 = vpack.i.bf16 %v6835_v59, %v7187_v58  ;;  %v8653_v50 = vrot.slane %v6972_v49, 7 }
 0x37a   : > { %8650 = vst [vmem:[#allocation35_spill] sm:$0xff] %v7192_v37  ;;  %v7200_v26 = vpack.i.bf16 %v6946_v25, %v7192_v37  ;;  %v7207_v62 = vsel %vm495_vm1, %v2337_v6, %v8651_v24  ;;  %v2347_v8 = vrot.slane %v2221_v34, 7  ;;  %v2229_v42 = vld [vmem:[#allocation3 + $0x100] sm:$0xff]  ;;  %v8654_v34 = vrot.slane %v6907_v41, 7 }
 0x37b   : > { %4203 = vrot.lane.b32.xlu1 %v6860_v29, %s4788_s28  ;;  %4228 = vrot.lane.b32.xlu0 %v6968_v7, %s4788_s28  ;;  %8652 = vst [vmem:[#allocation110_spill] sm:$0xff] %v7207_v62  ;;  %v7212_v16 = vsel %vm495_vm1, %v2362_v28, %v8653_v50  ;;  %v4282_v48 = vpack.i.bf16 %v6880_v20, %v7207_v62  ;;  %v2357_v6 = vrot.slane %v2229_v42, 7  ;;  %v2237_v28 = vld [vmem:[#allocation3 + $0x140] sm:$0xff]  ;;  %v8656_v50 = vrot.slane %v6951_v22, 7 }
 0x37c   : > { %v7219_v37 = vpack.i.bf16 %v6986_v10, %v7212_v16  ;;  %v7226_v49 = vsel %vm495_vm1, %v2347_v8, %v8654_v34  ;;  %v2367_v41 = vrot.slane %v2237_v28, 7  ;;  %v8657_v42 = vrot.slane %v6994_v46, 7  ;;  %v2241_v46 = vld [vmem:[#allocation3 + $0x160] sm:$0xff] }
 0x37d   : > { %8655 = vst [vmem:[#allocation84_spill] sm:$0xff] %v7226_v49  ;;  %v7233_v24 = vpack.i.bf16 %v6924_v45, %v7226_v49  ;;  %v7238_v25 = vsel %vm495_vm1, %v2357_v6, %v8656_v50  ;;  %v2372_v6 = vrot.slane %v2241_v46, 7  ;;  %v8658_v28 = vrot.slane %v7016_v51, 7  ;;  %v8671_v49 = vld [vmem:[#allocation22_spill] sm:$0xff] }
 0x37e   : > { %v7246_v8 = vpack.i.bf16 %v6966_v0, %v7238_v25  ;;  %v7251_v34 = vsel %vm495_vm1, %v2367_v41, %v8657_v42  ;;  %v2245_v41 = vld [vmem:[#allocation3 + $0x180] sm:$0xff]  ;;  %v8672_v45 = vrot.slane %v8671_v49, 7 }
 0x37f   : > { %4213 = vrot.lane.b32.xlu1 %v6904_v12, %s4788_s28  ;;  %4238 = vrot.lane.b32.xlu0 %v7011_v32, %s4788_s28  ;;  %v4337_v22 = vpack.i.bf16 %v7008_v35, %v7251_v34  ;;  %v7275_v50 = vsel %vm495_vm1, %v2372_v6, %v8658_v28  ;;  %v8666_v6 = vrot.slane %v7038_v27, 7 }
 0x380   : > { %8659 = vst [vmem:[#allocation20_spill] sm:$0xff] %v7275_v50 }
 0x383   : > { %4223 = vrot.lane.b32.xlu1 %v6948_v63, %s4788_s28  ;;  %4248 = vrot.lane.b32.xlu0 %v7055_v2, %s4788_s28 }
 0x387   : > { %4233 = vrot.lane.b32.xlu1 %v6989_v52, %s4788_s28  ;;  %4258 = vrot.lane.b32.xlu0 %v7100_v1, %s4788_s28 }
 0x38b   : > { %4243 = vrot.lane.b32.xlu1 %v7033_v13, %s4788_s28  ;;  %4268 = vrot.lane.b32.xlu0 %v4267_v23, %s4790_s30  ;;  %v7182_v23 = vpack.i.bf16 %v6901_v4, %v7174_v53 }
 0x38f   : > { %4253 = vrot.lane.b32.xlu1 %v7077_v17, %s4788_s28  ;;  %4278 = vrot.lane.b32.xlu0 %v7169_v40, %s4790_s30 }
 0x393   : > { %4263 = vrot.lane.b32.xlu1 %v7129_v18, %s4788_s28  ;;  %4288 = vrot.lane.b32.xlu0 %v7182_v23, %s4790_s30 }
 0x397   : > { %4298 = vrot.lane.b32.xlu0 %v7200_v26, %s4790_s30  ;;  %4273 = vrot.lane.b32.xlu1 %v4272_v39, %s4790_s30 }
 0x39b   : > { %4308 = vrot.lane.b32.xlu0 %v7219_v37, %s4790_s30  ;;  %4283 = vrot.lane.b32.xlu1 %v4282_v48, %s4790_s30 }
 0x39f   : > { %4318 = vrot.lane.b32.xlu0 %v6975_v61, %s4792_s17  ;;  %4293 = vrot.lane.b32.xlu1 %v7233_v24, %s4790_s30 }
 0x3a3   : > { %4328 = vrot.lane.b32.xlu0 %v6989_v52, %s4793_s22  ;;  %4303 = vrot.lane.b32.xlu1 %v7246_v8, %s4790_s30 }
 0x3a7   : > { %4338 = vrot.lane.b32.xlu0 %v4337_v22, %s4794_s23  ;;  %4313 = vrot.lane.b32.xlu1 %v4337_v22, %s4790_s30  ;;  %v2377_v22 = vrot.slane %v2245_v41, 7 }
 0x3a9   : > { %v7333_v28 = vsel %vm495_vm1, %v2377_v22, %v8666_v6 }
 0x3aa   : > { %8667 = vst [vmem:[#allocation30_spill] sm:$0xff] %v7333_v28 }
 0x3ab   : > { %4348 = vrot.lane.b32.xlu0 %v6997_v14, %s4795_s24  ;;  %4323 = vrot.lane.b32.xlu1 %v6799_v19, %s4792_s17  ;;  %v4387_v19 = vpack.i.bf16 %v7030_v15, %v7275_v50 }
 0x3af   : > { %4358 = vrot.lane.b32.xlu0 %v7011_v32, %s4796_s25  ;;  %4333 = vrot.lane.b32.xlu1 %v6816_v57, %s4793_s22  ;;  %v7283_v57 = vpop.permute.xlu0 %4108 }
 0x3b3   : > { %4368 = vrot.lane.b32.xlu0 %v6997_v14, %s4792_s17  ;;  %4343 = vrot.lane.b32.xlu1 %v4272_v39, %s4794_s23  ;;  %v7292_v51 = vpop.permute.xlu0 %4118 }
 0x3b7   : > { %4378 = vrot.lane.b32.xlu0 %v7011_v32, %s4793_s22  ;;  %4353 = vrot.lane.b32.xlu1 %v6823_v43, %s4795_s24  ;;  %v7298_v14 = vpop.permute.xlu0 %4128  ;;  %v7303_v32 = vpop.permute.xlu1 %4113 }
 0x3b8   : > { %8660 = vst [vmem:[#allocation109_spill] sm:$0xff] %v7298_v14 }
 0x3bb   : > { %4388 = vrot.lane.b32.xlu0 %v4387_v19, %s4794_s23  ;;  %4363 = vrot.lane.b32.xlu1 %v6838_v56, %s4796_s25  ;;  %v7305_v39 = vpop.permute.xlu0 %4138 }
 0x3bc   : > { %8661 = vst [vmem:[#allocation16_spill] sm:$0xff] %v7305_v39 }
 0x3bf   : > { %4398 = vrot.lane.b32.xlu0 %v7019_v3, %s4795_s24  ;;  %4373 = vrot.lane.b32.xlu1 %v6823_v43, %s4792_s17  ;;  %v7311_v43 = vpop.permute.xlu1 %4123 }
 0x3c0   : > { %8662 = vst [vmem:[#allocation18_spill] sm:$0xff] %v7311_v43 }
 0x3c3   : > { %4408 = vrot.lane.b32.xlu0 %v7033_v13, %s4796_s25  ;;  %4383 = vrot.lane.b32.xlu1 %v6838_v56, %s4793_s22  ;;  %v7313_v56 = vpop.permute.xlu0 %4148 }
 0x3c4   : > { %v4150_v20 = vunpack.i.l.bf16 %v7313_v56 }
 0x3c7   : > { %4418 = vrot.lane.b32.xlu0 %v4387_v19, %s4790_s30  ;;  %4393 = vrot.lane.b32.xlu1 %v7169_v40, %s4794_s23  ;;  %v7319_v40 = vpop.permute.xlu1 %4133  ;;  %v7321_v42 = vpop.permute.xlu0 %4158  ;;  %v2249_v19 = vld [vmem:[#allocation3 + $0x1a0] sm:$0xff] }
 0x3c8   : > { %8663 = vst [vmem:[#allocation32_spill] sm:$0xff] %v7319_v40  ;;  %v2382_v22 = vrot.slane %v2249_v19, 7  ;;  %v8683_v40 = vld [vmem:[#allocation17_spill] sm:$0xff] }
 0x3cb   : > { %4428 = vrot.lane.b32.xlu0 %v6845_v9, %s4792_s17  ;;  %4403 = vrot.lane.b32.xlu1 %v6845_v9, %s4795_s24  ;;  %v7326_v9 = vpop.permute.xlu1 %4143  ;;  %v7328_v46 = vpop.permute.xlu0 %4168 }
 0x3cc   : > { %8664 = vst [vmem:[#allocation41_spill] sm:$0xff] %v7326_v9  ;;  %8665 = vst [vmem:[#allocation87_spill] sm:$0xff] %v7328_v46 }
 0x3cf   : > { %4438 = vrot.lane.b32.xlu0 %v6860_v29, %s4793_s22  ;;  %4413 = vrot.lane.b32.xlu1 %v6860_v29, %s4796_s25  ;;  %v7339_v29 = vpop.permute.xlu1 %4153 }
 0x3d3   : > { %4448 = vrot.lane.b32.xlu0 %v4282_v48, %s4794_s23  ;;  %4423 = vrot.lane.b32.xlu1 %v7019_v3, %s4792_s17  ;;  %v4442_v3 = vpack.i.bf16 %v7052_v33, %v7333_v28  ;;  %v7348_v27 = vpop.permute.xlu1 %4163  ;;  %v2197_v28 = vld [vmem:[#allocation3] sm:$0xff] }
 0x3d7   : > { %4458 = vrot.lane.b32.xlu0 %v6867_v30, %s4795_s24  ;;  %4433 = vrot.lane.b32.xlu1 %v7033_v13, %s4793_s22  ;;  %v8669_v13 = vld [vmem:[#allocation82_spill] sm:$0xff]  ;;  %v7356_v6 = vpop.permute.xlu1 %4173 }
 0x3d8   : > { %8670 = vst [vmem:[#allocation112_spill] sm:$0xff] %v7356_v6 }
 0x3d9   : > { %v7341_v48 = vpop.permute.xlu0 %4178 }
 0x3da   : > { %8668 = vst [vmem:[#allocation39_spill] sm:$0xff] %v7341_v48  ;;  %v7363_v48 = vsel %vm495_vm1, %v2382_v22, %v8672_v45  ;;  %v8678_v22 = vld [vmem:[#allocation14_spill] sm:$0xff] }
 0x3db   : > { %4468 = vrot.lane.b32.xlu0 %v6882_v5, %s4796_s25  ;;  %4443 = vrot.lane.b32.xlu1 %v4442_v3, %s4794_s23  ;;  %8673 = vst [vmem:[#allocation86_spill] sm:$0xff] %v7363_v48 }
 0x3dd   : > { %v7350_v41 = vpop.permute.xlu0 %4188 }
 0x3df   : > { %4478 = vrot.lane.b32.xlu0 %v8669_v13, %s4792_s17  ;;  %4453 = vrot.lane.b32.xlu1 %v8669_v13, %s4795_s24  ;;  %v8676_v13 = vld [vmem:[#allocation13_spill] sm:$0xff] }
 0x3e0   : > { %v4497_v53 = vpack.i.bf16 %v8676_v13, %v7363_v48  ;;  %v2253_v48 = vld [vmem:[#allocation3 + $0x1c0] sm:$0xff]  ;;  %v8686_v13 = vrot.slane %v7082_v38, 7 }
 0x3e1   : > { %v7358_v9 = vpop.permute.xlu0 %4198 }
 0x3e3   : > { %4488 = vrot.lane.b32.xlu0 %v7055_v2, %s4793_s22  ;;  %4463 = vrot.lane.b32.xlu1 %v7055_v2, %s4796_s25 }
 0x3e5   : > { %v7369_v19 = vpop.permute.xlu1 %4183  ;;  %v7371_v39 = vpop.permute.xlu0 %4208 }
 0x3e6   : > { %8674 = vst [vmem:[#allocation27_spill] sm:$0xff] %v7369_v19  ;;  %8675 = vst [vmem:[#allocation111_spill] sm:$0xff] %v7371_v39 }
 0x3e7   : > { %4498 = vrot.lane.b32.xlu0 %v4497_v53, %s4794_s23  ;;  %4473 = vrot.lane.b32.xlu1 %v4442_v3, %s4790_s30 }
 0x3e9   : > { %v7377_v49 = vpop.permute.xlu1 %4193  ;;  %v7379_v45 = vpop.permute.xlu0 %4218 }
 0x3ea   : > { %8677 = vst [vmem:[#allocation24_spill] sm:$0xff] %v7379_v45 }
 0x3eb   : > { %4508 = vrot.lane.b32.xlu0 %v8678_v22, %s4795_s24  ;;  %4483 = vrot.lane.b32.xlu1 %v6867_v30, %s4792_s17 }
 0x3ed   : > { %v7385_v2 = vpop.permute.xlu1 %4203  ;;  %v7387_v19 = vpop.permute.xlu0 %4228 }
 0x3ee   : > { %8679 = vst [vmem:[#allocation36_spill] sm:$0xff] %v7385_v2  ;;  %v4231_v46 = vunpack.i.h.bf16 %v7387_v19  ;;  %v4230_v14 = vunpack.i.l.bf16 %v7387_v19  ;;  %v3337_v19 = vsel %vm268_vm2, %v7238_v25, %v4150_v20 }
 0x3ef   : > { %4518 = vrot.lane.b32.xlu0 %v7077_v17, %s4796_s25  ;;  %4493 = vrot.lane.b32.xlu1 %v6882_v5, %s4793_s22 }
 0x3f0   : > { %v3369_v2 = vsel %vm1598_vm6, %v3337_v19, %v4230_v14  ;;  %v8701_v19 = vld [vmem:[#allocation29_spill] sm:$0xff] }
 0x3f1   : > { %v7393_v3 = vpop.permute.xlu1 %4213  ;;  %v7395_v4 = vpop.permute.xlu0 %4238 }
 0x3f2   : > { %8680 = vst [vmem:[#allocation45_spill] sm:$0xff] %v7393_v3 }
 0x3f3   : > { %4528 = vrot.lane.b32.xlu0 %v4497_v53, %s4790_s30  ;;  %4503 = vrot.lane.b32.xlu1 %v7182_v23, %s4794_s23 }
 0x3f5   : > { %v7400_v30 = vpop.permute.xlu1 %4223  ;;  %v7402_v45 = vpop.permute.xlu0 %4248 }
 0x3f6   : > { %8681 = vst [vmem:[#allocation89_spill] sm:$0xff] %v7400_v30  ;;  %8682 = vst [vmem:[#allocation34_spill] sm:$0xff] %v7402_v45  ;;  %v2387_v30 = vrot.slane %v2253_v48, 7  ;;  %v8700_v45 = vld [vmem:[#allocation15_spill] sm:$0xff] }
 0x3f7   : > { %4538 = vrot.lane.b32.xlu0 %v8683_v40, %s4792_s17  ;;  %4513 = vrot.lane.b32.xlu1 %v8683_v40, %s4795_s24 }
 0x3f8   : > { %v7431_v6 = vsel %vm495_vm1, %v2387_v30, %v8686_v13 }
 0x3f9   : > { %v7408_v5 = vpop.permute.xlu1 %4233  ;;  %v7410_v3 = vpop.permute.xlu0 %4258  ;;  %8687 = vst [vmem:[#allocation88_spill] sm:$0xff] %v7431_v6 }
 0x3fa   : > { %8684 = vst [vmem:[#allocation43_spill] sm:$0xff] %v7410_v3 }
 0x3fb   : > { %4548 = vrot.lane.b32.xlu0 %v6904_v12, %s4793_s22  ;;  %4523 = vrot.lane.b32.xlu1 %v6904_v12, %s4796_s25  ;;  %v8688_v12 = vld [vmem:[#allocation78_spill] sm:$0xff] }
 0x3fd   : > { %v7416_v53 = vpop.permute.xlu1 %4243  ;;  %v7418_v23 = vpop.permute.xlu0 %4268 }
 0x3ff   : > { %4558 = vrot.lane.b32.xlu0 %v7233_v24, %s4794_s23  ;;  %4533 = vrot.lane.b32.xlu1 %v8678_v22, %s4792_s17  ;;  %v4552_v22 = vpack.i.bf16 %v7096_v36, %v7431_v6  ;;  %v8694_v6 = vrot.slane %v7110_v47, 7  ;;  %v2317_v47 = vrot.slane %v2197_v28, 7 }
 0x401   : > { %v7424_v40 = vpop.permute.xlu1 %4253  ;;  %v7426_v3 = vpop.permute.xlu0 %4278 }
 0x402   : > { %8685 = vst [vmem:[#allocation114_spill] sm:$0xff] %v7424_v40  ;;  %v2257_v40 = vld [vmem:[#allocation3 + $0x1e0] sm:$0xff] }
 0x403   : > { %4568 = vrot.lane.b32.xlu0 %v8688_v12, %s4795_s24  ;;  %4543 = vrot.lane.b32.xlu1 %v7077_v17, %s4793_s22  ;;  %v2392_v30 = vrot.slane %v2257_v40, 7  ;;  %v8692_v17 = vld [vmem:[#allocation28_spill] sm:$0xff] }
 0x405   : > { %v7437_v48 = vpop.permute.xlu1 %4263  ;;  %v7439_v24 = vpop.permute.xlu0 %4288  ;;  %v7459_v36 = vsel %vm495_vm1, %v2392_v30, %v8694_v6  ;;  %v4111_v6 = vunpack.i.h.bf16 %v7283_v57 }
 0x406   : > { %8689 = vst [vmem:[#allocation33_spill] sm:$0xff] %v7437_v48  ;;  %8690 = vst [vmem:[#allocation113_spill] sm:$0xff] %v7439_v24 }
 0x407   : > { %4578 = vrot.lane.b32.xlu0 %v6926_v54, %s4796_s25  ;;  %4553 = vrot.lane.b32.xlu1 %v4552_v22, %s4794_s23  ;;  %8695 = vst [vmem:[#allocation167_spill] sm:$0xff] %v7459_v36  ;;  %v7488_v62 = vsel %vm268_vm2, %v8700_v45, %v4111_v6 }
 0x409   : > { %v7446_v38 = vpop.permute.xlu0 %4298  ;;  %v7448_v13 = vpop.permute.xlu1 %4273 }
 0x40a   : > { %8691 = vst [vmem:[#allocation31_spill] sm:$0xff] %v7446_v38 }
 0x40b   : > { %4588 = vrot.lane.b32.xlu0 %v8692_v17, %s4792_s17  ;;  %4563 = vrot.lane.b32.xlu1 %v8692_v17, %s4795_s24  ;;  %v4607_v17 = vpack.i.bf16 %v7127_v55, %v7459_v36  ;;  %v4151_v36 = vunpack.i.h.bf16 %v7313_v56  ;;  %v7481_v55 = vld [vmem:[#allocation3 + $0x210] sm:$0xff] }
 0x40d   : > { %v4309_v48 = vpop.permute.xlu0 %4308  ;;  %v7454_v24 = vpop.permute.xlu1 %4283  ;;  %v3338_v56 = vsel %vm268_vm2, %v6966_v0, %v4151_v36 }
 0x40e   : > { %8693 = vst [vmem:[#allocation147_spill] sm:$0xff] %v7454_v24  ;;  %v4310_v60 = vunpack.i.l.bf16 %v4309_v48  ;;  %v7508_v24 = vld [vmem:[#allocation3 + $0x208] sm:$0xff] }
 0x40f   : > { %4598 = vrot.lane.b32.xlu0 %v7100_v1, %s4793_s22  ;;  %4573 = vrot.lane.b32.xlu1 %v7100_v1, %s4796_s25  ;;  %v7478_v1 = vld [vmem:[#allocation3 + $0x200] sm:$0xff]  ;;  %v2529_v14 = vrot.slane %v7508_v24, 7 }
 0x410   : > { %v2528_v21 = vrot.slane %v7478_v1, 7  ;;  %v3401_v36 = vsel %vm1664_vm8, %v3369_v2, %v4310_v60 }
 0x411   : > { %v4319_v40 = vpop.permute.xlu0 %4318  ;;  %v7465_v38 = vpop.permute.xlu1 %4293 }
 0x412   : > { %8696 = vst [vmem:[#allocation40_spill] sm:$0xff] %v7465_v38  ;;  %v8698_v38 = vld [vmem:[#allocation74_spill] sm:$0xff]  ;;  %v4321_v45 = vunpack.i.h.bf16 %v4319_v40 }
 0x413   : > { %4608 = vrot.lane.b32.xlu0 %v4607_v17, %s4794_s23  ;;  %4583 = vrot.lane.b32.xlu1 %v4552_v22, %s4790_s30  ;;  %v8699_v22 = vrot.slane %v8698_v38, 7  ;;  %v4311_v38 = vunpack.i.h.bf16 %v4309_v48 }
 0x415   : > { %v4329_v30 = vpop.permute.xlu0 %4328  ;;  %v7472_v33 = vpop.permute.xlu1 %4303  ;;  %v2319_v28 = vsel %vm495_vm1, %v2317_v47, %v8699_v22  ;;  %v4320_v47 = vunpack.i.l.bf16 %v4319_v40 }
 0x416   : > { %8697 = vst [vmem:[#allocation49_spill] sm:$0xff] %v7472_v33  ;;  %v4110_v33 = vunpack.i.l.bf16 %v7283_v57  ;;  %v2531_v57 = vrot.slane %v7481_v55, 7  ;;  %v4331_v6 = vunpack.i.h.bf16 %v4329_v30  ;;  %v4330_v1 = vunpack.i.l.bf16 %v4329_v30 }
 0x417   : > { %4618 = vrot.lane.b32.xlu0 %v7113_v11, %s4795_s24  ;;  %4593 = vrot.lane.b32.xlu1 %v8688_v12, %s4792_s17  ;;  %v3433_v25 = vsel %vm1730_vm10, %v3401_v36, %v4320_v47 }
 0x419   : > { %v4339_v39 = vpop.permute.xlu0 %4338  ;;  %v7492_v12 = vpop.permute.xlu1 %4313 }
 0x41a   : > { %v4341_v43 = vunpack.i.h.bf16 %v4339_v39  ;;  %v4340_v0 = vunpack.i.l.bf16 %v4339_v39  ;;  %v3466_v39 = vsel %vm3449_vm12, %v3433_v25, %v4330_v1  ;;  %v4191_v25 = vunpack.i.h.bf16 %v7350_v41 }
 0x41b   : > { %4628 = vrot.lane.b32.xlu0 %v7129_v18, %s4796_s25  ;;  %4603 = vrot.lane.b32.xlu1 %v6926_v54, %s4793_s22  ;;  %v3370_v54 = vsel %vm1598_vm6, %v3338_v56, %v4231_v46 }
 0x41c   : > { %v3402_v40 = vsel %vm1664_vm8, %v3370_v54, %v4311_v38  ;;  %v7522_v38 = vld [vmem:[#allocation3 + $0x218] sm:$0xff] }
 0x41d   : > { %v4349_v48 = vpop.permute.xlu0 %4348  ;;  %v7506_v22 = vpop.permute.xlu1 %4323  ;;  %v3434_v30 = vsel %vm1730_vm10, %v3402_v40, %v4321_v45  ;;  %v3321_v45 = vsel %vm268_vm2, %v2319_v28, %v4110_v33  ;;  %v2537_v33 = vrot.slane %v7522_v38, 1 }
 0x41e   : > { %v4351_v50 = vunpack.i.h.bf16 %v4349_v48  ;;  %v4350_v20 = vunpack.i.l.bf16 %v4349_v48  ;;  %v3467_v60 = vsel %vm3449_vm12, %v3434_v30, %v4331_v6  ;;  %v4190_v30 = vunpack.i.l.bf16 %v7350_v41 }
 0x41f   : > { %4638 = vrot.lane.b32.xlu0 %v4607_v17, %s4790_s30  ;;  %4613 = vrot.lane.b32.xlu1 %v7200_v26, %s4794_s23  ;;  %v3499_v17 = vsel %vm3482_vm13, %v3466_v39, %v4340_v0  ;;  %v3500_v26 = vsel %vm3482_vm13, %v3467_v60, %v4341_v43  ;;  %v4115_v0 = vunpack.i.l.bf16 %v7303_v32  ;;  %v2530_v39 = vsel %vm495_vm1, %v2528_v21, %v2529_v14 }
 0x420   : > { %v3532_v6 = vsel %vm3515_vm14, %v3499_v17, %v4350_v20  ;;  %v3533_v1 = vsel %vm3515_vm14, %v3500_v26, %v4351_v50  ;;  %v2535_v20 = vrot.slane %v7481_v55, 1  ;;  %v2532_v60 = vsel %vm495_vm1, %v2529_v14, %v2531_v57 }
 0x421   : > { %v4359_v46 = vpop.permute.xlu0 %4358  ;;  %v4334_v2 = vpop.permute.xlu1 %4333  ;;  %v4270_v17 = vunpack.i.l.bf16 %v7418_v23  ;;  %v7559_v26 = vpack.i.bf16 %v7481_v55, %v7508_v24  ;;  %v4156_v41 = vunpack.i.h.bf16 %v7339_v29  ;;  %v4155_v21 = vunpack.i.l.bf16 %v7339_v29 }
 0x422   : > { %v4361_v56 = vunpack.i.h.bf16 %v4359_v46  ;;  %v4360_v47 = vunpack.i.l.bf16 %v4359_v46  ;;  %v4271_v46 = vunpack.i.h.bf16 %v7418_v23  ;;  %v4326_v57 = vunpack.i.h.bf16 %v7506_v22 }
 0x423   : > { %4648 = vrot.lane.b32.xlu0 %v8701_v19, %s4792_s17  ;;  %4623 = vrot.lane.b32.xlu1 %v8701_v19, %s4795_s24  ;;  %v4325_v14 = vunpack.i.l.bf16 %v7506_v22  ;;  %v4336_v23 = vunpack.i.h.bf16 %v4334_v2  ;;  %v3353_v29 = vsel %vm1598_vm6, %v3321_v45, %v4190_v30 }
 0x424   : > { %v3565_v48 = vsel %vm3548_vm15, %v3532_v6, %v4360_v47  ;;  %v3566_v54 = vsel %vm3548_vm15, %v3533_v1, %v4361_v56  ;;  %v4335_v56 = vunpack.i.l.bf16 %v4334_v2  ;;  %v7569_v6 = vpack.i.bf16 %v2532_v60, %v2530_v39 }
 0x425   : > { %v7544_v36 = vpop.permute.xlu0 %4368  ;;  %v4344_v40 = vpop.permute.xlu1 %4343  ;;  %v4037_v50 = vpack.c.bf16 %v3566_v54, %v3565_v48  ;;  %v2534_v1 = vrot.slane %v7508_v24, 1  ;;  %v3354_v48 = vsel %vm1598_vm6, %v7488_v62, %v4191_v25  ;;  %v3340_v39 = vsel %vm268_vm2, %v6986_v10, %v4156_v41 }
 0x426   : > { %v4346_v54 = vunpack.i.h.bf16 %v4344_v40  ;;  %v3386_v22 = vsel %vm1664_vm8, %v3354_v48, %v4271_v46  ;;  %v3339_v60 = vsel %vm268_vm2, %v7212_v16, %v4155_v21  ;;  %v4235_v25 = vunpack.i.l.bf16 %v7408_v5 }
 0x427   : > { %4658 = vrot.lane.b32.xlu0 %v6948_v63, %s4793_s22  ;;  %4039 = vmatprep.subr.msk.bf16.mxu1 %vm7537_vm4, %v4037_v50  ;;  %v4345_v50 = vunpack.i.l.bf16 %v4344_v40  ;;  %v3418_v62 = vsel %vm1730_vm10, %v3386_v22, %v4326_v57  ;;  %v4236_v40 = vunpack.i.h.bf16 %v7408_v5  ;;  %v2265_v57 = vld [vmem:[#allocation3 + $0x220] sm:$0xff]  ;;  %v4370_v48 = vunpack.i.l.bf16 %v7544_v36 }
 0x428   : > { %4633 = vrot.lane.b32.xlu1 %v6948_v63, %s4796_s25  ;;  %v3385_v63 = vsel %vm1664_vm8, %v3353_v29, %v4270_v17 }
 0x429   : > { %v7567_v47 = vpop.permute.xlu0 %4378  ;;  %v4354_v19 = vpop.permute.xlu1 %4353  ;;  %v3417_v45 = vsel %vm1730_vm10, %v3385_v63, %v4325_v14  ;;  %v4316_v14 = vunpack.i.h.bf16 %v7492_v12 }
 0x42a   : > { %v4356_v28 = vunpack.i.h.bf16 %v4354_v19  ;;  %v4355_v2 = vunpack.i.l.bf16 %v4354_v19  ;;  %v3450_v30 = vsel %vm3449_vm12, %v3417_v45, %v4335_v56  ;;  %v8704_v56 = vld [vmem:[#allocation19_spill] sm:$0xff]  ;;  %v3372_v45 = vsel %vm1598_vm6, %v3340_v39, %v4236_v40 }
 0x42b   : > { %4668 = vrot.lane.b32.xlu0 %v7246_v8, %s4794_s23  ;;  %v3451_v8 = vsel %vm3449_vm12, %v3418_v62, %v4336_v23  ;;  %v3483_v17 = vsel %vm3482_vm13, %v3450_v30, %v4345_v50  ;;  %v4371_v23 = vunpack.i.h.bf16 %v7544_v36  ;;  %v4380_v50 = vunpack.i.l.bf16 %v7567_v47  ;;  %v7611_v62 = vld [vmem:[#allocation3 + $0x230] sm:$0xff] }
 0x42c   : > { %4643 = vrot.lane.b32.xlu1 %v7113_v11, %s4792_s17  ;;  %v3484_v16 = vsel %vm3482_vm13, %v3451_v8, %v4346_v54  ;;  %v4315_v11 = vunpack.i.l.bf16 %v7492_v12  ;;  %v3516_v19 = vsel %vm3515_vm14, %v3483_v17, %v4355_v2  ;;  %v4381_v12 = vunpack.i.h.bf16 %v7567_v47  ;;  %v7609_v2 = vld [vmem:[#allocation3 + $0x228] sm:$0xff] }
 0x42d   : > { %v4389_v46 = vpop.permute.xlu0 %4388  ;;  %v4364_v10 = vpop.permute.xlu1 %4363  ;;  %v3517_v5 = vsel %vm3515_vm14, %v3484_v16, %v4356_v28  ;;  %v2542_v36 = vrot.slane %v2265_v57, 7  ;;  %v2545_v40 = vrot.slane %v7611_v62, 7 }
 0x42e   : > { %v4366_v41 = vunpack.i.h.bf16 %v4364_v10  ;;  %v4365_v21 = vunpack.i.l.bf16 %v4364_v10  ;;  %v4391_v30 = vunpack.i.h.bf16 %v4389_v46  ;;  %v4390_v8 = vunpack.i.l.bf16 %v4389_v46 }
 0x42f   : > { %4678 = vrot.lane.b32.xlu0 %v8704_v56, %s4795_s24  ;;  %v3404_v10 = vsel %vm1664_vm8, %v3372_v45, %v4316_v14  ;;  %v2536_v14 = vsel %vm624_vm3, %v2534_v1, %v2535_v20  ;;  %v8705_v45 = vunpack.i.h.bf16 %v7303_v32 }
 0x430   : > { %4653 = vrot.lane.b32.xlu1 %v7129_v18, %s4793_s22  ;;  %v3549_v29 = vsel %vm3548_vm15, %v3516_v19, %v4365_v21  ;;  %v3550_v54 = vsel %vm3548_vm15, %v3517_v5, %v4366_v41  ;;  %v3371_v18 = vsel %vm1598_vm6, %v3339_v60, %v4235_v25  ;;  %v3436_v39 = vsel %vm1730_vm10, %v3404_v10, %v4371_v23 }
 0x431   : > { %v4399_v22 = vpop.permute.xlu0 %4398  ;;  %v7607_v28 = vpop.permute.xlu1 %4373  ;;  %v4040_v63 = vpack.c.bf16 %v3550_v54, %v3549_v29  ;;  %v3403_v17 = vsel %vm1664_vm8, %v3371_v18, %v4315_v11  ;;  %v2543_v60 = vrot.slane %v7609_v2, 7  ;;  %v3469_v46 = vsel %vm3449_vm12, %v3436_v39, %v4381_v12 }
 0x432   : > { %v4401_v47 = vunpack.i.h.bf16 %v4399_v22  ;;  %v4400_v16 = vunpack.i.l.bf16 %v4399_v22  ;;  %v3435_v41 = vsel %vm1730_vm10, %v3403_v17, %v4370_v48  ;;  %v2538_v11 = vsel %vm624_vm3, %v2535_v20, %v2537_v33 }
 0x433   : > { %4688 = vrot.lane.b32.xlu0 %v6968_v7, %s4796_s25  ;;  %4042 = vmatpush3.bf16.xpose.msk.msra.mxu1 %vm7537_vm4, %v4040_v63  ;;  %v3468_v25 = vsel %vm3449_vm12, %v3435_v41, %v4380_v50  ;;  %v3502_v5 = vsel %vm3482_vm13, %v3469_v46, %v4391_v30  ;;  %v2544_v55 = vsel %vm495_vm1, %v2542_v36, %v2543_v60  ;;  %v2268_v63 = vld [vmem:[#allocation3 + $0x238] sm:$0xff]  ;;  %v4196_v36 = vunpack.i.h.bf16 %v7377_v49 }
 0x434   : > { %4663 = vrot.lane.b32.xlu1 %v7569_v6, %s4794_s23  ;;  %v3501_v19 = vsel %vm3482_vm13, %v3468_v25, %v4390_v8  ;;  %v3535_v54 = vsel %vm3515_vm14, %v3502_v5, %v4401_v47  ;;  %v2546_v33 = vsel %vm495_vm1, %v2543_v60, %v2545_v40  ;;  %v3323_v20 = vsel %vm268_vm2, %v7151_v31, %v4115_v0 }
 0x435   : > { %v4409_v21 = vpop.permute.xlu0 %4408  ;;  %v4384_v57 = vpop.permute.xlu1 %4383  ;;  %v3534_v29 = vsel %vm3515_vm14, %v3501_v19, %v4400_v16  ;;  %v4707_v22 = vpack.i.bf16 %v2538_v11, %v2536_v14  ;;  %v4195_v18 = vunpack.i.l.bf16 %v7377_v49  ;;  %v4276_v30 = vunpack.i.h.bf16 %v7448_v13 }
 0x436   : > { %v4411_v23 = vunpack.i.h.bf16 %v4409_v21  ;;  %v4410_v48 = vunpack.i.l.bf16 %v4409_v21  ;;  %v4275_v8 = vunpack.i.l.bf16 %v7448_v13  ;;  %v4717_v31 = vpack.i.bf16 %v2546_v33, %v2544_v55 }
 0x437   : > { %4698 = vrot.lane.b32.xlu0 %v7559_v26, %s4792_s17  ;;  %v2548_v0 = vrot.slane %v7609_v2, 1  ;;  %v4376_v32 = vunpack.i.h.bf16 %v7607_v28  ;;  %v2549_v49 = vrot.slane %v7611_v62, 1  ;;  %v2551_v10 = vrot.slane %v2268_v63, 1 }
 0x438   : > { %v3567_v24 = vsel %vm3548_vm15, %v3534_v29, %v4410_v48  ;;  %v3568_v38 = vsel %vm3548_vm15, %v3535_v54, %v4411_v23  ;;  %4673 = vrot.lane.b32.xlu1 %v7559_v26, %s4795_s24  ;;  %v3324_v26 = vsel %vm268_vm2, %v6813_v44, %v8705_v45  ;;  %v4375_v44 = vunpack.i.l.bf16 %v7607_v28 }
 0x439   : > { %v4043_v1 = vpack.c.bf16 %v3568_v38, %v3567_v24  ;;  %v7655_v12 = vpop.permute.xlu0 %4418  ;;  %v4394_v50 = vpop.permute.xlu1 %4393  ;;  %v4386_v17 = vunpack.i.h.bf16 %v4384_v57  ;;  %v4385_v47 = vunpack.i.l.bf16 %v4384_v57  ;;  %v4727_v41 = vpack.i.bf16 %v7611_v62, %v7609_v2 }
 0x43a   : > { %v3356_v39 = vsel %vm1598_vm6, %v3324_v26, %v4196_v36  ;;  %v3355_v60 = vsel %vm1598_vm6, %v3323_v20, %v4195_v18  ;;  %v4396_v40 = vunpack.i.h.bf16 %v4394_v50  ;;  %v4395_v25 = vunpack.i.l.bf16 %v4394_v50 }
 0x43b   : > { %4708 = vrot.lane.b32.xlu0 %v4707_v22, %s4793_s22  ;;  %4045 = vmatprep.subr.msk.bf16.mxu1 %vm7537_vm4, %v4043_v1  ;;  %v3388_v28 = vsel %vm1664_vm8, %v3356_v39, %v4276_v30  ;;  %v3387_v46 = vsel %vm1664_vm8, %v3355_v60, %v4275_v8  ;;  %v2550_v2 = vsel %vm624_vm3, %v2548_v0, %v2549_v49  ;;  %v4121_v20 = vunpack.i.h.bf16 %v7292_v51 }
 0x43c   : > { %4683 = vrot.lane.b32.xlu1 %v4707_v22, %s4796_s25  ;;  %v3419_v57 = vsel %vm1730_vm10, %v3387_v46, %v4375_v44  ;;  %v3420_v11 = vsel %vm1730_vm10, %v3388_v28, %v4376_v32  ;;  %v2552_v62 = vsel %vm624_vm3, %v2549_v49, %v2551_v10  ;;  %v4120_v1 = vunpack.i.l.bf16 %v7292_v51 }
 0x43d   : > { %v7673_v13 = vpop.permute.xlu0 %4428  ;;  %v4404_v16 = vpop.permute.xlu1 %4403  ;;  %v3452_v19 = vsel %vm3449_vm12, %v3419_v57, %v4385_v47  ;;  %v3453_v5 = vsel %vm3449_vm12, %v3420_v11, %v4386_v17  ;;  %v4737_v33 = vpack.i.bf16 %v2552_v62, %v2550_v2  ;;  %v4161_v36 = vunpack.i.h.bf16 %v7321_v42 }
 0x43e   : > { %v4406_v21 = vunpack.i.h.bf16 %v4404_v16  ;;  %v4405_v14 = vunpack.i.l.bf16 %v4404_v16  ;;  %v3485_v29 = vsel %vm3482_vm13, %v3452_v19, %v4395_v25  ;;  %v3486_v54 = vsel %vm3482_vm13, %v3453_v5, %v4396_v40 }
 0x43f   : > { %4718 = vrot.lane.b32.xlu0 %v4717_v31, %s4794_s23  ;;  %v4160_v18 = vunpack.i.l.bf16 %v7321_v42  ;;  %v3325_v51 = vsel %vm268_vm2, %v7187_v58, %v4120_v1  ;;  %v4200_v30 = vunpack.i.l.bf16 %v7358_v9  ;;  %v4201_v8 = vunpack.i.h.bf16 %v7358_v9 }
 0x440   : > { %4693 = vrot.lane.b32.xlu1 %v7569_v6, %s4790_s30  ;;  %v3518_v55 = vsel %vm3515_vm14, %v3485_v29, %v4405_v14  ;;  %v3519_v6 = vsel %vm3515_vm14, %v3486_v54, %v4406_v21  ;;  %v4241_v42 = vunpack.i.h.bf16 %v7395_v4  ;;  %v4240_v31 = vunpack.i.l.bf16 %v7395_v4  ;;  %s3899_s30 = sshll.u32 %s8749_s19, 4 }
 0x441   : > { %v7690_v23 = vpop.permute.xlu0 %4438  ;;  %v4414_v48 = vpop.permute.xlu1 %4413  ;;  %v4280_v0 = vunpack.i.l.bf16 %v7426_v3  ;;  %v3342_v58 = vsel %vm268_vm2, %v7008_v35, %v4161_v36  ;;  %v4281_v49 = vunpack.i.h.bf16 %v7426_v3  ;;  %v4421_v9 = vunpack.i.h.bf16 %v7655_v12  ;;  %v7742_v3 = vld [vmem:[%s8080_s3] sm:$0xff]  ;;  %s224_s8 = scalar_lea.vmem %s8082_s5, %s3899_s30 }
 0x442   : > { %v4416_v24 = vunpack.i.h.bf16 %v4414_v48  ;;  %v4415_v38 = vunpack.i.l.bf16 %v4414_v48  ;;  %v4420_v10 = vunpack.i.l.bf16 %v7655_v12  ;;  %v4431_v4 = vunpack.i.h.bf16 %v7673_v13  ;;  %3969 = vmatprep.mubr.msk.f32.mxu1 %vm3588_vm0, %v7742_v3 }
 0x443   : > { %4728 = vrot.lane.b32.xlu0 %v4727_v41, %s4795_s24  ;;  %v4440_v17 = vunpack.i.l.bf16 %v7690_v23  ;;  %v4166_v47 = vunpack.i.h.bf16 %v7348_v27  ;;  %v4165_v16 = vunpack.i.l.bf16 %v7348_v27  ;;  %v3357_v35 = vsel %vm1598_vm6, %v3325_v51, %v4200_v30 }
 0x444   : > { %v3551_v50 = vsel %vm3548_vm15, %v3518_v55, %v4415_v38  ;;  %v3552_v22 = vsel %vm3548_vm15, %v3519_v6, %v4416_v24  ;;  %4703 = vrot.lane.b32.xlu1 %v8704_v56, %s4792_s17  ;;  %v3326_v56 = vsel %vm268_vm2, %v6835_v59, %v4121_v20  ;;  %v3341_v59 = vsel %vm268_vm2, %v7251_v34, %v4160_v18 }
 0x445   : > { %v4046_v63 = vpack.c.bf16 %v3552_v22, %v3551_v50  ;;  %v7703_v45 = vpop.permute.xlu0 %4448  ;;  %v7705_v26 = vpop.permute.xlu1 %4423  ;;  %v4441_v34 = vunpack.i.h.bf16 %v7690_v23  ;;  %v3358_v12 = vsel %vm1598_vm6, %v3326_v56, %v4201_v8  ;;  %v3373_v41 = vsel %vm1598_vm6, %v3341_v59, %v4240_v31 }
 0x446   : > { %v3389_v39 = vsel %vm1664_vm8, %v3357_v35, %v4280_v0  ;;  %v3390_v25 = vsel %vm1664_vm8, %v3358_v12, %v4281_v49  ;;  %v4450_v46 = vunpack.i.l.bf16 %v7703_v45  ;;  %v3405_v21 = vsel %vm1664_vm8, %v3373_v41, %v4420_v10 }
 0x447   : > { %4738 = vrot.lane.b32.xlu0 %v4737_v33, %s4796_s25  ;;  %4048 = vmatpush3.bf16.xpose.msk.msra.mxu1 %vm7537_vm4, %v4046_v63  ;;  %v3422_v57 = vsel %vm1730_vm10, %v3390_v25, %v4431_v4  ;;  %v4451_v62 = vunpack.i.h.bf16 %v7703_v45  ;;  %v4426_v19 = vunpack.i.h.bf16 %v7705_v26  ;;  %v4425_v5 = vunpack.i.l.bf16 %v7705_v26  ;;  %v3582_v63 = vld [vmem:[%s8081_s4] sm:$0xff] }
 0x448   : > { %4713 = vrot.lane.b32.xlu1 %v6968_v7, %s4793_s22  ;;  %v4430_v7 = vunpack.i.l.bf16 %v7673_v13  ;;  %v3374_v13 = vsel %vm1598_vm6, %v3342_v58, %v4241_v42  ;;  %v3455_v2 = vsel %vm3449_vm12, %v3422_v57, %v4441_v34  ;;  %v4797_v18 = vmov 0   ;;  %v8706_v34 = vld [vmem:[#allocation20_spill] sm:$0xff] }
 0x449   : > { %v4459_v32 = vpop.permute.xlu0 %4458  ;;  %v4434_v44 = vpop.permute.xlu1 %4433  ;;  %v3406_v14 = vsel %vm1664_vm8, %v3374_v13, %v4421_v9  ;;  %v3488_v45 = vsel %vm3482_vm13, %v3455_v2, %v4451_v62  ;;  %v3437_v36 = vsel %vm1730_vm10, %v3405_v21, %v4425_v5  ;;  %4747 = vset.pattern.permute.xlu0 %v4797_v18  ;;  %v3344_v10 = vsel %vm268_vm2, %v7030_v15, %v4166_v47 }
 0x44a   : > { %v3421_v28 = vsel %vm1730_vm10, %v3389_v39, %v4430_v7  ;;  %v4461_v23 = vunpack.i.h.bf16 %v4459_v32  ;;  %v4460_v48 = vunpack.i.l.bf16 %v4459_v32  ;;  %v4436_v29 = vunpack.i.h.bf16 %v4434_v44 }
 0x44b   : > { %v3454_v11 = vsel %vm3449_vm12, %v3421_v28, %v4440_v17  ;;  %v4435_v54 = vunpack.i.l.bf16 %v4434_v44  ;;  %v3438_v26 = vsel %vm1730_vm10, %v3406_v14, %v4426_v19  ;;  %3585 = vperm.xlu0 %4747, %v3582_v63   ;;  %v3343_v12 = vsel %vm268_vm2, %v8706_v34, %v4165_v16 }
 0x44c   : > { %4723 = vrot.lane.b32.xlu1 %v7219_v37, %s4794_s23  ;;  %v4246_v37 = vunpack.i.h.bf16 %v7416_v53  ;;  %v3487_v55 = vsel %vm3482_vm13, %v3454_v11, %v4450_v46  ;;  %v3521_v56 = vsel %vm3515_vm14, %v3488_v45, %v4461_v23  ;;  %v3471_v8 = vsel %vm3449_vm12, %v3438_v26, %v4436_v29  ;;  %v8708_v26 = vld [vmem:[#allocation36_spill] sm:$0xff] }
 0x44d   : > { %v4469_v60 = vpop.permute.xlu0 %4468  ;;  %v4444_v40 = vpop.permute.xlu1 %4443  ;;  %v3520_v51 = vsel %vm3515_vm14, %v3487_v55, %v4460_v48  ;;  %v3470_v30 = vsel %vm3449_vm12, %v3437_v36, %v4435_v54  ;;  %v4206_v36 = vunpack.i.h.bf16 %v8708_v26  ;;  %v4205_v18 = vunpack.i.l.bf16 %v8708_v26  ;;  %v8719_v26 = vld [vmem:[#allocation30_spill] sm:$0xff] }
 0x44e   : > { %v4471_v6 = vunpack.i.h.bf16 %v4469_v60  ;;  %v4446_v33 = vunpack.i.h.bf16 %v4444_v40  ;;  %v4445_v20 = vunpack.i.l.bf16 %v4444_v40  ;;  %v4470_v1 = vunpack.i.l.bf16 %v4469_v60 }
 0x44f   : > { %v3376_v60 = vsel %vm1598_vm6, %v3344_v10, %v4246_v37 }
 0x450   : > { %4733 = vrot.lane.b32.xlu1 %v6975_v61, %s4795_s24  ;;  %v4245_v61 = vunpack.i.l.bf16 %v7416_v53  ;;  %v3503_v31 = vsel %vm3482_vm13, %v3470_v30, %v4445_v20  ;;  %v3504_v0 = vsel %vm3482_vm13, %v3471_v8, %v4446_v33  ;;  %v3554_v58 = vsel %vm3548_vm15, %v3521_v56, %v4471_v6 }
 0x451   : > { %v4479_v24 = vpop.permute.xlu0 %4478  ;;  %v4454_v38 = vpop.permute.xlu1 %4453 }
 0x452   : > { %v4456_v50 = vunpack.i.h.bf16 %v4454_v38  ;;  %v4455_v22 = vunpack.i.l.bf16 %v4454_v38  ;;  %v3375_v40 = vsel %vm1598_vm6, %v3343_v12, %v4245_v61  ;;  %v4481_v25 = vunpack.i.h.bf16 %v4479_v24 }
 0x453   : > { %v4480_v28 = vunpack.i.l.bf16 %v4479_v24 }
 0x454   : > { %4743 = vrot.lane.b32.xlu1 %v6989_v52, %s4796_s25  ;;  %v3553_v52 = vsel %vm3548_vm15, %v3520_v51, %v4470_v1  ;;  %v3536_v59 = vsel %vm3515_vm14, %v3503_v31, %v4455_v22  ;;  %v3537_v49 = vsel %vm3515_vm14, %v3504_v0, %v4456_v50  ;;  %v8707_v1 = vld [vmem:[#allocation18_spill] sm:$0xff]  ;;  %v8709_v51 = vld [vmem:[#allocation147_spill] sm:$0xff]  ;;  %v8711_v0 = vld [vmem:[#allocation5_spill] sm:$0xff] }
 0x455   : > { %v4489_v53 = vpop.permute.xlu0 %4488  ;;  %v4464_v42 = vpop.permute.xlu1 %4463  ;;  %v4052_v13 = vpack.c.bf16 %v3554_v58, %v3553_v52  ;;  %v4126_v50 = vunpack.i.h.bf16 %v8707_v1  ;;  %v4125_v22 = vunpack.i.l.bf16 %v8707_v1  ;;  %v4286_v56 = vunpack.i.h.bf16 %v8709_v51 }
 0x456   : > { %v4466_v32 = vunpack.i.h.bf16 %v4464_v42  ;;  %v4465_v44 = vunpack.i.l.bf16 %v4464_v42  ;;  %v4491_v15 = vunpack.i.h.bf16 %v4489_v53  ;;  %v4490_v47 = vunpack.i.l.bf16 %v4489_v53  ;;  %v8710_v42 = vld [vmem:[#allocation85_spill] sm:$0xff] }
 0x457   : > { %v4285_v30 = vunpack.i.l.bf16 %v8709_v51  ;;  %v3327_v31 = vsel %vm268_vm2, %v8710_v42, %v4125_v22 }
 0x458   : > { %v3569_v7 = vsel %vm3548_vm15, %v3536_v59, %v4465_v44  ;;  %v3570_v9 = vsel %vm3548_vm15, %v3537_v49, %v4466_v32  ;;  %v3328_v32 = vsel %vm268_vm2, %v8711_v0, %v4126_v50  ;;  %v3359_v49 = vsel %vm1598_vm6, %v3327_v31, %v4205_v18  ;;  %v8720_v18 = vld [vmem:[#allocation113_spill] sm:$0xff]  ;;  %v8721_v31 = vld [vmem:[#allocation112_spill] sm:$0xff] }
 0x459   : > { %v4049_v4 = vpack.c.bf16 %v3570_v9, %v3569_v7  ;;  %v4499_v17 = vpop.permute.xlu0 %4498  ;;  %v4474_v35 = vpop.permute.xlu1 %4473  ;;  %v3360_v7 = vsel %vm1598_vm6, %v3328_v32, %v4206_v36  ;;  %v4291_v51 = vunpack.i.h.bf16 %v8720_v18  ;;  %v4176_v0 = vunpack.i.h.bf16 %v8721_v31 }
 0x45a   : > { %v4476_v41 = vunpack.i.h.bf16 %v4474_v35  ;;  %v4475_v39 = vunpack.i.l.bf16 %v4474_v35  ;;  %v4501_v57 = vunpack.i.h.bf16 %v4499_v17  ;;  %v4500_v11 = vunpack.i.l.bf16 %v4499_v17 }
 0x45b   : > { %4051 = vmatprep.subr.msk.bf16.mxu1 %vm7537_vm4, %v4049_v4  ;;  %v3392_v4 = vsel %vm1664_vm8, %v3360_v7, %v4286_v56  ;;  %v3391_v17 = vsel %vm1664_vm8, %v3359_v49, %v4285_v30  ;;  %v4290_v56 = vunpack.i.l.bf16 %v8720_v18  ;;  %v4175_v32 = vunpack.i.l.bf16 %v8721_v31  ;;  %v8722_v7 = vld [vmem:[#allocation114_spill] sm:$0xff] }
 0x45c   : > { %v3408_v46 = vsel %vm1664_vm8, %v3376_v60, %v4476_v41  ;;  %v3407_v27 = vsel %vm1664_vm8, %v3375_v40, %v4475_v39  ;;  %4054 = vmatpush3.bf16.xpose.msk.msra.mxu1 %vm7537_vm4, %v4052_v13 }
 0x45d   : > { %v3440_v16 = vsel %vm1730_vm10, %v3408_v46, %v4481_v25  ;;  %v3439_v37 = vsel %vm1730_vm10, %v3407_v27, %v4480_v28  ;;  %v4509_v21 = vpop.permute.xlu0 %4508  ;;  %v4484_v14 = vpop.permute.xlu1 %4483 }
 0x45e   : > { %v3472_v2 = vsel %vm3449_vm12, %v3439_v37, %v4490_v47  ;;  %v3473_v62 = vsel %vm3449_vm12, %v3440_v16, %v4491_v15  ;;  %v4511_v19 = vunpack.i.h.bf16 %v4509_v21  ;;  %v4510_v5 = vunpack.i.l.bf16 %v4509_v21  ;;  %v8712_v21 = vld [vmem:[#allocation109_spill] sm:$0xff] }
 0x45f   : > { %v3505_v23 = vsel %vm3482_vm13, %v3472_v2, %v4500_v11  ;;  %v3506_v48 = vsel %vm3482_vm13, %v3473_v62, %v4501_v57  ;;  %v4486_v8 = vunpack.i.h.bf16 %v4484_v14  ;;  %v4485_v53 = vunpack.i.l.bf16 %v4484_v14 }
 0x460   : > { %v3538_v55 = vsel %vm3515_vm14, %v3505_v23, %v4510_v5  ;;  %v3539_v6 = vsel %vm3515_vm14, %v3506_v48, %v4511_v19  ;;  %v4131_v14 = vunpack.i.h.bf16 %v8712_v21  ;;  %v4130_v57 = vunpack.i.l.bf16 %v8712_v21  ;;  %v8713_v19 = vld [vmem:[#allocation87_spill] sm:$0xff] }
 0x461   : > { %v4519_v29 = vpop.permute.xlu0 %4518  ;;  %v4494_v54 = vpop.permute.xlu1 %4493  ;;  %v3423_v12 = vsel %vm1730_vm10, %v3391_v17, %v4485_v53  ;;  %v3424_v13 = vsel %vm1730_vm10, %v3392_v4, %v4486_v8  ;;  %v4171_v5 = vunpack.i.h.bf16 %v8713_v19  ;;  %v4170_v23 = vunpack.i.l.bf16 %v8713_v19  ;;  %v8714_v48 = vld [vmem:[#allocation111_spill] sm:$0xff] }
 0x462   : > { %v4521_v24 = vunpack.i.h.bf16 %v4519_v29  ;;  %v4520_v38 = vunpack.i.l.bf16 %v4519_v29  ;;  %v4496_v44 = vunpack.i.h.bf16 %v4494_v54  ;;  %v4495_v52 = vunpack.i.l.bf16 %v4494_v54 }
 0x463   : > { %v4211_v29 = vunpack.i.h.bf16 %v8714_v48  ;;  %v4210_v54 = vunpack.i.l.bf16 %v8714_v48  ;;  %v3345_v36 = vsel %vm268_vm2, %v8719_v26, %v4170_v23 }
 0x464   : > { %v3571_v33 = vsel %vm3548_vm15, %v3538_v55, %v4520_v38  ;;  %v3572_v20 = vsel %vm3548_vm15, %v3539_v6, %v4521_v24  ;;  %v3456_v41 = vsel %vm3449_vm12, %v3423_v12, %v4495_v52  ;;  %v3457_v39 = vsel %vm3449_vm12, %v3424_v13, %v4496_v44  ;;  %v8715_v24 = vld [vmem:[#allocation79_spill] sm:$0xff]  ;;  %v8716_v55 = vld [vmem:[#allocation110_spill] sm:$0xff] }
 0x465   : > { %v4055_v63 = vpack.c.bf16 %v3572_v20, %v3571_v33  ;;  %v7814_v61 = vpop.permute.xlu0 %4528  ;;  %v4504_v45 = vpop.permute.xlu1 %4503  ;;  %v3330_v38 = vsel %vm268_vm2, %v8715_v24, %v4131_v14  ;;  %v3329_v6 = vsel %vm268_vm2, %v8716_v55, %v4130_v57  ;;  %v8717_v33 = vld [vmem:[#allocation34_spill] sm:$0xff] }
 0x466   : > { %v4506_v9 = vunpack.i.h.bf16 %v4504_v45  ;;  %v4505_v10 = vunpack.i.l.bf16 %v4504_v45  ;;  %v4251_v20 = vunpack.i.h.bf16 %v8717_v33  ;;  %v4250_v1 = vunpack.i.l.bf16 %v8717_v33 }
 0x467   : > { %4057 = vmatprep.subr.msk.bf16.mxu1 %vm7537_vm4, %v4055_v63  ;;  %v8718_v63 = vld [vmem:[#allocation25_spill] sm:$0xff]  ;;  %v4531_v30 = vunpack.i.h.bf16 %v7814_v61  ;;  %v4530_v8 = vunpack.i.l.bf16 %v7814_v61  ;;  %v3362_v44 = vsel %vm1598_vm6, %v3330_v38, %v4211_v29  ;;  %v3361_v52 = vsel %vm1598_vm6, %v3329_v6, %v4210_v54 }
 0x468   : > { %v3489_v25 = vsel %vm3482_vm13, %v3456_v41, %v4505_v10  ;;  %v3490_v28 = vsel %vm3482_vm13, %v3457_v39, %v4506_v9  ;;  %v3346_v45 = vsel %vm268_vm2, %v8718_v63, %v4171_v5  ;;  %v3377_v49 = vsel %vm1598_vm6, %v3345_v36, %v4250_v1 }
 0x469   : > { %v7826_v58 = vpop.permute.xlu0 %4538  ;;  %v4514_v59 = vpop.permute.xlu1 %4513  ;;  %v4256_v9 = vunpack.i.h.bf16 %v8722_v7  ;;  %v4255_v61 = vunpack.i.l.bf16 %v8722_v7  ;;  %v3394_v17 = vsel %vm1664_vm8, %v3362_v44, %v4291_v51  ;;  %v3409_v12 = vsel %vm1664_vm8, %v3377_v49, %v4530_v8  ;;  %v8724_v44 = vld [vmem:[#allocation86_spill] sm:$0xff] }
 0x46a   : > { %v4516_v35 = vunpack.i.h.bf16 %v4514_v59  ;;  %v4515_v34 = vunpack.i.l.bf16 %v4514_v59  ;;  %v4541_v53 = vunpack.i.h.bf16 %v7826_v58  ;;  %v4540_v42 = vunpack.i.l.bf16 %v7826_v58 }
 0x46b   : > { %v3378_v59 = vsel %vm1598_vm6, %v3346_v45, %v4251_v20  ;;  %v3393_v58 = vsel %vm1664_vm8, %v3361_v52, %v4290_v56  ;;  %v3347_v52 = vsel %vm268_vm2, %v8724_v44, %v4175_v32 }
 0x46c   : > { %v3522_v46 = vsel %vm3515_vm14, %v3489_v25, %v4515_v34  ;;  %v3523_v27 = vsel %vm3515_vm14, %v3490_v28, %v4516_v35  ;;  %v3410_v13 = vsel %vm1664_vm8, %v3378_v59, %v4531_v30  ;;  %v3425_v41 = vsel %vm1730_vm10, %v3393_v58, %v4540_v42  ;;  %v8723_v30 = vld [vmem:[#allocation13_spill] sm:$0xff] }
 0x46d   : > { %v7836_v60 = vpop.permute.xlu0 %4548  ;;  %v4524_v40 = vpop.permute.xlu1 %4523  ;;  %v3426_v39 = vsel %vm1730_vm10, %v3394_v17, %v4541_v53  ;;  %v3348_v8 = vsel %vm268_vm2, %v8723_v30, %v4176_v0 }
 0x46e   : > { %v4526_v15 = vunpack.i.h.bf16 %v4524_v40  ;;  %v4525_v47 = vunpack.i.l.bf16 %v4524_v40  ;;  %v4551_v35 = vunpack.i.h.bf16 %v7836_v60  ;;  %v4550_v34 = vunpack.i.l.bf16 %v7836_v60 }
 0x470   : > { %v3555_v16 = vsel %vm3548_vm15, %v3522_v46, %v4525_v47  ;;  %v3556_v37 = vsel %vm3548_vm15, %v3523_v27, %v4526_v15  ;;  %v3458_v60 = vsel %vm3449_vm12, %v3425_v41, %v4550_v34  ;;  %v3459_v14 = vsel %vm3449_vm12, %v3426_v39, %v4551_v35 }
 0x471   : > { %v4058_v11 = vpack.c.bf16 %v3556_v37, %v3555_v16  ;;  %v4559_v2 = vpop.permute.xlu0 %4558  ;;  %v4534_v62 = vpop.permute.xlu1 %4533 }
 0x472   : > { %v4561_v40 = vunpack.i.h.bf16 %v4559_v2  ;;  %v4560_v25 = vunpack.i.l.bf16 %v4559_v2  ;;  %v4536_v28 = vunpack.i.h.bf16 %v4534_v62  ;;  %v4535_v15 = vunpack.i.l.bf16 %v4534_v62 }
 0x473   : > { %4060 = vmatpush3.bf16.xpose.msk.msra.mxu1 %vm7537_vm4, %v4058_v11 }
 0x474   : > { %v3491_v2 = vsel %vm3482_vm13, %v3458_v60, %v4560_v25  ;;  %v3492_v62 = vsel %vm3482_vm13, %v3459_v14, %v4561_v40  ;;  %v3442_v29 = vsel %vm1730_vm10, %v3410_v13, %v4536_v28  ;;  %v3441_v54 = vsel %vm1730_vm10, %v3409_v12, %v4535_v15 }
 0x475   : > { %v4569_v50 = vpop.permute.xlu0 %4568  ;;  %v4544_v22 = vpop.permute.xlu1 %4543 }
 0x476   : > { %v4571_v47 = vunpack.i.h.bf16 %v4569_v50  ;;  %v4570_v46 = vunpack.i.l.bf16 %v4569_v50  ;;  %v4546_v27 = vunpack.i.h.bf16 %v4544_v22  ;;  %v4545_v16 = vunpack.i.l.bf16 %v4544_v22 }
 0x478   : > { %v3524_v24 = vsel %vm3515_vm14, %v3491_v2, %v4570_v46  ;;  %v3525_v38 = vsel %vm3515_vm14, %v3492_v62, %v4571_v47  ;;  %v3474_v55 = vsel %vm3449_vm12, %v3441_v54, %v4545_v16  ;;  %v3475_v6 = vsel %vm3449_vm12, %v3442_v29, %v4546_v27  ;;  %v8726_v29 = vld [vmem:[#allocation45_spill] sm:$0xff] }
 0x479   : > { %v4579_v10 = vpop.permute.xlu0 %4578  ;;  %v4554_v4 = vpop.permute.xlu1 %4553  ;;  %v4216_v54 = vunpack.i.h.bf16 %v8726_v29 }
 0x47a   : > { %v4556_v57 = vunpack.i.h.bf16 %v4554_v4  ;;  %v4555_v11 = vunpack.i.l.bf16 %v4554_v4  ;;  %v4581_v19 = vunpack.i.h.bf16 %v4579_v10  ;;  %v4580_v5 = vunpack.i.l.bf16 %v4579_v10 }
 0x47b   : > { %v3380_v10 = vsel %vm1598_vm6, %v3348_v8, %v4256_v9  ;;  %v3379_v4 = vsel %vm1598_vm6, %v3347_v52, %v4255_v61 }
 0x47c   : > { %v3507_v1 = vsel %vm3482_vm13, %v3474_v55, %v4555_v11  ;;  %v3508_v50 = vsel %vm3482_vm13, %v3475_v6, %v4556_v57  ;;  %v3557_v45 = vsel %vm3548_vm15, %v3524_v24, %v4580_v5  ;;  %v3558_v26 = vsel %vm3548_vm15, %v3525_v38, %v4581_v19  ;;  %v8727_v38 = vld [vmem:[#allocation40_spill] sm:$0xff] }
 0x47d   : > { %v4589_v37 = vpop.permute.xlu0 %4588  ;;  %v4564_v21 = vpop.permute.xlu1 %4563  ;;  %v4064_v59 = vpack.c.bf16 %v3558_v26, %v3557_v45  ;;  %v4215_v24 = vunpack.i.l.bf16 %v8726_v29  ;;  %v4296_v55 = vunpack.i.h.bf16 %v8727_v38  ;;  %v4295_v6 = vunpack.i.l.bf16 %v8727_v38  ;;  %v8729_v45 = vld [vmem:[#allocation26_spill] sm:$0xff]  ;;  %v8737_v29 = vld [vmem:[#allocation88_spill] sm:$0xff] }
 0x47e   : > { %v4566_v23 = vunpack.i.h.bf16 %v4564_v21  ;;  %v4565_v48 = vunpack.i.l.bf16 %v4564_v21  ;;  %v4591_v58 = vunpack.i.h.bf16 %v4589_v37  ;;  %v4590_v17 = vunpack.i.l.bf16 %v4589_v37 }
 0x480   : > { %v3540_v36 = vsel %vm3515_vm14, %v3507_v1, %v4565_v48  ;;  %v3541_v18 = vsel %vm3515_vm14, %v3508_v50, %v4566_v23  ;;  %v8725_v48 = vld [vmem:[#allocation32_spill] sm:$0xff] }
 0x481   : > { %v4599_v33 = vpop.permute.xlu0 %4598  ;;  %v4574_v20 = vpop.permute.xlu1 %4573  ;;  %v4136_v2 = vunpack.i.h.bf16 %v8725_v48  ;;  %v4135_v62 = vunpack.i.l.bf16 %v8725_v48 }
 0x482   : > { %v4576_v22 = vunpack.i.h.bf16 %v4574_v20  ;;  %v4575_v63 = vunpack.i.l.bf16 %v4574_v20  ;;  %v4601_v35 = vunpack.i.h.bf16 %v4599_v33  ;;  %v4600_v0 = vunpack.i.l.bf16 %v4599_v33 }
 0x483   : > { %v3331_v26 = vsel %vm268_vm2, %v8729_v45, %v4135_v62 }
 0x484   : > { %v3573_v51 = vsel %vm3548_vm15, %v3540_v36, %v4575_v63  ;;  %v3574_v56 = vsel %vm3548_vm15, %v3541_v18, %v4576_v22  ;;  %v8728_v22 = vld [vmem:[#allocation23_spill] sm:$0xff] }
 0x485   : > { %v4061_v53 = vpack.c.bf16 %v3574_v56, %v3573_v51  ;;  %v4609_v42 = vpop.permute.xlu0 %4608  ;;  %v4584_v31 = vpop.permute.xlu1 %4583  ;;  %v3332_v63 = vsel %vm268_vm2, %v8728_v22, %v4136_v2  ;;  %v3363_v56 = vsel %vm1598_vm6, %v3331_v26, %v4215_v24  ;;  %v8736_v2 = vld [vmem:[#allocation37_spill] sm:$0xff]  ;;  %v8738_v24 = vld [vmem:[#allocation31_spill] sm:$0xff] }
 0x486   : > { %v4586_v49 = vunpack.i.h.bf16 %v4584_v31  ;;  %v4585_v7 = vunpack.i.l.bf16 %v4584_v31  ;;  %v4611_v41 = vunpack.i.h.bf16 %v4609_v42  ;;  %v4610_v39 = vunpack.i.l.bf16 %v4609_v42  ;;  %v8739_v22 = vld [vmem:[#allocation27_spill] sm:$0xff] }
 0x487   : > { %4063 = vmatprep.subr.msk.bf16.mxu1 %vm7537_vm4, %v4061_v53  ;;  %v3364_v51 = vsel %vm1598_vm6, %v3332_v63, %v4216_v54  ;;  %v3395_v42 = vsel %vm1664_vm8, %v3363_v56, %v4295_v6  ;;  %v4301_v38 = vunpack.i.h.bf16 %v8738_v24  ;;  %v4186_v63 = vunpack.i.h.bf16 %v8739_v22 }
 0x488   : > { %v3412_v34 = vsel %vm1664_vm8, %v3380_v10, %v4586_v49  ;;  %v3411_v12 = vsel %vm1664_vm8, %v3379_v4, %v4585_v7  ;;  %4066 = vmatpush3.bf16.xpose.msk.msra.mxu1 %vm7537_vm4, %v4064_v59  ;;  %v3396_v53 = vsel %vm1664_vm8, %v3364_v51, %v4296_v55  ;;  %v4300_v55 = vunpack.i.l.bf16 %v8738_v24 }
 0x489   : > { %v3444_v32 = vsel %vm1730_vm10, %v3412_v34, %v4591_v58  ;;  %v3443_v9 = vsel %vm1730_vm10, %v3411_v12, %v4590_v17  ;;  %v4619_v13 = vpop.permute.xlu0 %4618  ;;  %v4594_v61 = vpop.permute.xlu1 %4593  ;;  %v4185_v45 = vunpack.i.l.bf16 %v8739_v22 }
 0x48a   : > { %v3476_v40 = vsel %vm3449_vm12, %v3443_v9, %v4600_v0  ;;  %v3477_v25 = vsel %vm3449_vm12, %v3444_v32, %v4601_v35  ;;  %v4621_v28 = vunpack.i.h.bf16 %v4619_v13  ;;  %v4620_v15 = vunpack.i.l.bf16 %v4619_v13 }
 0x48b   : > { %v3509_v47 = vsel %vm3482_vm13, %v3476_v40, %v4610_v39  ;;  %v3510_v46 = vsel %vm3482_vm13, %v3477_v25, %v4611_v41  ;;  %v4596_v33 = vunpack.i.h.bf16 %v4594_v61  ;;  %v4595_v20 = vunpack.i.l.bf16 %v4594_v61  ;;  %v8730_v61 = vld [vmem:[#allocation16_spill] sm:$0xff] }
 0x48c   : > { %v3542_v60 = vsel %vm3515_vm14, %v3509_v47, %v4620_v15  ;;  %v3543_v14 = vsel %vm3515_vm14, %v3510_v46, %v4621_v28  ;;  %v4141_v41 = vunpack.i.h.bf16 %v8730_v61  ;;  %v4140_v39 = vunpack.i.l.bf16 %v8730_v61  ;;  %v8731_v28 = vld [vmem:[#allocation39_spill] sm:$0xff]  ;;  %v8732_v46 = vld [vmem:[#allocation24_spill] sm:$0xff] }
 0x48d   : > { %v4629_v27 = vpop.permute.xlu0 %4628  ;;  %v4604_v16 = vpop.permute.xlu1 %4603  ;;  %v3427_v52 = vsel %vm1730_vm10, %v3395_v42, %v4595_v20  ;;  %v3428_v59 = vsel %vm1730_vm10, %v3396_v53, %v4596_v33  ;;  %v4181_v15 = vunpack.i.h.bf16 %v8731_v28  ;;  %v4180_v47 = vunpack.i.l.bf16 %v8731_v28 }
 0x48e   : > { %v4631_v37 = vunpack.i.h.bf16 %v4629_v27  ;;  %v4630_v21 = vunpack.i.l.bf16 %v4629_v27  ;;  %v4606_v36 = vunpack.i.h.bf16 %v4604_v16  ;;  %v4605_v18 = vunpack.i.l.bf16 %v4604_v16 }
 0x48f   : > { %v4221_v27 = vunpack.i.h.bf16 %v8732_v46  ;;  %v4220_v16 = vunpack.i.l.bf16 %v8732_v46  ;;  %v3350_v62 = vsel %vm268_vm2, %v8736_v2, %v4181_v15  ;;  %v3349_v54 = vsel %vm268_vm2, %v8737_v29, %v4180_v47 }
 0x490   : > { %v3575_v57 = vsel %vm3548_vm15, %v3542_v60, %v4630_v21  ;;  %v3576_v11 = vsel %vm3548_vm15, %v3543_v14, %v4631_v37  ;;  %v3460_v7 = vsel %vm3449_vm12, %v3427_v52, %v4605_v18  ;;  %v3461_v10 = vsel %vm3449_vm12, %v3428_v59, %v4606_v36  ;;  %v8733_v21 = vld [vmem:[#allocation21_spill] sm:$0xff]  ;;  %v8734_v14 = vld [vmem:[#allocation84_spill] sm:$0xff] }
 0x491   : > { %v4067_v19 = vpack.c.bf16 %v3576_v11, %v3575_v57  ;;  %v7924_v5 = vpop.permute.xlu0 %4638  ;;  %v4614_v23 = vpop.permute.xlu1 %4613  ;;  %v3334_v60 = vsel %vm268_vm2, %v8733_v21, %v4141_v41  ;;  %v3333_v57 = vsel %vm268_vm2, %v8734_v14, %v4140_v39  ;;  %v8735_v11 = vld [vmem:[#allocation43_spill] sm:$0xff] }
 0x492   : > { %v4616_v30 = vunpack.i.h.bf16 %v4614_v23  ;;  %v4615_v8 = vunpack.i.l.bf16 %v4614_v23  ;;  %v4260_v23 = vunpack.i.l.bf16 %v8735_v11  ;;  %v4641_v6 = vunpack.i.h.bf16 %v7924_v5 }
 0x493   : > { %4069 = vmatprep.subr.msk.bf16.mxu1 %vm7537_vm4, %v4067_v19  ;;  %v4261_v19 = vunpack.i.h.bf16 %v8735_v11  ;;  %v4640_v33 = vunpack.i.l.bf16 %v7924_v5  ;;  %v3366_v26 = vsel %vm1598_vm6, %v3334_v60, %v4221_v27  ;;  %v3365_v36 = vsel %vm1598_vm6, %v3333_v57, %v4220_v16 }
 0x494   : > { %v3493_v58 = vsel %vm3482_vm13, %v3460_v7, %v4615_v8  ;;  %v3494_v17 = vsel %vm3482_vm13, %v3461_v10, %v4616_v30  ;;  %v3381_v56 = vsel %vm1598_vm6, %v3349_v54, %v4260_v23  ;;  %v8740_v30 = vld [vmem:[#allocation33_spill] sm:$0xff]  ;;  %v3398_v42 = vsel %vm1664_vm8, %v3366_v26, %v4301_v38  ;;  %v8741_v38 = vld [vmem:[#allocation80_spill] sm:$0xff] }
 0x495   : > { %v7934_v1 = vpop.permute.xlu0 %4648  ;;  %v4624_v50 = vpop.permute.xlu1 %4623  ;;  %v3382_v51 = vsel %vm1598_vm6, %v3350_v62, %v4261_v19  ;;  %v4266_v8 = vunpack.i.h.bf16 %v8740_v30  ;;  %v4265_v5 = vunpack.i.l.bf16 %v8740_v30  ;;  %v3413_v52 = vsel %vm1664_vm8, %v3381_v56, %v4640_v33 }
 0x496   : > { %v4626_v31 = vunpack.i.h.bf16 %v4624_v50  ;;  %v4625_v44 = vunpack.i.l.bf16 %v4624_v50  ;;  %v4651_v20 = vunpack.i.h.bf16 %v7934_v1  ;;  %v4650_v50 = vunpack.i.l.bf16 %v7934_v1 }
 0x497   : > { %v3397_v1 = vsel %vm1664_vm8, %v3365_v36, %v4300_v55  ;;  %v3414_v59 = vsel %vm1664_vm8, %v3382_v51, %v4641_v6  ;;  %v3352_v55 = vsel %vm268_vm2, %v8741_v38, %v4186_v63 }
 0x498   : > { %v3526_v34 = vsel %vm3515_vm14, %v3493_v58, %v4625_v44  ;;  %v3527_v12 = vsel %vm3515_vm14, %v3494_v17, %v4626_v31  ;;  %v3429_v7 = vsel %vm1730_vm10, %v3397_v1, %v4650_v50  ;;  %v3430_v10 = vsel %vm1730_vm10, %v3398_v42, %v4651_v20  ;;  %v8742_v50 = vld [vmem:[#allocation167_spill] sm:$0xff] }
 0x499   : > { %v7946_v49 = vpop.permute.xlu0 %4658  ;;  %v3351_v22 = vsel %vm268_vm2, %v8742_v50, %v4185_v45  ;;  %v3384_v26 = vsel %vm1598_vm6, %v3352_v55, %v4266_v8 }
 0x49a   : > { %v4634_v4 = vpop.permute.xlu1 %4633  ;;  %v4661_v31 = vunpack.i.h.bf16 %v7946_v49  ;;  %v4660_v44 = vunpack.i.l.bf16 %v7946_v49  ;;  %v3383_v51 = vsel %vm1598_vm6, %v3351_v22, %v4265_v5 }
 0x49b   : > { %v4636_v35 = vunpack.i.h.bf16 %v4634_v4  ;;  %v4635_v0 = vunpack.i.l.bf16 %v4634_v4 }
 0x49c   : > { %v3462_v61 = vsel %vm3449_vm12, %v3429_v7, %v4660_v44  ;;  %v3463_v41 = vsel %vm3449_vm12, %v3430_v10, %v4661_v31 }
 0x49d   : > { %v3559_v32 = vsel %vm3548_vm15, %v3526_v34, %v4635_v0  ;;  %v3560_v9 = vsel %vm3548_vm15, %v3527_v12, %v4636_v35  ;;  %v7956_v13 = vpop.permute.xlu0 %4668 }
 0x49e   : > { %v4070_v40 = vpack.c.bf16 %v3560_v9, %v3559_v32  ;;  %v4644_v25 = vpop.permute.xlu1 %4643  ;;  %v4671_v4 = vunpack.i.h.bf16 %v7956_v13  ;;  %v4670_v58 = vunpack.i.l.bf16 %v7956_v13 }
 0x49f   : > { %v4646_v17 = vunpack.i.h.bf16 %v4644_v25  ;;  %v4645_v35 = vunpack.i.l.bf16 %v4644_v25 }
 0x4a0   : > { %4072 = vmatpush3.bf16.xpose.msk.msra.mxu1 %vm7537_vm4, %v4070_v40  ;;  %v3495_v13 = vsel %vm3482_vm13, %v3462_v61, %v4670_v58  ;;  %v3496_v25 = vsel %vm3482_vm13, %v3463_v41, %v4671_v4 }
 0x4a1   : > { %v4679_v37 = vpop.permute.xlu0 %4678  ;;  %v3446_v27 = vsel %vm1730_vm10, %v3414_v59, %v4646_v17  ;;  %v3445_v16 = vsel %vm1730_vm10, %v3413_v52, %v4645_v35 }
 0x4a2   : > { %v4654_v48 = vpop.permute.xlu1 %4653  ;;  %v4681_v34 = vunpack.i.h.bf16 %v4679_v37  ;;  %v4680_v12 = vunpack.i.l.bf16 %v4679_v37 }
 0x4a3   : > { %v4656_v32 = vunpack.i.h.bf16 %v4654_v48  ;;  %v4655_v9 = vunpack.i.l.bf16 %v4654_v48 }
 0x4a4   : > { %v3528_v21 = vsel %vm3515_vm14, %v3495_v13, %v4680_v12  ;;  %v3529_v60 = vsel %vm3515_vm14, %v3496_v25, %v4681_v34  ;;  %v8744_v25 = vld [vmem:[#allocation89_spill] sm:$0xff] }
 0x4a5   : > { %v4689_v18 = vpop.permute.xlu0 %4688  ;;  %v3478_v14 = vsel %vm3449_vm12, %v3445_v16, %v4655_v9  ;;  %v3479_v57 = vsel %vm3449_vm12, %v3446_v27, %v4656_v32  ;;  %v4226_v27 = vunpack.i.h.bf16 %v8744_v25  ;;  %v4225_v16 = vunpack.i.l.bf16 %v8744_v25 }
 0x4a6   : > { %v4664_v53 = vpop.permute.xlu1 %4663  ;;  %v4691_v28 = vunpack.i.h.bf16 %v4689_v18  ;;  %v4690_v15 = vunpack.i.l.bf16 %v4689_v18 }
 0x4a7   : > { %v4666_v39 = vunpack.i.h.bf16 %v4664_v53  ;;  %v4665_v40 = vunpack.i.l.bf16 %v4664_v53 }
 0x4a8   : > { %v3561_v62 = vsel %vm3548_vm15, %v3528_v21, %v4690_v15  ;;  %v3562_v29 = vsel %vm3548_vm15, %v3529_v60, %v4691_v28  ;;  %v8743_v15 = vld [vmem:[#allocation41_spill] sm:$0xff] }
 0x4a9   : > { %v4699_v0 = vpop.permute.xlu0 %4698  ;;  %v3511_v19 = vsel %vm3482_vm13, %v3478_v14, %v4665_v40  ;;  %v3512_v23 = vsel %vm3482_vm13, %v3479_v57, %v4666_v39  ;;  %v4076_v56 = vpack.c.bf16 %v3562_v29, %v3561_v62 }
 0x4aa   : > { %v4674_v49 = vpop.permute.xlu1 %4673  ;;  %v4701_v1 = vunpack.i.h.bf16 %v4699_v0  ;;  %v4700_v42 = vunpack.i.l.bf16 %v4699_v0 }
 0x4ab   : > { %v4676_v47 = vunpack.i.h.bf16 %v4674_v49  ;;  %v4675_v46 = vunpack.i.l.bf16 %v4674_v49 }
 0x4ad   : > { %v4709_v37 = vpop.permute.xlu0 %4708  ;;  %v3544_v54 = vsel %vm3515_vm14, %v3511_v19, %v4675_v46  ;;  %v3545_v24 = vsel %vm3515_vm14, %v3512_v23, %v4676_v47  ;;  %v4146_v47 = vunpack.i.h.bf16 %v8743_v15  ;;  %v4145_v46 = vunpack.i.l.bf16 %v8743_v15  ;;  %v8747_v23 = vld [vmem:[#allocation35_spill] sm:$0xff] }
 0x4ae   : > { %v4684_v11 = vpop.permute.xlu1 %4683  ;;  %v4711_v44 = vunpack.i.h.bf16 %v4709_v37  ;;  %v4710_v52 = vunpack.i.l.bf16 %v4709_v37  ;;  %v8745_v37 = vld [vmem:[#allocation49_spill] sm:$0xff] }
 0x4af   : > { %v4686_v48 = vunpack.i.h.bf16 %v4684_v11  ;;  %v4685_v2 = vunpack.i.l.bf16 %v4684_v11  ;;  %v4306_v21 = vunpack.i.h.bf16 %v8745_v37  ;;  %v4305_v60 = vunpack.i.l.bf16 %v8745_v37  ;;  %v8746_v11 = vld [vmem:[#allocation83_spill] sm:$0xff] }
 0x4b0   : > { %v3336_v19 = vsel %vm268_vm2, %v8746_v11, %v4146_v47 }
 0x4b1   : > { %v3577_v6 = vsel %vm3548_vm15, %v3544_v54, %v4685_v2  ;;  %v3578_v33 = vsel %vm3548_vm15, %v3545_v24, %v4686_v48  ;;  %v4719_v20 = vpop.permute.xlu0 %4718  ;;  %v3335_v48 = vsel %vm268_vm2, %v8747_v23, %v4145_v46  ;;  %v3368_v54 = vsel %vm1598_vm6, %v3336_v19, %v4226_v27 }
 0x4b2   : > { %v4073_v36 = vpack.c.bf16 %v3578_v33, %v3577_v6  ;;  %v4694_v18 = vpop.permute.xlu1 %4693  ;;  %v4721_v63 = vunpack.i.h.bf16 %v4719_v20  ;;  %v4720_v31 = vunpack.i.l.bf16 %v4719_v20  ;;  %v3367_v24 = vsel %vm1598_vm6, %v3335_v48, %v4225_v16 }
 0x4b3   : > { %v4696_v30 = vunpack.i.h.bf16 %v4694_v18  ;;  %v4695_v53 = vunpack.i.l.bf16 %v4694_v18  ;;  %v3400_v6 = vsel %vm1664_vm8, %v3368_v54, %v4306_v21  ;;  %v3399_v33 = vsel %vm1664_vm8, %v3367_v24, %v4305_v60 }
 0x4b4   : > { %4075 = vmatprep.subr.msk.bf16.mxu1 %vm7537_vm4, %v4073_v36 }
 0x4b5   : > { %v3416_v45 = vsel %vm1664_vm8, %v3384_v26, %v4696_v30  ;;  %v3415_v8 = vsel %vm1664_vm8, %v3383_v51, %v4695_v53  ;;  %4078 = vmatpush3.bf16.xpose.msk.msra.mxu1 %vm7537_vm4, %v4076_v56  ;;  %v4729_v5 = vpop.permute.xlu0 %4728 }
 0x4b6   : > { %v3448_v59 = vsel %vm1730_vm10, %v3416_v45, %v4701_v1  ;;  %v3447_v7 = vsel %vm1730_vm10, %v3415_v8, %v4700_v42  ;;  %v4704_v10 = vpop.permute.xlu1 %4703  ;;  %v4731_v4 = vunpack.i.h.bf16 %v4729_v5  ;;  %v4730_v58 = vunpack.i.l.bf16 %v4729_v5 }
 0x4b7   : > { %v3480_v17 = vsel %vm3449_vm12, %v3447_v7, %v4710_v52  ;;  %v3481_v35 = vsel %vm3449_vm12, %v3448_v59, %v4711_v44  ;;  %v4706_v14 = vunpack.i.h.bf16 %v4704_v10  ;;  %v4705_v57 = vunpack.i.l.bf16 %v4704_v10 }
 0x4b8   : > { %v3513_v0 = vsel %vm3482_vm13, %v3480_v17, %v4720_v31  ;;  %v3514_v34 = vsel %vm3482_vm13, %v3481_v35, %v4721_v63 }
 0x4b9   : > { %v4739_v12 = vpop.permute.xlu0 %4738  ;;  %v3546_v61 = vsel %vm3515_vm14, %v3513_v0, %v4730_v58  ;;  %v3547_v41 = vsel %vm3515_vm14, %v3514_v34, %v4731_v4  ;;  %v3431_v22 = vsel %vm1730_vm10, %v3399_v33, %v4705_v57  ;;  %v3432_v26 = vsel %vm1730_vm10, %v3400_v6, %v4706_v14 }
 0x4ba   : > { %v4741_v32 = vunpack.i.h.bf16 %v4739_v12  ;;  %v4740_v9 = vunpack.i.l.bf16 %v4739_v12  ;;  %v4714_v49 = vpop.permute.xlu1 %4713 }
 0x4bb   : > { %v4716_v2 = vunpack.i.h.bf16 %v4714_v49  ;;  %v4715_v62 = vunpack.i.l.bf16 %v4714_v49 }
 0x4bc   : > { %v3579_v39 = vsel %vm3548_vm15, %v3546_v61, %v4740_v9  ;;  %v3580_v40 = vsel %vm3548_vm15, %v3547_v41, %v4741_v32 }
 0x4bd   : > { %v4079_v28 = vpack.c.bf16 %v3580_v40, %v3579_v39  ;;  %v3464_v36 = vsel %vm3449_vm12, %v3431_v22, %v4715_v62  ;;  %v3465_v18 = vsel %vm3449_vm12, %v3432_v26, %v4716_v2 }
 0x4be   : > { %v4724_v13 = vpop.permute.xlu1 %4723 }
 0x4bf   : > { %4081 = vmatprep.subr.msk.bf16.mxu1 %vm7537_vm4, %v4079_v28  ;;  %v4726_v38 = vunpack.i.h.bf16 %v4724_v13  ;;  %v4725_v55 = vunpack.i.l.bf16 %v4724_v13 }
 0x4c1   : > { %v3497_v56 = vsel %vm3482_vm13, %v3464_v36, %v4725_v55  ;;  %v3498_v30 = vsel %vm3482_vm13, %v3465_v18, %v4726_v38 }
 0x4c2   : > { %v4734_v29 = vpop.permute.xlu1 %4733 }
 0x4c3   : > { %v4736_v20 = vunpack.i.h.bf16 %v4734_v29  ;;  %v4735_v50 = vunpack.i.l.bf16 %v4734_v29 }
 0x4c5   : > { %v3530_v42 = vsel %vm3515_vm14, %v3497_v56, %v4735_v50  ;;  %v3531_v63 = vsel %vm3515_vm14, %v3498_v30, %v4736_v20 }
 0x4c6   : > { %v4744_v51 = vpop.permute.xlu1 %4743 }
 0x4c7   : > { %v4746_v53 = vunpack.i.h.bf16 %v4744_v51  ;;  %v4745_v1 = vunpack.i.l.bf16 %v4744_v51 }
 0x4c9   : > { %v3563_v31 = vsel %vm3548_vm15, %v3530_v42, %v4745_v1  ;;  %v3564_v44 = vsel %vm3548_vm15, %v3531_v63, %v4746_v53 }
 0x4ca   : > { %v4082_v52 = vpack.c.bf16 %v3564_v44, %v3563_v31  ;;  %v3586_v45 = vpop.permute.xlu0 %3585 }
 0x4cc   : > { %4084 = vmatpush3.bf16.xpose.msk.msra.mxu1 %vm7537_vm4, %v4082_v52 }
 0x4d3   : > { %3970 = vmatmul.mubr.msk.f32.vlgmr.msra.gmra.mrb[0].mxu1 %vm3588_vm0, %v7742_v3 }
 0x5a6   : > { %v3754_v8 = vpop.f32.mrb[0].mxu1 }
 0x5a7   : > { %v3755_v5 = vadd.f32 %v3754_v8, %v3586_v45  ;;  %v3756_v59 = vpop.f32.mrb[1].mxu1 }
 0x5a8   : > { %v3757_v7 = vadd.f32 %v3756_v59, %v3586_v45 }
 0x5a9   : > { %v3759_v10 = vmul.f32 0.01, %v3755_v5 }
 0x5aa   : > { %v3760_v4 = vmul.f32 0.01, %v3757_v7 }
 0x5ab   : > { %v3761_v58 = vmax.f32 %v3755_v5, %v3759_v10 }
 0x5ac   : > { %v3762_v17 = vmax.f32 %v3757_v7, %v3760_v4 }
 0x5ad   : > { %3763 = vst [vmem:[%s224_s8] sm:$0xff] %v3761_v58 }
 0x5ae   : > { %3764 = vst [vmem:[%s224_s8 + $0x8] sm:$0xff] %v3762_v17 }
 0x5af PF: > { %s15_s18 = sadd.s32 1, %s4782_s18  }
 0x5b0   : > { %p12_p4 = scmp.ge.s32.totalorder %s15_s18, 4  }
 0x5b2   :  { %14 = sbr.rel (!%p12_p4) target bundleno = 1 (0x1), region = 74 }

</bundles_post_ra>
